<compile_context>
chip_gen: v6e
topology: v6e:2x2x1
jax: 0.10.0
libtpu: 0.0.40
codegen_flags: <defaults>
</compile_context>

<pallas_src>
import functools

import jax
import jax.numpy as jnp
from jax.experimental import pallas as pl
from jax.experimental.pallas import tpu as pltpu


def _make_kernel(num_layers, B_pad, T, H, compute_dtype):
    L = num_layers

    def kernel(x_ref, *rest):
        out_ref = rest[-1]
        prefs = rest[:-1]

        # Per-layer, per-gate params.  Static leading-axis indexing -> no lane shuffles.
        #   wih[l][k]: (in_dim_l, H)   whh[l][k]: (H, H)   bias[l][k]: (B_pad, H) f32
        wih = [[prefs[3 * l + 0][k] for k in range(4)] for l in range(L)]
        whh = [[prefs[3 * l + 1][k] for k in range(4)] for l in range(L)]
        bias = [[prefs[3 * l + 2][k] for k in range(4)] for l in range(L)]
        w_fc = prefs[3 * L + 0][...]      # (H, O_pad)    compute_dtype
        b_fc = prefs[3 * L + 1][...]      # (B_pad, O_pad) f32

        def step(t, carry):
            hs, cs = carry
            inp = x_ref[t].astype(compute_dtype)        # (B_pad, D) dynamic leading-axis index
            new_hs, new_cs = [], []
            for l in range(L):
                h_prev = hs[l]                           # f32 carry
                c_prev = cs[l]
                h_mx = h_prev.astype(compute_dtype)      # MXU operand only

                def gate(k, _l=l, _inp=inp, _h=h_mx):
                    # One lane-aligned (B_pad, H) pre-activation per gate; f32 accumulate.
                    return (jnp.dot(_inp, wih[_l][k], preferred_element_type=jnp.float32)
                            + jnp.dot(_h, whh[_l][k], preferred_element_type=jnp.float32)
                            + bias[_l][k])

                i_g = jax.nn.sigmoid(gate(0))
                f_g = jax.nn.sigmoid(gate(1))
                g_g = jnp.tanh(gate(2))
                o_g = jax.nn.sigmoid(gate(3))
                c_new = f_g * c_prev + i_g * g_g         # f32 cell state
                h_new = o_g * jnp.tanh(c_new)            # f32 hidden state
                new_hs.append(h_new)
                new_cs.append(c_new)
                inp = h_new.astype(compute_dtype)        # stacked LSTM: feed layer l+1
            return (tuple(new_hs), tuple(new_cs))

        # h0 = c0 = zeros, matching the PyTorch forward().
        init = (tuple(jnp.zeros((B_pad, H), jnp.float32) for _ in range(L)),
                tuple(jnp.zeros((B_pad, H), jnp.float32) for _ in range(L)))
        # Fully unroll the (static, tiny) time loop for scheduler visibility.
        hs, _ = jax.lax.fori_loop(0, T, step, init, unroll=True)

        # fc on the last timestep's top-layer hidden state; (B_pad, O_pad) is a lane-dense store.
        out_ref[...] = (jnp.dot(hs[L - 1].astype(compute_dtype), w_fc,
                                preferred_element_type=jnp.float32)
                        + b_fc).astype(out_ref.dtype)

    return kernel


def _pack_params(params, num_layers, hidden_dim, output_dim, B_pad, O_pad, compute_dtype):
    """Split the 4H gate axis per gate (lane-aligned at offset 0), pre-broadcast biases,
    pad the fc weights/bias to a 128-lane output, and cast MXU operands to compute_dtype."""
    H = hidden_dim
    packed = []
    for l in range(num_layers):
        w_ih = params[f"w_ih_{l}"]        # (in_dim, 4H)
        w_hh = params[f"w_hh_{l}"]        # (H, 4H)
        b = params[f"b_{l}"]              # (1, 4H)  (b_ih + b_hh pre-summed)
        w_ih_g = jnp.stack([w_ih[:, k * H:(k + 1) * H] for k in range(4)],
                           axis=0).astype(compute_dtype)          # (4, in_dim, H)
        w_hh_g = jnp.stack([w_hh[:, k * H:(k + 1) * H] for k in range(4)],
                           axis=0).astype(compute_dtype)          # (4, H, H)
        b_g = jnp.stack([jnp.broadcast_to(b[:, k * H:(k + 1) * H], (B_pad, H))
                         for k in range(4)], axis=0).astype(jnp.float32)  # (4, B_pad, H)
        packed.extend([w_ih_g, w_hh_g, b_g])

    w_fc = params["w_fc"]                 # (H, O)
    b_fc = params["b_fc"]                 # (1, O)
    w_fc_pad = (jnp.zeros((H, O_pad), jnp.float32)
                .at[:, :output_dim].set(w_fc)).astype(compute_dtype)       # (H, O_pad)
    b_fc_pad = (jnp.zeros((B_pad, O_pad), jnp.float32)
                .at[:, :output_dim].set(jnp.broadcast_to(b_fc, (B_pad, output_dim))))
    packed.extend([w_fc_pad, b_fc_pad])
    return packed


def prediction_model_forward(x_btd, params, *, num_layers, hidden_dim, output_dim,
                             compute_dtype=jnp.bfloat16):
    """x_btd: (B, T, input_dim) float32 — same axis convention as the PyTorch module."""
    B, T, D = x_btd.shape
    H, O, L = hidden_dim, output_dim, num_layers

    B_pad = max(8, ((B + 7) // 8) * 8)            # fill sublanes
    O_pad = max(128, ((O + 127) // 128) * 128)    # lane-dense output store

    # Pad batch and go time-major.  (Tiny here; for large T*B keep data time-major upstream
    # or stream x over a T grid axis instead of this wrapper transpose.)
    x_pad = jnp.zeros((B_pad, T, D), x_btd.dtype).at[:B].set(x_btd)
    x_tbd = jnp.transpose(x_pad, (1, 0, 2))       # (T, B_pad, D)

    flat_params = _pack_params(params, L, H, O, B_pad, O_pad, compute_dtype)
    kernel = _make_kernel(L, B_pad, T, H, compute_dtype)

    n_in = 1 + len(flat_params)
    vmem_spec = pl.BlockSpec(memory_space=pltpu.MemorySpace.VMEM)

    out_pad = pl.pallas_call(
        kernel,
        out_shape=jax.ShapeDtypeStruct((B_pad, O_pad), jnp.float32),
        in_specs=[vmem_spec] * n_in,
        out_specs=vmem_spec,
    )(x_tbd, *flat_params)
    return out_pad[:B, :O]


def init_params(key, input_dim, hidden_dim, num_layers, output_dim):
    """Deterministic init mimicking PyTorch's U(-1/sqrt(H), 1/sqrt(H)). Weights are stored
    transposed ((in, 4H)) relative to PyTorch ((4H, in)); b_ih and b_hh are pre-summed."""
    H = hidden_dim
    k = 1.0 / jnp.sqrt(jnp.float32(H))
    params = {}
    for l in range(num_layers):
        in_dim = input_dim if l == 0 else H
        key, k1, k2, k3, k4 = jax.random.split(key, 5)
        params[f"w_ih_{l}"] = jax.random.uniform(k1, (in_dim, 4 * H), jnp.float32, -k, k)
        params[f"w_hh_{l}"] = jax.random.uniform(k2, (H, 4 * H), jnp.float32, -k, k)
        b_ih = jax.random.uniform(k3, (1, 4 * H), jnp.float32, -k, k)
        b_hh = jax.random.uniform(k4, (1, 4 * H), jnp.float32, -k, k)
        params[f"b_{l}"] = b_ih + b_hh
    key, k5, k6 = jax.random.split(key, 3)
    kf = 1.0 / jnp.sqrt(jnp.float32(H))
    params["w_fc"] = jax.random.uniform(k5, (H, output_dim), jnp.float32, -kf, kf)
    params["b_fc"] = jax.random.uniform(k6, (1, output_dim), jnp.float32, -kf, kf)
    return params


if __name__ == "__main__":
    # Small shapes consistent with the module: batch=2, seq=8, input_dim=8,
    # hidden_dim=32, num_layers=2, output_dim=4.
    B, T, D = 2, 8, 8
    H, L, O = 32, 2, 4

    root = jax.random.PRNGKey(0)
    kx, kp = jax.random.split(root)
    x = jax.random.normal(kx, (B, T, D), jnp.float32)
    params = init_params(kp, D, H, L, O)

    fwd = jax.jit(functools.partial(prediction_model_forward,
                                    num_layers=L, hidden_dim=H, output_dim=O))
    out = fwd(x, params)
    out = jax.block_until_ready(out)
    assert out.shape == (B, O), out.shape
    assert bool(jnp.all(jnp.isfinite(out)))
    print("KERNEL_OK")
</pallas_src>

<mosaic_0001>
module attributes {stable_mosaic.version = 11 : i64} {
  func.func @kernel(%arg0: memref<8x8x8xf32, #tpu.memory_space<vmem>>, %arg1: memref<4x8x32xbf16, #tpu.memory_space<vmem>>, %arg2: memref<4x32x32xbf16, #tpu.memory_space<vmem>>, %arg3: memref<4x8x32xf32, #tpu.memory_space<vmem>>, %arg4: memref<4x32x32xbf16, #tpu.memory_space<vmem>>, %arg5: memref<4x32x32xbf16, #tpu.memory_space<vmem>>, %arg6: memref<4x8x32xf32, #tpu.memory_space<vmem>>, %arg7: memref<32x128xbf16, #tpu.memory_space<vmem>>, %arg8: memref<8x128xf32, #tpu.memory_space<vmem>>, %arg9: memref<8x128xf32, #tpu.memory_space<vmem>>) attributes {dimension_semantics = [], scalar_prefetch = 0 : i64, scratch_operands = 0 : i64, tpu.core_type = #tpu.core_type<tc>} {
    %c0 = arith.constant 0 : index
    %c0_0 = arith.constant 0 : index
    %c0_1 = arith.constant 0 : index
    %0 = vector.load %arg1[%c0, %c0_0, %c0_1] : memref<4x8x32xbf16, #tpu.memory_space<vmem>>, vector<1x8x32xbf16>
    %1 = vector.shape_cast %0 : vector<1x8x32xbf16> to vector<8x32xbf16>
    %c1 = arith.constant 1 : index
    %c0_2 = arith.constant 0 : index
    %c0_3 = arith.constant 0 : index
    %2 = vector.load %arg1[%c1, %c0_2, %c0_3] : memref<4x8x32xbf16, #tpu.memory_space<vmem>>, vector<1x8x32xbf16>
    %3 = vector.shape_cast %2 : vector<1x8x32xbf16> to vector<8x32xbf16>
    %c2 = arith.constant 2 : index
    %c0_4 = arith.constant 0 : index
    %c0_5 = arith.constant 0 : index
    %4 = vector.load %arg1[%c2, %c0_4, %c0_5] : memref<4x8x32xbf16, #tpu.memory_space<vmem>>, vector<1x8x32xbf16>
    %5 = vector.shape_cast %4 : vector<1x8x32xbf16> to vector<8x32xbf16>
    %c3 = arith.constant 3 : index
    %c0_6 = arith.constant 0 : index
    %c0_7 = arith.constant 0 : index
    %6 = vector.load %arg1[%c3, %c0_6, %c0_7] : memref<4x8x32xbf16, #tpu.memory_space<vmem>>, vector<1x8x32xbf16>
    %7 = vector.shape_cast %6 : vector<1x8x32xbf16> to vector<8x32xbf16>
    %c0_8 = arith.constant 0 : index
    %c0_9 = arith.constant 0 : index
    %c0_10 = arith.constant 0 : index
    %8 = vector.load %arg4[%c0_8, %c0_9, %c0_10] : memref<4x32x32xbf16, #tpu.memory_space<vmem>>, vector<1x32x32xbf16>
    %9 = vector.shape_cast %8 : vector<1x32x32xbf16> to vector<32x32xbf16>
    %c1_11 = arith.constant 1 : index
    %c0_12 = arith.constant 0 : index
    %c0_13 = arith.constant 0 : index
    %10 = vector.load %arg4[%c1_11, %c0_12, %c0_13] : memref<4x32x32xbf16, #tpu.memory_space<vmem>>, vector<1x32x32xbf16>
    %11 = vector.shape_cast %10 : vector<1x32x32xbf16> to vector<32x32xbf16>
    %c2_14 = arith.constant 2 : index
    %c0_15 = arith.constant 0 : index
    %c0_16 = arith.constant 0 : index
    %12 = vector.load %arg4[%c2_14, %c0_15, %c0_16] : memref<4x32x32xbf16, #tpu.memory_space<vmem>>, vector<1x32x32xbf16>
    %13 = vector.shape_cast %12 : vector<1x32x32xbf16> to vector<32x32xbf16>
    %c3_17 = arith.constant 3 : index
    %c0_18 = arith.constant 0 : index
    %c0_19 = arith.constant 0 : index
    %14 = vector.load %arg4[%c3_17, %c0_18, %c0_19] : memref<4x32x32xbf16, #tpu.memory_space<vmem>>, vector<1x32x32xbf16>
    %15 = vector.shape_cast %14 : vector<1x32x32xbf16> to vector<32x32xbf16>
    %c0_20 = arith.constant 0 : index
    %c0_21 = arith.constant 0 : index
    %c0_22 = arith.constant 0 : index
    %16 = vector.load %arg2[%c0_20, %c0_21, %c0_22] : memref<4x32x32xbf16, #tpu.memory_space<vmem>>, vector<1x32x32xbf16>
    %17 = vector.shape_cast %16 : vector<1x32x32xbf16> to vector<32x32xbf16>
    %c1_23 = arith.constant 1 : index
    %c0_24 = arith.constant 0 : index
    %c0_25 = arith.constant 0 : index
    %18 = vector.load %arg2[%c1_23, %c0_24, %c0_25] : memref<4x32x32xbf16, #tpu.memory_space<vmem>>, vector<1x32x32xbf16>
    %19 = vector.shape_cast %18 : vector<1x32x32xbf16> to vector<32x32xbf16>
    %c2_26 = arith.constant 2 : index
    %c0_27 = arith.constant 0 : index
    %c0_28 = arith.constant 0 : index
    %20 = vector.load %arg2[%c2_26, %c0_27, %c0_28] : memref<4x32x32xbf16, #tpu.memory_space<vmem>>, vector<1x32x32xbf16>
    %21 = vector.shape_cast %20 : vector<1x32x32xbf16> to vector<32x32xbf16>
    %c3_29 = arith.constant 3 : index
    %c0_30 = arith.constant 0 : index
    %c0_31 = arith.constant 0 : index
    %22 = vector.load %arg2[%c3_29, %c0_30, %c0_31] : memref<4x32x32xbf16, #tpu.memory_space<vmem>>, vector<1x32x32xbf16>
    %23 = vector.shape_cast %22 : vector<1x32x32xbf16> to vector<32x32xbf16>
    %c0_32 = arith.constant 0 : index
    %c0_33 = arith.constant 0 : index
    %c0_34 = arith.constant 0 : index
    %24 = vector.load %arg5[%c0_32, %c0_33, %c0_34] : memref<4x32x32xbf16, #tpu.memory_space<vmem>>, vector<1x32x32xbf16>
    %25 = vector.shape_cast %24 : vector<1x32x32xbf16> to vector<32x32xbf16>
    %c1_35 = arith.constant 1 : index
    %c0_36 = arith.constant 0 : index
    %c0_37 = arith.constant 0 : index
    %26 = vector.load %arg5[%c1_35, %c0_36, %c0_37] : memref<4x32x32xbf16, #tpu.memory_space<vmem>>, vector<1x32x32xbf16>
    %27 = vector.shape_cast %26 : vector<1x32x32xbf16> to vector<32x32xbf16>
    %c2_38 = arith.constant 2 : index
    %c0_39 = arith.constant 0 : index
    %c0_40 = arith.constant 0 : index
    %28 = vector.load %arg5[%c2_38, %c0_39, %c0_40] : memref<4x32x32xbf16, #tpu.memory_space<vmem>>, vector<1x32x32xbf16>
    %29 = vector.shape_cast %28 : vector<1x32x32xbf16> to vector<32x32xbf16>
    %c3_41 = arith.constant 3 : index
    %c0_42 = arith.constant 0 : index
    %c0_43 = arith.constant 0 : index
    %30 = vector.load %arg5[%c3_41, %c0_42, %c0_43] : memref<4x32x32xbf16, #tpu.memory_space<vmem>>, vector<1x32x32xbf16>
    %31 = vector.shape_cast %30 : vector<1x32x32xbf16> to vector<32x32xbf16>
    %c0_44 = arith.constant 0 : index
    %c0_45 = arith.constant 0 : index
    %c0_46 = arith.constant 0 : index
    %32 = vector.load %arg3[%c0_44, %c0_45, %c0_46] : memref<4x8x32xf32, #tpu.memory_space<vmem>>, vector<1x8x32xf32>
    %33 = vector.shape_cast %32 : vector<1x8x32xf32> to vector<8x32xf32>
    %c1_47 = arith.constant 1 : index
    %c0_48 = arith.constant 0 : index
    %c0_49 = arith.constant 0 : index
    %34 = vector.load %arg3[%c1_47, %c0_48, %c0_49] : memref<4x8x32xf32, #tpu.memory_space<vmem>>, vector<1x8x32xf32>
    %35 = vector.shape_cast %34 : vector<1x8x32xf32> to vector<8x32xf32>
    %c2_50 = arith.constant 2 : index
    %c0_51 = arith.constant 0 : index
    %c0_52 = arith.constant 0 : index
    %36 = vector.load %arg3[%c2_50, %c0_51, %c0_52] : memref<4x8x32xf32, #tpu.memory_space<vmem>>, vector<1x8x32xf32>
    %37 = vector.shape_cast %36 : vector<1x8x32xf32> to vector<8x32xf32>
    %c3_53 = arith.constant 3 : index
    %c0_54 = arith.constant 0 : index
    %c0_55 = arith.constant 0 : index
    %38 = vector.load %arg3[%c3_53, %c0_54, %c0_55] : memref<4x8x32xf32, #tpu.memory_space<vmem>>, vector<1x8x32xf32>
    %39 = vector.shape_cast %38 : vector<1x8x32xf32> to vector<8x32xf32>
    %c0_56 = arith.constant 0 : index
    %c0_57 = arith.constant 0 : index
    %c0_58 = arith.constant 0 : index
    %40 = vector.load %arg6[%c0_56, %c0_57, %c0_58] : memref<4x8x32xf32, #tpu.memory_space<vmem>>, vector<1x8x32xf32>
    %41 = vector.shape_cast %40 : vector<1x8x32xf32> to vector<8x32xf32>
    %c1_59 = arith.constant 1 : index
    %c0_60 = arith.constant 0 : index
    %c0_61 = arith.constant 0 : index
    %42 = vector.load %arg6[%c1_59, %c0_60, %c0_61] : memref<4x8x32xf32, #tpu.memory_space<vmem>>, vector<1x8x32xf32>
    %43 = vector.shape_cast %42 : vector<1x8x32xf32> to vector<8x32xf32>
    %c2_62 = arith.constant 2 : index
    %c0_63 = arith.constant 0 : index
    %c0_64 = arith.constant 0 : index
    %44 = vector.load %arg6[%c2_62, %c0_63, %c0_64] : memref<4x8x32xf32, #tpu.memory_space<vmem>>, vector<1x8x32xf32>
    %45 = vector.shape_cast %44 : vector<1x8x32xf32> to vector<8x32xf32>
    %c3_65 = arith.constant 3 : index
    %c0_66 = arith.constant 0 : index
    %c0_67 = arith.constant 0 : index
    %46 = vector.load %arg6[%c3_65, %c0_66, %c0_67] : memref<4x8x32xf32, #tpu.memory_space<vmem>>, vector<1x8x32xf32>
    %47 = vector.shape_cast %46 : vector<1x8x32xf32> to vector<8x32xf32>
    %c0_68 = arith.constant 0 : index
    %c0_69 = arith.constant 0 : index
    %48 = vector.load %arg7[%c0_68, %c0_69] : memref<32x128xbf16, #tpu.memory_space<vmem>>, vector<32x128xbf16>
    %c0_70 = arith.constant 0 : index
    %c0_71 = arith.constant 0 : index
    %49 = vector.load %arg8[%c0_70, %c0_71] : memref<8x128xf32, #tpu.memory_space<vmem>>, vector<8x128xf32>
    %cst = arith.constant 0.000000e+00 : f32
    %50 = vector.broadcast %cst : f32 to vector<8x32xf32>
    %cst_72 = arith.constant 0.000000e+00 : f32
    %51 = vector.broadcast %cst_72 : f32 to vector<8x32xf32>
    %cst_73 = arith.constant 0.000000e+00 : f32
    %52 = vector.broadcast %cst_73 : f32 to vector<8x32xf32>
    %cst_74 = arith.constant 0.000000e+00 : f32
    %53 = vector.broadcast %cst_74 : f32 to vector<8x32xf32>
    %c0_i32 = arith.constant 0 : i32
    %54 = arith.index_cast %c0_i32 : i32 to index
    %c0_75 = arith.constant 0 : index
    %c0_76 = arith.constant 0 : index
    %55 = vector.load %arg0[%54, %c0_75, %c0_76] : memref<8x8x8xf32, #tpu.memory_space<vmem>>, vector<1x8x8xf32>
    %56 = vector.shape_cast %55 : vector<1x8x8xf32> to vector<8x8xf32>
    %57 = arith.truncf %56 : vector<8x8xf32> to vector<8x8xbf16>
    %58 = arith.truncf %50 : vector<8x32xf32> to vector<8x32xbf16>
    %cst_77 = arith.constant dense<0.000000e+00> : vector<8x32xf32>
    %59 = tpu.matmul %57, %1, %cst_77 {dimension_numbers = #tpu.dot_dimension_numbers<[1], [0], [0], [1], [0, 0, 1, 1], [], []>} : vector<8x8xbf16>, vector<8x32xbf16>, vector<8x32xf32> -> vector<8x32xf32>
    %cst_78 = arith.constant dense<0.000000e+00> : vector<8x32xf32>
    %60 = tpu.matmul %58, %17, %cst_78 {dimension_numbers = #tpu.dot_dimension_numbers<[1], [0], [0], [1], [0, 0, 1, 1], [], []>} : vector<8x32xbf16>, vector<32x32xbf16>, vector<8x32xf32> -> vector<8x32xf32>
    %61 = arith.addf %59, %60 : vector<8x32xf32>
    %62 = arith.addf %61, %33 : vector<8x32xf32>
    %63 = arith.negf %62 : vector<8x32xf32>
    %64 = math.exp %63 : vector<8x32xf32>
    %cst_79 = arith.constant 1.000000e+00 : f32
    %65 = vector.broadcast %cst_79 : f32 to vector<8x32xf32>
    %66 = arith.addf %65, %64 : vector<8x32xf32>
    %67 = arith.divf %65, %66 : vector<8x32xf32>
    %cst_80 = arith.constant dense<0.000000e+00> : vector<8x32xf32>
    %68 = tpu.matmul %57, %3, %cst_80 {dimension_numbers = #tpu.dot_dimension_numbers<[1], [0], [0], [1], [0, 0, 1, 1], [], []>} : vector<8x8xbf16>, vector<8x32xbf16>, vector<8x32xf32> -> vector<8x32xf32>
    %cst_81 = arith.constant dense<0.000000e+00> : vector<8x32xf32>
    %69 = tpu.matmul %58, %19, %cst_81 {dimension_numbers = #tpu.dot_dimension_numbers<[1], [0], [0], [1], [0, 0, 1, 1], [], []>} : vector<8x32xbf16>, vector<32x32xbf16>, vector<8x32xf32> -> vector<8x32xf32>
    %70 = arith.addf %68, %69 : vector<8x32xf32>
    %71 = arith.addf %70, %35 : vector<8x32xf32>
    %72 = arith.negf %71 : vector<8x32xf32>
    %73 = math.exp %72 : vector<8x32xf32>
    %cst_82 = arith.constant 1.000000e+00 : f32
    %74 = vector.broadcast %cst_82 : f32 to vector<8x32xf32>
    %75 = arith.addf %74, %73 : vector<8x32xf32>
    %76 = arith.divf %74, %75 : vector<8x32xf32>
    %cst_83 = arith.constant dense<0.000000e+00> : vector<8x32xf32>
    %77 = tpu.matmul %57, %5, %cst_83 {dimension_numbers = #tpu.dot_dimension_numbers<[1], [0], [0], [1], [0, 0, 1, 1], [], []>} : vector<8x8xbf16>, vector<8x32xbf16>, vector<8x32xf32> -> vector<8x32xf32>
    %cst_84 = arith.constant dense<0.000000e+00> : vector<8x32xf32>
    %78 = tpu.matmul %58, %21, %cst_84 {dimension_numbers = #tpu.dot_dimension_numbers<[1], [0], [0], [1], [0, 0, 1, 1], [], []>} : vector<8x32xbf16>, vector<32x32xbf16>, vector<8x32xf32> -> vector<8x32xf32>
    %79 = arith.addf %77, %78 : vector<8x32xf32>
    %80 = arith.addf %79, %37 : vector<8x32xf32>
    %81 = math.tanh %80 : vector<8x32xf32>
    %cst_85 = arith.constant dense<0.000000e+00> : vector<8x32xf32>
    %82 = tpu.matmul %57, %7, %cst_85 {dimension_numbers = #tpu.dot_dimension_numbers<[1], [0], [0], [1], [0, 0, 1, 1], [], []>} : vector<8x8xbf16>, vector<8x32xbf16>, vector<8x32xf32> -> vector<8x32xf32>
    %cst_86 = arith.constant dense<0.000000e+00> : vector<8x32xf32>
    %83 = tpu.matmul %58, %23, %cst_86 {dimension_numbers = #tpu.dot_dimension_numbers<[1], [0], [0], [1], [0, 0, 1, 1], [], []>} : vector<8x32xbf16>, vector<32x32xbf16>, vector<8x32xf32> -> vector<8x32xf32>
    %84 = arith.addf %82, %83 : vector<8x32xf32>
    %85 = arith.addf %84, %39 : vector<8x32xf32>
    %86 = arith.negf %85 : vector<8x32xf32>
    %87 = math.exp %86 : vector<8x32xf32>
    %cst_87 = arith.constant 1.000000e+00 : f32
    %88 = vector.broadcast %cst_87 : f32 to vector<8x32xf32>
    %89 = arith.addf %88, %87 : vector<8x32xf32>
    %90 = arith.divf %88, %89 : vector<8x32xf32>
    %91 = arith.mulf %76, %52 : vector<8x32xf32>
    %92 = arith.mulf %67, %81 : vector<8x32xf32>
    %93 = arith.addf %91, %92 : vector<8x32xf32>
    %94 = math.tanh %93 : vector<8x32xf32>
    %95 = arith.mulf %90, %94 : vector<8x32xf32>
    %96 = arith.truncf %95 : vector<8x32xf32> to vector<8x32xbf16>
    %97 = arith.truncf %51 : vector<8x32xf32> to vector<8x32xbf16>
    %cst_88 = arith.constant dense<0.000000e+00> : vector<8x32xf32>
    %98 = tpu.matmul %96, %9, %cst_88 {dimension_numbers = #tpu.dot_dimension_numbers<[1], [0], [0], [1], [0, 0, 1, 1], [], []>} : vector<8x32xbf16>, vector<32x32xbf16>, vector<8x32xf32> -> vector<8x32xf32>
    %cst_89 = arith.constant dense<0.000000e+00> : vector<8x32xf32>
    %99 = tpu.matmul %97, %25, %cst_89 {dimension_numbers = #tpu.dot_dimension_numbers<[1], [0], [0], [1], [0, 0, 1, 1], [], []>} : vector<8x32xbf16>, vector<32x32xbf16>, vector<8x32xf32> -> vector<8x32xf32>
    %100 = arith.addf %98, %99 : vector<8x32xf32>
    %101 = arith.addf %100, %41 : vector<8x32xf32>
    %102 = arith.negf %101 : vector<8x32xf32>
    %103 = math.exp %102 : vector<8x32xf32>
    %cst_90 = arith.constant 1.000000e+00 : f32
    %104 = vector.broadcast %cst_90 : f32 to vector<8x32xf32>
    %105 = arith.addf %104, %103 : vector<8x32xf32>
    %106 = arith.divf %104, %105 : vector<8x32xf32>
    %cst_91 = arith.constant dense<0.000000e+00> : vector<8x32xf32>
    %107 = tpu.matmul %96, %11, %cst_91 {dimension_numbers = #tpu.dot_dimension_numbers<[1], [0], [0], [1], [0, 0, 1, 1], [], []>} : vector<8x32xbf16>, vector<32x32xbf16>, vector<8x32xf32> -> vector<8x32xf32>
    %cst_92 = arith.constant dense<0.000000e+00> : vector<8x32xf32>
    %108 = tpu.matmul %97, %27, %cst_92 {dimension_numbers = #tpu.dot_dimension_numbers<[1], [0], [0], [1], [0, 0, 1, 1], [], []>} : vector<8x32xbf16>, vector<32x32xbf16>, vector<8x32xf32> -> vector<8x32xf32>
    %109 = arith.addf %107, %108 : vector<8x32xf32>
    %110 = arith.addf %109, %43 : vector<8x32xf32>
    %111 = arith.negf %110 : vector<8x32xf32>
    %112 = math.exp %111 : vector<8x32xf32>
    %cst_93 = arith.constant 1.000000e+00 : f32
    %113 = vector.broadcast %cst_93 : f32 to vector<8x32xf32>
    %114 = arith.addf %113, %112 : vector<8x32xf32>
    %115 = arith.divf %113, %114 : vector<8x32xf32>
    %cst_94 = arith.constant dense<0.000000e+00> : vector<8x32xf32>
    %116 = tpu.matmul %96, %13, %cst_94 {dimension_numbers = #tpu.dot_dimension_numbers<[1], [0], [0], [1], [0, 0, 1, 1], [], []>} : vector<8x32xbf16>, vector<32x32xbf16>, vector<8x32xf32> -> vector<8x32xf32>
    %cst_95 = arith.constant dense<0.000000e+00> : vector<8x32xf32>
    %117 = tpu.matmul %97, %29, %cst_95 {dimension_numbers = #tpu.dot_dimension_numbers<[1], [0], [0], [1], [0, 0, 1, 1], [], []>} : vector<8x32xbf16>, vector<32x32xbf16>, vector<8x32xf32> -> vector<8x32xf32>
    %118 = arith.addf %116, %117 : vector<8x32xf32>
    %119 = arith.addf %118, %45 : vector<8x32xf32>
    %120 = math.tanh %119 : vector<8x32xf32>
    %cst_96 = arith.constant dense<0.000000e+00> : vector<8x32xf32>
    %121 = tpu.matmul %96, %15, %cst_96 {dimension_numbers = #tpu.dot_dimension_numbers<[1], [0], [0], [1], [0, 0, 1, 1], [], []>} : vector<8x32xbf16>, vector<32x32xbf16>, vector<8x32xf32> -> vector<8x32xf32>
    %cst_97 = arith.constant dense<0.000000e+00> : vector<8x32xf32>
    %122 = tpu.matmul %97, %31, %cst_97 {dimension_numbers = #tpu.dot_dimension_numbers<[1], [0], [0], [1], [0, 0, 1, 1], [], []>} : vector<8x32xbf16>, vector<32x32xbf16>, vector<8x32xf32> -> vector<8x32xf32>
    %123 = arith.addf %121, %122 : vector<8x32xf32>
    %124 = arith.addf %123, %47 : vector<8x32xf32>
    %125 = arith.negf %124 : vector<8x32xf32>
    %126 = math.exp %125 : vector<8x32xf32>
    %cst_98 = arith.constant 1.000000e+00 : f32
    %127 = vector.broadcast %cst_98 : f32 to vector<8x32xf32>
    %128 = arith.addf %127, %126 : vector<8x32xf32>
    %129 = arith.divf %127, %128 : vector<8x32xf32>
    %130 = arith.mulf %115, %53 : vector<8x32xf32>
    %131 = arith.mulf %106, %120 : vector<8x32xf32>
    %132 = arith.addf %130, %131 : vector<8x32xf32>
    %133 = math.tanh %132 : vector<8x32xf32>
    %134 = arith.mulf %129, %133 : vector<8x32xf32>
    %c1_i32 = arith.constant 1 : i32
    %135 = arith.index_cast %c1_i32 : i32 to index
    %c0_99 = arith.constant 0 : index
    %c0_100 = arith.constant 0 : index
    %136 = vector.load %arg0[%135, %c0_99, %c0_100] : memref<8x8x8xf32, #tpu.memory_space<vmem>>, vector<1x8x8xf32>
    %137 = vector.shape_cast %136 : vector<1x8x8xf32> to vector<8x8xf32>
    %138 = arith.truncf %137 : vector<8x8xf32> to vector<8x8xbf16>
    %139 = arith.truncf %95 : vector<8x32xf32> to vector<8x32xbf16>
    %cst_101 = arith.constant dense<0.000000e+00> : vector<8x32xf32>
    %140 = tpu.matmul %138, %1, %cst_101 {dimension_numbers = #tpu.dot_dimension_numbers<[1], [0], [0], [1], [0, 0, 1, 1], [], []>} : vector<8x8xbf16>, vector<8x32xbf16>, vector<8x32xf32> -> vector<8x32xf32>
    %cst_102 = arith.constant dense<0.000000e+00> : vector<8x32xf32>
    %141 = tpu.matmul %139, %17, %cst_102 {dimension_numbers = #tpu.dot_dimension_numbers<[1], [0], [0], [1], [0, 0, 1, 1], [], []>} : vector<8x32xbf16>, vector<32x32xbf16>, vector<8x32xf32> -> vector<8x32xf32>
    %142 = arith.addf %140, %141 : vector<8x32xf32>
    %143 = arith.addf %142, %33 : vector<8x32xf32>
    %144 = arith.negf %143 : vector<8x32xf32>
    %145 = math.exp %144 : vector<8x32xf32>
    %cst_103 = arith.constant 1.000000e+00 : f32
    %146 = vector.broadcast %cst_103 : f32 to vector<8x32xf32>
    %147 = arith.addf %146, %145 : vector<8x32xf32>
    %148 = arith.divf %146, %147 : vector<8x32xf32>
    %cst_104 = arith.constant dense<0.000000e+00> : vector<8x32xf32>
    %149 = tpu.matmul %138, %3, %cst_104 {dimension_numbers = #tpu.dot_dimension_numbers<[1], [0], [0], [1], [0, 0, 1, 1], [], []>} : vector<8x8xbf16>, vector<8x32xbf16>, vector<8x32xf32> -> vector<8x32xf32>
    %cst_105 = arith.constant dense<0.000000e+00> : vector<8x32xf32>
    %150 = tpu.matmul %139, %19, %cst_105 {dimension_numbers = #tpu.dot_dimension_numbers<[1], [0], [0], [1], [0, 0, 1, 1], [], []>} : vector<8x32xbf16>, vector<32x32xbf16>, vector<8x32xf32> -> vector<8x32xf32>
    %151 = arith.addf %149, %150 : vector<8x32xf32>
    %152 = arith.addf %151, %35 : vector<8x32xf32>
    %153 = arith.negf %152 : vector<8x32xf32>
    %154 = math.exp %153 : vector<8x32xf32>
    %cst_106 = arith.constant 1.000000e+00 : f32
    %155 = vector.broadcast %cst_106 : f32 to vector<8x32xf32>
    %156 = arith.addf %155, %154 : vector<8x32xf32>
    %157 = arith.divf %155, %156 : vector<8x32xf32>
    %cst_107 = arith.constant dense<0.000000e+00> : vector<8x32xf32>
    %158 = tpu.matmul %138, %5, %cst_107 {dimension_numbers = #tpu.dot_dimension_numbers<[1], [0], [0], [1], [0, 0, 1, 1], [], []>} : vector<8x8xbf16>, vector<8x32xbf16>, vector<8x32xf32> -> vector<8x32xf32>
    %cst_108 = arith.constant dense<0.000000e+00> : vector<8x32xf32>
    %159 = tpu.matmul %139, %21, %cst_108 {dimension_numbers = #tpu.dot_dimension_numbers<[1], [0], [0], [1], [0, 0, 1, 1], [], []>} : vector<8x32xbf16>, vector<32x32xbf16>, vector<8x32xf32> -> vector<8x32xf32>
    %160 = arith.addf %158, %159 : vector<8x32xf32>
    %161 = arith.addf %160, %37 : vector<8x32xf32>
    %162 = math.tanh %161 : vector<8x32xf32>
    %cst_109 = arith.constant dense<0.000000e+00> : vector<8x32xf32>
    %163 = tpu.matmul %138, %7, %cst_109 {dimension_numbers = #tpu.dot_dimension_numbers<[1], [0], [0], [1], [0, 0, 1, 1], [], []>} : vector<8x8xbf16>, vector<8x32xbf16>, vector<8x32xf32> -> vector<8x32xf32>
    %cst_110 = arith.constant dense<0.000000e+00> : vector<8x32xf32>
    %164 = tpu.matmul %139, %23, %cst_110 {dimension_numbers = #tpu.dot_dimension_numbers<[1], [0], [0], [1], [0, 0, 1, 1], [], []>} : vector<8x32xbf16>, vector<32x32xbf16>, vector<8x32xf32> -> vector<8x32xf32>
    %165 = arith.addf %163, %164 : vector<8x32xf32>
    %166 = arith.addf %165, %39 : vector<8x32xf32>
    %167 = arith.negf %166 : vector<8x32xf32>
    %168 = math.exp %167 : vector<8x32xf32>
    %cst_111 = arith.constant 1.000000e+00 : f32
    %169 = vector.broadcast %cst_111 : f32 to vector<8x32xf32>
    %170 = arith.addf %169, %168 : vector<8x32xf32>
    %171 = arith.divf %169, %170 : vector<8x32xf32>
    %172 = arith.mulf %157, %93 : vector<8x32xf32>
    %173 = arith.mulf %148, %162 : vector<8x32xf32>
    %174 = arith.addf %172, %173 : vector<8x32xf32>
    %175 = math.tanh %174 : vector<8x32xf32>
    %176 = arith.mulf %171, %175 : vector<8x32xf32>
    %177 = arith.truncf %176 : vector<8x32xf32> to vector<8x32xbf16>
    %178 = arith.truncf %134 : vector<8x32xf32> to vector<8x32xbf16>
    %cst_112 = arith.constant dense<0.000000e+00> : vector<8x32xf32>
    %179 = tpu.matmul %177, %9, %cst_112 {dimension_numbers = #tpu.dot_dimension_numbers<[1], [0], [0], [1], [0, 0, 1, 1], [], []>} : vector<8x32xbf16>, vector<32x32xbf16>, vector<8x32xf32> -> vector<8x32xf32>
    %cst_113 = arith.constant dense<0.000000e+00> : vector<8x32xf32>
    %180 = tpu.matmul %178, %25, %cst_113 {dimension_numbers = #tpu.dot_dimension_numbers<[1], [0], [0], [1], [0, 0, 1, 1], [], []>} : vector<8x32xbf16>, vector<32x32xbf16>, vector<8x32xf32> -> vector<8x32xf32>
    %181 = arith.addf %179, %180 : vector<8x32xf32>
    %182 = arith.addf %181, %41 : vector<8x32xf32>
    %183 = arith.negf %182 : vector<8x32xf32>
    %184 = math.exp %183 : vector<8x32xf32>
    %cst_114 = arith.constant 1.000000e+00 : f32
    %185 = vector.broadcast %cst_114 : f32 to vector<8x32xf32>
    %186 = arith.addf %185, %184 : vector<8x32xf32>
    %187 = arith.divf %185, %186 : vector<8x32xf32>
    %cst_115 = arith.constant dense<0.000000e+00> : vector<8x32xf32>
    %188 = tpu.matmul %177, %11, %cst_115 {dimension_numbers = #tpu.dot_dimension_numbers<[1], [0], [0], [1], [0, 0, 1, 1], [], []>} : vector<8x32xbf16>, vector<32x32xbf16>, vector<8x32xf32> -> vector<8x32xf32>
    %cst_116 = arith.constant dense<0.000000e+00> : vector<8x32xf32>
    %189 = tpu.matmul %178, %27, %cst_116 {dimension_numbers = #tpu.dot_dimension_numbers<[1], [0], [0], [1], [0, 0, 1, 1], [], []>} : vector<8x32xbf16>, vector<32x32xbf16>, vector<8x32xf32> -> vector<8x32xf32>
    %190 = arith.addf %188, %189 : vector<8x32xf32>
    %191 = arith.addf %190, %43 : vector<8x32xf32>
    %192 = arith.negf %191 : vector<8x32xf32>
    %193 = math.exp %192 : vector<8x32xf32>
    %cst_117 = arith.constant 1.000000e+00 : f32
    %194 = vector.broadcast %cst_117 : f32 to vector<8x32xf32>
    %195 = arith.addf %194, %193 : vector<8x32xf32>
    %196 = arith.divf %194, %195 : vector<8x32xf32>
    %cst_118 = arith.constant dense<0.000000e+00> : vector<8x32xf32>
    %197 = tpu.matmul %177, %13, %cst_118 {dimension_numbers = #tpu.dot_dimension_numbers<[1], [0], [0], [1], [0, 0, 1, 1], [], []>} : vector<8x32xbf16>, vector<32x32xbf16>, vector<8x32xf32> -> vector<8x32xf32>
    %cst_119 = arith.constant dense<0.000000e+00> : vector<8x32xf32>
    %198 = tpu.matmul %178, %29, %cst_119 {dimension_numbers = #tpu.dot_dimension_numbers<[1], [0], [0], [1], [0, 0, 1, 1], [], []>} : vector<8x32xbf16>, vector<32x32xbf16>, vector<8x32xf32> -> vector<8x32xf32>
    %199 = arith.addf %197, %198 : vector<8x32xf32>
    %200 = arith.addf %199, %45 : vector<8x32xf32>
    %201 = math.tanh %200 : vector<8x32xf32>
    %cst_120 = arith.constant dense<0.000000e+00> : vector<8x32xf32>
    %202 = tpu.matmul %177, %15, %cst_120 {dimension_numbers = #tpu.dot_dimension_numbers<[1], [0], [0], [1], [0, 0, 1, 1], [], []>} : vector<8x32xbf16>, vector<32x32xbf16>, vector<8x32xf32> -> vector<8x32xf32>
    %cst_121 = arith.constant dense<0.000000e+00> : vector<8x32xf32>
    %203 = tpu.matmul %178, %31, %cst_121 {dimension_numbers = #tpu.dot_dimension_numbers<[1], [0], [0], [1], [0, 0, 1, 1], [], []>} : vector<8x32xbf16>, vector<32x32xbf16>, vector<8x32xf32> -> vector<8x32xf32>
    %204 = arith.addf %202, %203 : vector<8x32xf32>
    %205 = arith.addf %204, %47 : vector<8x32xf32>
    %206 = arith.negf %205 : vector<8x32xf32>
    %207 = math.exp %206 : vector<8x32xf32>
    %cst_122 = arith.constant 1.000000e+00 : f32
    %208 = vector.broadcast %cst_122 : f32 to vector<8x32xf32>
    %209 = arith.addf %208, %207 : vector<8x32xf32>
    %210 = arith.divf %208, %209 : vector<8x32xf32>
    %211 = arith.mulf %196, %132 : vector<8x32xf32>
    %212 = arith.mulf %187, %201 : vector<8x32xf32>
    %213 = arith.addf %211, %212 : vector<8x32xf32>
    %214 = math.tanh %213 : vector<8x32xf32>
    %215 = arith.mulf %210, %214 : vector<8x32xf32>
    %c2_i32 = arith.constant 2 : i32
    %216 = arith.index_cast %c2_i32 : i32 to index
    %c0_123 = arith.constant 0 : index
    %c0_124 = arith.constant 0 : index
    %217 = vector.load %arg0[%216, %c0_123, %c0_124] : memref<8x8x8xf32, #tpu.memory_space<vmem>>, vector<1x8x8xf32>
    %218 = vector.shape_cast %217 : vector<1x8x8xf32> to vector<8x8xf32>
    %219 = arith.truncf %218 : vector<8x8xf32> to vector<8x8xbf16>
    %220 = arith.truncf %176 : vector<8x32xf32> to vector<8x32xbf16>
    %cst_125 = arith.constant dense<0.000000e+00> : vector<8x32xf32>
    %221 = tpu.matmul %219, %1, %cst_125 {dimension_numbers = #tpu.dot_dimension_numbers<[1], [0], [0], [1], [0, 0, 1, 1], [], []>} : vector<8x8xbf16>, vector<8x32xbf16>, vector<8x32xf32> -> vector<8x32xf32>
    %cst_126 = arith.constant dense<0.000000e+00> : vector<8x32xf32>
    %222 = tpu.matmul %220, %17, %cst_126 {dimension_numbers = #tpu.dot_dimension_numbers<[1], [0], [0], [1], [0, 0, 1, 1], [], []>} : vector<8x32xbf16>, vector<32x32xbf16>, vector<8x32xf32> -> vector<8x32xf32>
    %223 = arith.addf %221, %222 : vector<8x32xf32>
    %224 = arith.addf %223, %33 : vector<8x32xf32>
    %225 = arith.negf %224 : vector<8x32xf32>
    %226 = math.exp %225 : vector<8x32xf32>
    %cst_127 = arith.constant 1.000000e+00 : f32
    %227 = vector.broadcast %cst_127 : f32 to vector<8x32xf32>
    %228 = arith.addf %227, %226 : vector<8x32xf32>
    %229 = arith.divf %227, %228 : vector<8x32xf32>
    %cst_128 = arith.constant dense<0.000000e+00> : vector<8x32xf32>
    %230 = tpu.matmul %219, %3, %cst_128 {dimension_numbers = #tpu.dot_dimension_numbers<[1], [0], [0], [1], [0, 0, 1, 1], [], []>} : vector<8x8xbf16>, vector<8x32xbf16>, vector<8x32xf32> -> vector<8x32xf32>
    %cst_129 = arith.constant dense<0.000000e+00> : vector<8x32xf32>
    %231 = tpu.matmul %220, %19, %cst_129 {dimension_numbers = #tpu.dot_dimension_numbers<[1], [0], [0], [1], [0, 0, 1, 1], [], []>} : vector<8x32xbf16>, vector<32x32xbf16>, vector<8x32xf32> -> vector<8x32xf32>
    %232 = arith.addf %230, %231 : vector<8x32xf32>
    %233 = arith.addf %232, %35 : vector<8x32xf32>
    %234 = arith.negf %233 : vector<8x32xf32>
    %235 = math.exp %234 : vector<8x32xf32>
    %cst_130 = arith.constant 1.000000e+00 : f32
    %236 = vector.broadcast %cst_130 : f32 to vector<8x32xf32>
    %237 = arith.addf %236, %235 : vector<8x32xf32>
    %238 = arith.divf %236, %237 : vector<8x32xf32>
    %cst_131 = arith.constant dense<0.000000e+00> : vector<8x32xf32>
    %239 = tpu.matmul %219, %5, %cst_131 {dimension_numbers = #tpu.dot_dimension_numbers<[1], [0], [0], [1], [0, 0, 1, 1], [], []>} : vector<8x8xbf16>, vector<8x32xbf16>, vector<8x32xf32> -> vector<8x32xf32>
    %cst_132 = arith.constant dense<0.000000e+00> : vector<8x32xf32>
    %240 = tpu.matmul %220, %21, %cst_132 {dimension_numbers = #tpu.dot_dimension_numbers<[1], [0], [0], [1], [0, 0, 1, 1], [], []>} : vector<8x32xbf16>, vector<32x32xbf16>, vector<8x32xf32> -> vector<8x32xf32>
    %241 = arith.addf %239, %240 : vector<8x32xf32>
    %242 = arith.addf %241, %37 : vector<8x32xf32>
    %243 = math.tanh %242 : vector<8x32xf32>
    %cst_133 = arith.constant dense<0.000000e+00> : vector<8x32xf32>
    %244 = tpu.matmul %219, %7, %cst_133 {dimension_numbers = #tpu.dot_dimension_numbers<[1], [0], [0], [1], [0, 0, 1, 1], [], []>} : vector<8x8xbf16>, vector<8x32xbf16>, vector<8x32xf32> -> vector<8x32xf32>
    %cst_134 = arith.constant dense<0.000000e+00> : vector<8x32xf32>
    %245 = tpu.matmul %220, %23, %cst_134 {dimension_numbers = #tpu.dot_dimension_numbers<[1], [0], [0], [1], [0, 0, 1, 1], [], []>} : vector<8x32xbf16>, vector<32x32xbf16>, vector<8x32xf32> -> vector<8x32xf32>
    %246 = arith.addf %244, %245 : vector<8x32xf32>
    %247 = arith.addf %246, %39 : vector<8x32xf32>
    %248 = arith.negf %247 : vector<8x32xf32>
    %249 = math.exp %248 : vector<8x32xf32>
    %cst_135 = arith.constant 1.000000e+00 : f32
    %250 = vector.broadcast %cst_135 : f32 to vector<8x32xf32>
    %251 = arith.addf %250, %249 : vector<8x32xf32>
    %252 = arith.divf %250, %251 : vector<8x32xf32>
    %253 = arith.mulf %238, %174 : vector<8x32xf32>
    %254 = arith.mulf %229, %243 : vector<8x32xf32>
    %255 = arith.addf %253, %254 : vector<8x32xf32>
    %256 = math.tanh %255 : vector<8x32xf32>
    %257 = arith.mulf %252, %256 : vector<8x32xf32>
    %258 = arith.truncf %257 : vector<8x32xf32> to vector<8x32xbf16>
    %259 = arith.truncf %215 : vector<8x32xf32> to vector<8x32xbf16>
    %cst_136 = arith.constant dense<0.000000e+00> : vector<8x32xf32>
    %260 = tpu.matmul %258, %9, %cst_136 {dimension_numbers = #tpu.dot_dimension_numbers<[1], [0], [0], [1], [0, 0, 1, 1], [], []>} : vector<8x32xbf16>, vector<32x32xbf16>, vector<8x32xf32> -> vector<8x32xf32>
    %cst_137 = arith.constant dense<0.000000e+00> : vector<8x32xf32>
    %261 = tpu.matmul %259, %25, %cst_137 {dimension_numbers = #tpu.dot_dimension_numbers<[1], [0], [0], [1], [0, 0, 1, 1], [], []>} : vector<8x32xbf16>, vector<32x32xbf16>, vector<8x32xf32> -> vector<8x32xf32>
    %262 = arith.addf %260, %261 : vector<8x32xf32>
    %263 = arith.addf %262, %41 : vector<8x32xf32>
    %264 = arith.negf %263 : vector<8x32xf32>
    %265 = math.exp %264 : vector<8x32xf32>
    %cst_138 = arith.constant 1.000000e+00 : f32
    %266 = vector.broadcast %cst_138 : f32 to vector<8x32xf32>
    %267 = arith.addf %266, %265 : vector<8x32xf32>
    %268 = arith.divf %266, %267 : vector<8x32xf32>
    %cst_139 = arith.constant dense<0.000000e+00> : vector<8x32xf32>
    %269 = tpu.matmul %258, %11, %cst_139 {dimension_numbers = #tpu.dot_dimension_numbers<[1], [0], [0], [1], [0, 0, 1, 1], [], []>} : vector<8x32xbf16>, vector<32x32xbf16>, vector<8x32xf32> -> vector<8x32xf32>
    %cst_140 = arith.constant dense<0.000000e+00> : vector<8x32xf32>
    %270 = tpu.matmul %259, %27, %cst_140 {dimension_numbers = #tpu.dot_dimension_numbers<[1], [0], [0], [1], [0, 0, 1, 1], [], []>} : vector<8x32xbf16>, vector<32x32xbf16>, vector<8x32xf32> -> vector<8x32xf32>
    %271 = arith.addf %269, %270 : vector<8x32xf32>
    %272 = arith.addf %271, %43 : vector<8x32xf32>
    %273 = arith.negf %272 : vector<8x32xf32>
    %274 = math.exp %273 : vector<8x32xf32>
    %cst_141 = arith.constant 1.000000e+00 : f32
    %275 = vector.broadcast %cst_141 : f32 to vector<8x32xf32>
    %276 = arith.addf %275, %274 : vector<8x32xf32>
    %277 = arith.divf %275, %276 : vector<8x32xf32>
    %cst_142 = arith.constant dense<0.000000e+00> : vector<8x32xf32>
    %278 = tpu.matmul %258, %13, %cst_142 {dimension_numbers = #tpu.dot_dimension_numbers<[1], [0], [0], [1], [0, 0, 1, 1], [], []>} : vector<8x32xbf16>, vector<32x32xbf16>, vector<8x32xf32> -> vector<8x32xf32>
    %cst_143 = arith.constant dense<0.000000e+00> : vector<8x32xf32>
    %279 = tpu.matmul %259, %29, %cst_143 {dimension_numbers = #tpu.dot_dimension_numbers<[1], [0], [0], [1], [0, 0, 1, 1], [], []>} : vector<8x32xbf16>, vector<32x32xbf16>, vector<8x32xf32> -> vector<8x32xf32>
    %280 = arith.addf %278, %279 : vector<8x32xf32>
    %281 = arith.addf %280, %45 : vector<8x32xf32>
    %282 = math.tanh %281 : vector<8x32xf32>
    %cst_144 = arith.constant dense<0.000000e+00> : vector<8x32xf32>
    %283 = tpu.matmul %258, %15, %cst_144 {dimension_numbers = #tpu.dot_dimension_numbers<[1], [0], [0], [1], [0, 0, 1, 1], [], []>} : vector<8x32xbf16>, vector<32x32xbf16>, vector<8x32xf32> -> vector<8x32xf32>
    %cst_145 = arith.constant dense<0.000000e+00> : vector<8x32xf32>
    %284 = tpu.matmul %259, %31, %cst_145 {dimension_numbers = #tpu.dot_dimension_numbers<[1], [0], [0], [1], [0, 0, 1, 1], [], []>} : vector<8x32xbf16>, vector<32x32xbf16>, vector<8x32xf32> -> vector<8x32xf32>
    %285 = arith.addf %283, %284 : vector<8x32xf32>
    %286 = arith.addf %285, %47 : vector<8x32xf32>
    %287 = arith.negf %286 : vector<8x32xf32>
    %288 = math.exp %287 : vector<8x32xf32>
    %cst_146 = arith.constant 1.000000e+00 : f32
    %289 = vector.broadcast %cst_146 : f32 to vector<8x32xf32>
    %290 = arith.addf %289, %288 : vector<8x32xf32>
    %291 = arith.divf %289, %290 : vector<8x32xf32>
    %292 = arith.mulf %277, %213 : vector<8x32xf32>
    %293 = arith.mulf %268, %282 : vector<8x32xf32>
    %294 = arith.addf %292, %293 : vector<8x32xf32>
    %295 = math.tanh %294 : vector<8x32xf32>
    %296 = arith.mulf %291, %295 : vector<8x32xf32>
    %c3_i32 = arith.constant 3 : i32
    %297 = arith.index_cast %c3_i32 : i32 to index
    %c0_147 = arith.constant 0 : index
    %c0_148 = arith.constant 0 : index
    %298 = vector.load %arg0[%297, %c0_147, %c0_148] : memref<8x8x8xf32, #tpu.memory_space<vmem>>, vector<1x8x8xf32>
    %299 = vector.shape_cast %298 : vector<1x8x8xf32> to vector<8x8xf32>
    %300 = arith.truncf %299 : vector<8x8xf32> to vector<8x8xbf16>
    %301 = arith.truncf %257 : vector<8x32xf32> to vector<8x32xbf16>
    %cst_149 = arith.constant dense<0.000000e+00> : vector<8x32xf32>
    %302 = tpu.matmul %300, %1, %cst_149 {dimension_numbers = #tpu.dot_dimension_numbers<[1], [0], [0], [1], [0, 0, 1, 1], [], []>} : vector<8x8xbf16>, vector<8x32xbf16>, vector<8x32xf32> -> vector<8x32xf32>
    %cst_150 = arith.constant dense<0.000000e+00> : vector<8x32xf32>
    %303 = tpu.matmul %301, %17, %cst_150 {dimension_numbers = #tpu.dot_dimension_numbers<[1], [0], [0], [1], [0, 0, 1, 1], [], []>} : vector<8x32xbf16>, vector<32x32xbf16>, vector<8x32xf32> -> vector<8x32xf32>
    %304 = arith.addf %302, %303 : vector<8x32xf32>
    %305 = arith.addf %304, %33 : vector<8x32xf32>
    %306 = arith.negf %305 : vector<8x32xf32>
    %307 = math.exp %306 : vector<8x32xf32>
    %cst_151 = arith.constant 1.000000e+00 : f32
    %308 = vector.broadcast %cst_151 : f32 to vector<8x32xf32>
    %309 = arith.addf %308, %307 : vector<8x32xf32>
    %310 = arith.divf %308, %309 : vector<8x32xf32>
    %cst_152 = arith.constant dense<0.000000e+00> : vector<8x32xf32>
    %311 = tpu.matmul %300, %3, %cst_152 {dimension_numbers = #tpu.dot_dimension_numbers<[1], [0], [0], [1], [0, 0, 1, 1], [], []>} : vector<8x8xbf16>, vector<8x32xbf16>, vector<8x32xf32> -> vector<8x32xf32>
    %cst_153 = arith.constant dense<0.000000e+00> : vector<8x32xf32>
    %312 = tpu.matmul %301, %19, %cst_153 {dimension_numbers = #tpu.dot_dimension_numbers<[1], [0], [0], [1], [0, 0, 1, 1], [], []>} : vector<8x32xbf16>, vector<32x32xbf16>, vector<8x32xf32> -> vector<8x32xf32>
    %313 = arith.addf %311, %312 : vector<8x32xf32>
    %314 = arith.addf %313, %35 : vector<8x32xf32>
    %315 = arith.negf %314 : vector<8x32xf32>
    %316 = math.exp %315 : vector<8x32xf32>
    %cst_154 = arith.constant 1.000000e+00 : f32
    %317 = vector.broadcast %cst_154 : f32 to vector<8x32xf32>
    %318 = arith.addf %317, %316 : vector<8x32xf32>
    %319 = arith.divf %317, %318 : vector<8x32xf32>
    %cst_155 = arith.constant dense<0.000000e+00> : vector<8x32xf32>
    %320 = tpu.matmul %300, %5, %cst_155 {dimension_numbers = #tpu.dot_dimension_numbers<[1], [0], [0], [1], [0, 0, 1, 1], [], []>} : vector<8x8xbf16>, vector<8x32xbf16>, vector<8x32xf32> -> vector<8x32xf32>
    %cst_156 = arith.constant dense<0.000000e+00> : vector<8x32xf32>
    %321 = tpu.matmul %301, %21, %cst_156 {dimension_numbers = #tpu.dot_dimension_numbers<[1], [0], [0], [1], [0, 0, 1, 1], [], []>} : vector<8x32xbf16>, vector<32x32xbf16>, vector<8x32xf32> -> vector<8x32xf32>
    %322 = arith.addf %320, %321 : vector<8x32xf32>
    %323 = arith.addf %322, %37 : vector<8x32xf32>
    %324 = math.tanh %323 : vector<8x32xf32>
    %cst_157 = arith.constant dense<0.000000e+00> : vector<8x32xf32>
    %325 = tpu.matmul %300, %7, %cst_157 {dimension_numbers = #tpu.dot_dimension_numbers<[1], [0], [0], [1], [0, 0, 1, 1], [], []>} : vector<8x8xbf16>, vector<8x32xbf16>, vector<8x32xf32> -> vector<8x32xf32>
    %cst_158 = arith.constant dense<0.000000e+00> : vector<8x32xf32>
    %326 = tpu.matmul %301, %23, %cst_158 {dimension_numbers = #tpu.dot_dimension_numbers<[1], [0], [0], [1], [0, 0, 1, 1], [], []>} : vector<8x32xbf16>, vector<32x32xbf16>, vector<8x32xf32> -> vector<8x32xf32>
    %327 = arith.addf %325, %326 : vector<8x32xf32>
    %328 = arith.addf %327, %39 : vector<8x32xf32>
    %329 = arith.negf %328 : vector<8x32xf32>
    %330 = math.exp %329 : vector<8x32xf32>
    %cst_159 = arith.constant 1.000000e+00 : f32
    %331 = vector.broadcast %cst_159 : f32 to vector<8x32xf32>
    %332 = arith.addf %331, %330 : vector<8x32xf32>
    %333 = arith.divf %331, %332 : vector<8x32xf32>
    %334 = arith.mulf %319, %255 : vector<8x32xf32>
    %335 = arith.mulf %310, %324 : vector<8x32xf32>
    %336 = arith.addf %334, %335 : vector<8x32xf32>
    %337 = math.tanh %336 : vector<8x32xf32>
    %338 = arith.mulf %333, %337 : vector<8x32xf32>
    %339 = arith.truncf %338 : vector<8x32xf32> to vector<8x32xbf16>
    %340 = arith.truncf %296 : vector<8x32xf32> to vector<8x32xbf16>
    %cst_160 = arith.constant dense<0.000000e+00> : vector<8x32xf32>
    %341 = tpu.matmul %339, %9, %cst_160 {dimension_numbers = #tpu.dot_dimension_numbers<[1], [0], [0], [1], [0, 0, 1, 1], [], []>} : vector<8x32xbf16>, vector<32x32xbf16>, vector<8x32xf32> -> vector<8x32xf32>
    %cst_161 = arith.constant dense<0.000000e+00> : vector<8x32xf32>
    %342 = tpu.matmul %340, %25, %cst_161 {dimension_numbers = #tpu.dot_dimension_numbers<[1], [0], [0], [1], [0, 0, 1, 1], [], []>} : vector<8x32xbf16>, vector<32x32xbf16>, vector<8x32xf32> -> vector<8x32xf32>
    %343 = arith.addf %341, %342 : vector<8x32xf32>
    %344 = arith.addf %343, %41 : vector<8x32xf32>
    %345 = arith.negf %344 : vector<8x32xf32>
    %346 = math.exp %345 : vector<8x32xf32>
    %cst_162 = arith.constant 1.000000e+00 : f32
    %347 = vector.broadcast %cst_162 : f32 to vector<8x32xf32>
    %348 = arith.addf %347, %346 : vector<8x32xf32>
    %349 = arith.divf %347, %348 : vector<8x32xf32>
    %cst_163 = arith.constant dense<0.000000e+00> : vector<8x32xf32>
    %350 = tpu.matmul %339, %11, %cst_163 {dimension_numbers = #tpu.dot_dimension_numbers<[1], [0], [0], [1], [0, 0, 1, 1], [], []>} : vector<8x32xbf16>, vector<32x32xbf16>, vector<8x32xf32> -> vector<8x32xf32>
    %cst_164 = arith.constant dense<0.000000e+00> : vector<8x32xf32>
    %351 = tpu.matmul %340, %27, %cst_164 {dimension_numbers = #tpu.dot_dimension_numbers<[1], [0], [0], [1], [0, 0, 1, 1], [], []>} : vector<8x32xbf16>, vector<32x32xbf16>, vector<8x32xf32> -> vector<8x32xf32>
    %352 = arith.addf %350, %351 : vector<8x32xf32>
    %353 = arith.addf %352, %43 : vector<8x32xf32>
    %354 = arith.negf %353 : vector<8x32xf32>
    %355 = math.exp %354 : vector<8x32xf32>
    %cst_165 = arith.constant 1.000000e+00 : f32
    %356 = vector.broadcast %cst_165 : f32 to vector<8x32xf32>
    %357 = arith.addf %356, %355 : vector<8x32xf32>
    %358 = arith.divf %356, %357 : vector<8x32xf32>
    %cst_166 = arith.constant dense<0.000000e+00> : vector<8x32xf32>
    %359 = tpu.matmul %339, %13, %cst_166 {dimension_numbers = #tpu.dot_dimension_numbers<[1], [0], [0], [1], [0, 0, 1, 1], [], []>} : vector<8x32xbf16>, vector<32x32xbf16>, vector<8x32xf32> -> vector<8x32xf32>
    %cst_167 = arith.constant dense<0.000000e+00> : vector<8x32xf32>
    %360 = tpu.matmul %340, %29, %cst_167 {dimension_numbers = #tpu.dot_dimension_numbers<[1], [0], [0], [1], [0, 0, 1, 1], [], []>} : vector<8x32xbf16>, vector<32x32xbf16>, vector<8x32xf32> -> vector<8x32xf32>
    %361 = arith.addf %359, %360 : vector<8x32xf32>
    %362 = arith.addf %361, %45 : vector<8x32xf32>
    %363 = math.tanh %362 : vector<8x32xf32>
    %cst_168 = arith.constant dense<0.000000e+00> : vector<8x32xf32>
    %364 = tpu.matmul %339, %15, %cst_168 {dimension_numbers = #tpu.dot_dimension_numbers<[1], [0], [0], [1], [0, 0, 1, 1], [], []>} : vector<8x32xbf16>, vector<32x32xbf16>, vector<8x32xf32> -> vector<8x32xf32>
    %cst_169 = arith.constant dense<0.000000e+00> : vector<8x32xf32>
    %365 = tpu.matmul %340, %31, %cst_169 {dimension_numbers = #tpu.dot_dimension_numbers<[1], [0], [0], [1], [0, 0, 1, 1], [], []>} : vector<8x32xbf16>, vector<32x32xbf16>, vector<8x32xf32> -> vector<8x32xf32>
    %366 = arith.addf %364, %365 : vector<8x32xf32>
    %367 = arith.addf %366, %47 : vector<8x32xf32>
    %368 = arith.negf %367 : vector<8x32xf32>
    %369 = math.exp %368 : vector<8x32xf32>
    %cst_170 = arith.constant 1.000000e+00 : f32
    %370 = vector.broadcast %cst_170 : f32 to vector<8x32xf32>
    %371 = arith.addf %370, %369 : vector<8x32xf32>
    %372 = arith.divf %370, %371 : vector<8x32xf32>
    %373 = arith.mulf %358, %294 : vector<8x32xf32>
    %374 = arith.mulf %349, %363 : vector<8x32xf32>
    %375 = arith.addf %373, %374 : vector<8x32xf32>
    %376 = math.tanh %375 : vector<8x32xf32>
    %377 = arith.mulf %372, %376 : vector<8x32xf32>
    %c4_i32 = arith.constant 4 : i32
    %378 = arith.index_cast %c4_i32 : i32 to index
    %c0_171 = arith.constant 0 : index
    %c0_172 = arith.constant 0 : index
    %379 = vector.load %arg0[%378, %c0_171, %c0_172] : memref<8x8x8xf32, #tpu.memory_space<vmem>>, vector<1x8x8xf32>
    %380 = vector.shape_cast %379 : vector<1x8x8xf32> to vector<8x8xf32>
    %381 = arith.truncf %380 : vector<8x8xf32> to vector<8x8xbf16>
    %382 = arith.truncf %338 : vector<8x32xf32> to vector<8x32xbf16>
    %cst_173 = arith.constant dense<0.000000e+00> : vector<8x32xf32>
    %383 = tpu.matmul %381, %1, %cst_173 {dimension_numbers = #tpu.dot_dimension_numbers<[1], [0], [0], [1], [0, 0, 1, 1], [], []>} : vector<8x8xbf16>, vector<8x32xbf16>, vector<8x32xf32> -> vector<8x32xf32>
    %cst_174 = arith.constant dense<0.000000e+00> : vector<8x32xf32>
    %384 = tpu.matmul %382, %17, %cst_174 {dimension_numbers = #tpu.dot_dimension_numbers<[1], [0], [0], [1], [0, 0, 1, 1], [], []>} : vector<8x32xbf16>, vector<32x32xbf16>, vector<8x32xf32> -> vector<8x32xf32>
    %385 = arith.addf %383, %384 : vector<8x32xf32>
    %386 = arith.addf %385, %33 : vector<8x32xf32>
    %387 = arith.negf %386 : vector<8x32xf32>
    %388 = math.exp %387 : vector<8x32xf32>
    %cst_175 = arith.constant 1.000000e+00 : f32
    %389 = vector.broadcast %cst_175 : f32 to vector<8x32xf32>
    %390 = arith.addf %389, %388 : vector<8x32xf32>
    %391 = arith.divf %389, %390 : vector<8x32xf32>
    %cst_176 = arith.constant dense<0.000000e+00> : vector<8x32xf32>
    %392 = tpu.matmul %381, %3, %cst_176 {dimension_numbers = #tpu.dot_dimension_numbers<[1], [0], [0], [1], [0, 0, 1, 1], [], []>} : vector<8x8xbf16>, vector<8x32xbf16>, vector<8x32xf32> -> vector<8x32xf32>
    %cst_177 = arith.constant dense<0.000000e+00> : vector<8x32xf32>
    %393 = tpu.matmul %382, %19, %cst_177 {dimension_numbers = #tpu.dot_dimension_numbers<[1], [0], [0], [1], [0, 0, 1, 1], [], []>} : vector<8x32xbf16>, vector<32x32xbf16>, vector<8x32xf32> -> vector<8x32xf32>
    %394 = arith.addf %392, %393 : vector<8x32xf32>
    %395 = arith.addf %394, %35 : vector<8x32xf32>
    %396 = arith.negf %395 : vector<8x32xf32>
    %397 = math.exp %396 : vector<8x32xf32>
    %cst_178 = arith.constant 1.000000e+00 : f32
    %398 = vector.broadcast %cst_178 : f32 to vector<8x32xf32>
    %399 = arith.addf %398, %397 : vector<8x32xf32>
    %400 = arith.divf %398, %399 : vector<8x32xf32>
    %cst_179 = arith.constant dense<0.000000e+00> : vector<8x32xf32>
    %401 = tpu.matmul %381, %5, %cst_179 {dimension_numbers = #tpu.dot_dimension_numbers<[1], [0], [0], [1], [0, 0, 1, 1], [], []>} : vector<8x8xbf16>, vector<8x32xbf16>, vector<8x32xf32> -> vector<8x32xf32>
    %cst_180 = arith.constant dense<0.000000e+00> : vector<8x32xf32>
    %402 = tpu.matmul %382, %21, %cst_180 {dimension_numbers = #tpu.dot_dimension_numbers<[1], [0], [0], [1], [0, 0, 1, 1], [], []>} : vector<8x32xbf16>, vector<32x32xbf16>, vector<8x32xf32> -> vector<8x32xf32>
    %403 = arith.addf %401, %402 : vector<8x32xf32>
    %404 = arith.addf %403, %37 : vector<8x32xf32>
    %405 = math.tanh %404 : vector<8x32xf32>
    %cst_181 = arith.constant dense<0.000000e+00> : vector<8x32xf32>
    %406 = tpu.matmul %381, %7, %cst_181 {dimension_numbers = #tpu.dot_dimension_numbers<[1], [0], [0], [1], [0, 0, 1, 1], [], []>} : vector<8x8xbf16>, vector<8x32xbf16>, vector<8x32xf32> -> vector<8x32xf32>
    %cst_182 = arith.constant dense<0.000000e+00> : vector<8x32xf32>
    %407 = tpu.matmul %382, %23, %cst_182 {dimension_numbers = #tpu.dot_dimension_numbers<[1], [0], [0], [1], [0, 0, 1, 1], [], []>} : vector<8x32xbf16>, vector<32x32xbf16>, vector<8x32xf32> -> vector<8x32xf32>
    %408 = arith.addf %406, %407 : vector<8x32xf32>
    %409 = arith.addf %408, %39 : vector<8x32xf32>
    %410 = arith.negf %409 : vector<8x32xf32>
    %411 = math.exp %410 : vector<8x32xf32>
    %cst_183 = arith.constant 1.000000e+00 : f32
    %412 = vector.broadcast %cst_183 : f32 to vector<8x32xf32>
    %413 = arith.addf %412, %411 : vector<8x32xf32>
    %414 = arith.divf %412, %413 : vector<8x32xf32>
    %415 = arith.mulf %400, %336 : vector<8x32xf32>
    %416 = arith.mulf %391, %405 : vector<8x32xf32>
    %417 = arith.addf %415, %416 : vector<8x32xf32>
    %418 = math.tanh %417 : vector<8x32xf32>
    %419 = arith.mulf %414, %418 : vector<8x32xf32>
    %420 = arith.truncf %419 : vector<8x32xf32> to vector<8x32xbf16>
    %421 = arith.truncf %377 : vector<8x32xf32> to vector<8x32xbf16>
    %cst_184 = arith.constant dense<0.000000e+00> : vector<8x32xf32>
    %422 = tpu.matmul %420, %9, %cst_184 {dimension_numbers = #tpu.dot_dimension_numbers<[1], [0], [0], [1], [0, 0, 1, 1], [], []>} : vector<8x32xbf16>, vector<32x32xbf16>, vector<8x32xf32> -> vector<8x32xf32>
    %cst_185 = arith.constant dense<0.000000e+00> : vector<8x32xf32>
    %423 = tpu.matmul %421, %25, %cst_185 {dimension_numbers = #tpu.dot_dimension_numbers<[1], [0], [0], [1], [0, 0, 1, 1], [], []>} : vector<8x32xbf16>, vector<32x32xbf16>, vector<8x32xf32> -> vector<8x32xf32>
    %424 = arith.addf %422, %423 : vector<8x32xf32>
    %425 = arith.addf %424, %41 : vector<8x32xf32>
    %426 = arith.negf %425 : vector<8x32xf32>
    %427 = math.exp %426 : vector<8x32xf32>
    %cst_186 = arith.constant 1.000000e+00 : f32
    %428 = vector.broadcast %cst_186 : f32 to vector<8x32xf32>
    %429 = arith.addf %428, %427 : vector<8x32xf32>
    %430 = arith.divf %428, %429 : vector<8x32xf32>
    %cst_187 = arith.constant dense<0.000000e+00> : vector<8x32xf32>
    %431 = tpu.matmul %420, %11, %cst_187 {dimension_numbers = #tpu.dot_dimension_numbers<[1], [0], [0], [1], [0, 0, 1, 1], [], []>} : vector<8x32xbf16>, vector<32x32xbf16>, vector<8x32xf32> -> vector<8x32xf32>
    %cst_188 = arith.constant dense<0.000000e+00> : vector<8x32xf32>
    %432 = tpu.matmul %421, %27, %cst_188 {dimension_numbers = #tpu.dot_dimension_numbers<[1], [0], [0], [1], [0, 0, 1, 1], [], []>} : vector<8x32xbf16>, vector<32x32xbf16>, vector<8x32xf32> -> vector<8x32xf32>
    %433 = arith.addf %431, %432 : vector<8x32xf32>
    %434 = arith.addf %433, %43 : vector<8x32xf32>
    %435 = arith.negf %434 : vector<8x32xf32>
    %436 = math.exp %435 : vector<8x32xf32>
    %cst_189 = arith.constant 1.000000e+00 : f32
    %437 = vector.broadcast %cst_189 : f32 to vector<8x32xf32>
    %438 = arith.addf %437, %436 : vector<8x32xf32>
    %439 = arith.divf %437, %438 : vector<8x32xf32>
    %cst_190 = arith.constant dense<0.000000e+00> : vector<8x32xf32>
    %440 = tpu.matmul %420, %13, %cst_190 {dimension_numbers = #tpu.dot_dimension_numbers<[1], [0], [0], [1], [0, 0, 1, 1], [], []>} : vector<8x32xbf16>, vector<32x32xbf16>, vector<8x32xf32> -> vector<8x32xf32>
    %cst_191 = arith.constant dense<0.000000e+00> : vector<8x32xf32>
    %441 = tpu.matmul %421, %29, %cst_191 {dimension_numbers = #tpu.dot_dimension_numbers<[1], [0], [0], [1], [0, 0, 1, 1], [], []>} : vector<8x32xbf16>, vector<32x32xbf16>, vector<8x32xf32> -> vector<8x32xf32>
    %442 = arith.addf %440, %441 : vector<8x32xf32>
    %443 = arith.addf %442, %45 : vector<8x32xf32>
    %444 = math.tanh %443 : vector<8x32xf32>
    %cst_192 = arith.constant dense<0.000000e+00> : vector<8x32xf32>
    %445 = tpu.matmul %420, %15, %cst_192 {dimension_numbers = #tpu.dot_dimension_numbers<[1], [0], [0], [1], [0, 0, 1, 1], [], []>} : vector<8x32xbf16>, vector<32x32xbf16>, vector<8x32xf32> -> vector<8x32xf32>
    %cst_193 = arith.constant dense<0.000000e+00> : vector<8x32xf32>
    %446 = tpu.matmul %421, %31, %cst_193 {dimension_numbers = #tpu.dot_dimension_numbers<[1], [0], [0], [1], [0, 0, 1, 1], [], []>} : vector<8x32xbf16>, vector<32x32xbf16>, vector<8x32xf32> -> vector<8x32xf32>
    %447 = arith.addf %445, %446 : vector<8x32xf32>
    %448 = arith.addf %447, %47 : vector<8x32xf32>
    %449 = arith.negf %448 : vector<8x32xf32>
    %450 = math.exp %449 : vector<8x32xf32>
    %cst_194 = arith.constant 1.000000e+00 : f32
    %451 = vector.broadcast %cst_194 : f32 to vector<8x32xf32>
    %452 = arith.addf %451, %450 : vector<8x32xf32>
    %453 = arith.divf %451, %452 : vector<8x32xf32>
    %454 = arith.mulf %439, %375 : vector<8x32xf32>
    %455 = arith.mulf %430, %444 : vector<8x32xf32>
    %456 = arith.addf %454, %455 : vector<8x32xf32>
    %457 = math.tanh %456 : vector<8x32xf32>
    %458 = arith.mulf %453, %457 : vector<8x32xf32>
    %c5_i32 = arith.constant 5 : i32
    %459 = arith.index_cast %c5_i32 : i32 to index
    %c0_195 = arith.constant 0 : index
    %c0_196 = arith.constant 0 : index
    %460 = vector.load %arg0[%459, %c0_195, %c0_196] : memref<8x8x8xf32, #tpu.memory_space<vmem>>, vector<1x8x8xf32>
    %461 = vector.shape_cast %460 : vector<1x8x8xf32> to vector<8x8xf32>
    %462 = arith.truncf %461 : vector<8x8xf32> to vector<8x8xbf16>
    %463 = arith.truncf %419 : vector<8x32xf32> to vector<8x32xbf16>
    %cst_197 = arith.constant dense<0.000000e+00> : vector<8x32xf32>
    %464 = tpu.matmul %462, %1, %cst_197 {dimension_numbers = #tpu.dot_dimension_numbers<[1], [0], [0], [1], [0, 0, 1, 1], [], []>} : vector<8x8xbf16>, vector<8x32xbf16>, vector<8x32xf32> -> vector<8x32xf32>
    %cst_198 = arith.constant dense<0.000000e+00> : vector<8x32xf32>
    %465 = tpu.matmul %463, %17, %cst_198 {dimension_numbers = #tpu.dot_dimension_numbers<[1], [0], [0], [1], [0, 0, 1, 1], [], []>} : vector<8x32xbf16>, vector<32x32xbf16>, vector<8x32xf32> -> vector<8x32xf32>
    %466 = arith.addf %464, %465 : vector<8x32xf32>
    %467 = arith.addf %466, %33 : vector<8x32xf32>
    %468 = arith.negf %467 : vector<8x32xf32>
    %469 = math.exp %468 : vector<8x32xf32>
    %cst_199 = arith.constant 1.000000e+00 : f32
    %470 = vector.broadcast %cst_199 : f32 to vector<8x32xf32>
    %471 = arith.addf %470, %469 : vector<8x32xf32>
    %472 = arith.divf %470, %471 : vector<8x32xf32>
    %cst_200 = arith.constant dense<0.000000e+00> : vector<8x32xf32>
    %473 = tpu.matmul %462, %3, %cst_200 {dimension_numbers = #tpu.dot_dimension_numbers<[1], [0], [0], [1], [0, 0, 1, 1], [], []>} : vector<8x8xbf16>, vector<8x32xbf16>, vector<8x32xf32> -> vector<8x32xf32>
    %cst_201 = arith.constant dense<0.000000e+00> : vector<8x32xf32>
    %474 = tpu.matmul %463, %19, %cst_201 {dimension_numbers = #tpu.dot_dimension_numbers<[1], [0], [0], [1], [0, 0, 1, 1], [], []>} : vector<8x32xbf16>, vector<32x32xbf16>, vector<8x32xf32> -> vector<8x32xf32>
    %475 = arith.addf %473, %474 : vector<8x32xf32>
    %476 = arith.addf %475, %35 : vector<8x32xf32>
    %477 = arith.negf %476 : vector<8x32xf32>
    %478 = math.exp %477 : vector<8x32xf32>
    %cst_202 = arith.constant 1.000000e+00 : f32
    %479 = vector.broadcast %cst_202 : f32 to vector<8x32xf32>
    %480 = arith.addf %479, %478 : vector<8x32xf32>
    %481 = arith.divf %479, %480 : vector<8x32xf32>
    %cst_203 = arith.constant dense<0.000000e+00> : vector<8x32xf32>
    %482 = tpu.matmul %462, %5, %cst_203 {dimension_numbers = #tpu.dot_dimension_numbers<[1], [0], [0], [1], [0, 0, 1, 1], [], []>} : vector<8x8xbf16>, vector<8x32xbf16>, vector<8x32xf32> -> vector<8x32xf32>
    %cst_204 = arith.constant dense<0.000000e+00> : vector<8x32xf32>
    %483 = tpu.matmul %463, %21, %cst_204 {dimension_numbers = #tpu.dot_dimension_numbers<[1], [0], [0], [1], [0, 0, 1, 1], [], []>} : vector<8x32xbf16>, vector<32x32xbf16>, vector<8x32xf32> -> vector<8x32xf32>
    %484 = arith.addf %482, %483 : vector<8x32xf32>
    %485 = arith.addf %484, %37 : vector<8x32xf32>
    %486 = math.tanh %485 : vector<8x32xf32>
    %cst_205 = arith.constant dense<0.000000e+00> : vector<8x32xf32>
    %487 = tpu.matmul %462, %7, %cst_205 {dimension_numbers = #tpu.dot_dimension_numbers<[1], [0], [0], [1], [0, 0, 1, 1], [], []>} : vector<8x8xbf16>, vector<8x32xbf16>, vector<8x32xf32> -> vector<8x32xf32>
    %cst_206 = arith.constant dense<0.000000e+00> : vector<8x32xf32>
    %488 = tpu.matmul %463, %23, %cst_206 {dimension_numbers = #tpu.dot_dimension_numbers<[1], [0], [0], [1], [0, 0, 1, 1], [], []>} : vector<8x32xbf16>, vector<32x32xbf16>, vector<8x32xf32> -> vector<8x32xf32>
    %489 = arith.addf %487, %488 : vector<8x32xf32>
    %490 = arith.addf %489, %39 : vector<8x32xf32>
    %491 = arith.negf %490 : vector<8x32xf32>
    %492 = math.exp %491 : vector<8x32xf32>
    %cst_207 = arith.constant 1.000000e+00 : f32
    %493 = vector.broadcast %cst_207 : f32 to vector<8x32xf32>
    %494 = arith.addf %493, %492 : vector<8x32xf32>
    %495 = arith.divf %493, %494 : vector<8x32xf32>
    %496 = arith.mulf %481, %417 : vector<8x32xf32>
    %497 = arith.mulf %472, %486 : vector<8x32xf32>
    %498 = arith.addf %496, %497 : vector<8x32xf32>
    %499 = math.tanh %498 : vector<8x32xf32>
    %500 = arith.mulf %495, %499 : vector<8x32xf32>
    %501 = arith.truncf %500 : vector<8x32xf32> to vector<8x32xbf16>
    %502 = arith.truncf %458 : vector<8x32xf32> to vector<8x32xbf16>
    %cst_208 = arith.constant dense<0.000000e+00> : vector<8x32xf32>
    %503 = tpu.matmul %501, %9, %cst_208 {dimension_numbers = #tpu.dot_dimension_numbers<[1], [0], [0], [1], [0, 0, 1, 1], [], []>} : vector<8x32xbf16>, vector<32x32xbf16>, vector<8x32xf32> -> vector<8x32xf32>
    %cst_209 = arith.constant dense<0.000000e+00> : vector<8x32xf32>
    %504 = tpu.matmul %502, %25, %cst_209 {dimension_numbers = #tpu.dot_dimension_numbers<[1], [0], [0], [1], [0, 0, 1, 1], [], []>} : vector<8x32xbf16>, vector<32x32xbf16>, vector<8x32xf32> -> vector<8x32xf32>
    %505 = arith.addf %503, %504 : vector<8x32xf32>
    %506 = arith.addf %505, %41 : vector<8x32xf32>
    %507 = arith.negf %506 : vector<8x32xf32>
    %508 = math.exp %507 : vector<8x32xf32>
    %cst_210 = arith.constant 1.000000e+00 : f32
    %509 = vector.broadcast %cst_210 : f32 to vector<8x32xf32>
    %510 = arith.addf %509, %508 : vector<8x32xf32>
    %511 = arith.divf %509, %510 : vector<8x32xf32>
    %cst_211 = arith.constant dense<0.000000e+00> : vector<8x32xf32>
    %512 = tpu.matmul %501, %11, %cst_211 {dimension_numbers = #tpu.dot_dimension_numbers<[1], [0], [0], [1], [0, 0, 1, 1], [], []>} : vector<8x32xbf16>, vector<32x32xbf16>, vector<8x32xf32> -> vector<8x32xf32>
    %cst_212 = arith.constant dense<0.000000e+00> : vector<8x32xf32>
    %513 = tpu.matmul %502, %27, %cst_212 {dimension_numbers = #tpu.dot_dimension_numbers<[1], [0], [0], [1], [0, 0, 1, 1], [], []>} : vector<8x32xbf16>, vector<32x32xbf16>, vector<8x32xf32> -> vector<8x32xf32>
    %514 = arith.addf %512, %513 : vector<8x32xf32>
    %515 = arith.addf %514, %43 : vector<8x32xf32>
    %516 = arith.negf %515 : vector<8x32xf32>
    %517 = math.exp %516 : vector<8x32xf32>
    %cst_213 = arith.constant 1.000000e+00 : f32
    %518 = vector.broadcast %cst_213 : f32 to vector<8x32xf32>
    %519 = arith.addf %518, %517 : vector<8x32xf32>
    %520 = arith.divf %518, %519 : vector<8x32xf32>
    %cst_214 = arith.constant dense<0.000000e+00> : vector<8x32xf32>
    %521 = tpu.matmul %501, %13, %cst_214 {dimension_numbers = #tpu.dot_dimension_numbers<[1], [0], [0], [1], [0, 0, 1, 1], [], []>} : vector<8x32xbf16>, vector<32x32xbf16>, vector<8x32xf32> -> vector<8x32xf32>
    %cst_215 = arith.constant dense<0.000000e+00> : vector<8x32xf32>
    %522 = tpu.matmul %502, %29, %cst_215 {dimension_numbers = #tpu.dot_dimension_numbers<[1], [0], [0], [1], [0, 0, 1, 1], [], []>} : vector<8x32xbf16>, vector<32x32xbf16>, vector<8x32xf32> -> vector<8x32xf32>
    %523 = arith.addf %521, %522 : vector<8x32xf32>
    %524 = arith.addf %523, %45 : vector<8x32xf32>
    %525 = math.tanh %524 : vector<8x32xf32>
    %cst_216 = arith.constant dense<0.000000e+00> : vector<8x32xf32>
    %526 = tpu.matmul %501, %15, %cst_216 {dimension_numbers = #tpu.dot_dimension_numbers<[1], [0], [0], [1], [0, 0, 1, 1], [], []>} : vector<8x32xbf16>, vector<32x32xbf16>, vector<8x32xf32> -> vector<8x32xf32>
    %cst_217 = arith.constant dense<0.000000e+00> : vector<8x32xf32>
    %527 = tpu.matmul %502, %31, %cst_217 {dimension_numbers = #tpu.dot_dimension_numbers<[1], [0], [0], [1], [0, 0, 1, 1], [], []>} : vector<8x32xbf16>, vector<32x32xbf16>, vector<8x32xf32> -> vector<8x32xf32>
    %528 = arith.addf %526, %527 : vector<8x32xf32>
    %529 = arith.addf %528, %47 : vector<8x32xf32>
    %530 = arith.negf %529 : vector<8x32xf32>
    %531 = math.exp %530 : vector<8x32xf32>
    %cst_218 = arith.constant 1.000000e+00 : f32
    %532 = vector.broadcast %cst_218 : f32 to vector<8x32xf32>
    %533 = arith.addf %532, %531 : vector<8x32xf32>
    %534 = arith.divf %532, %533 : vector<8x32xf32>
    %535 = arith.mulf %520, %456 : vector<8x32xf32>
    %536 = arith.mulf %511, %525 : vector<8x32xf32>
    %537 = arith.addf %535, %536 : vector<8x32xf32>
    %538 = math.tanh %537 : vector<8x32xf32>
    %539 = arith.mulf %534, %538 : vector<8x32xf32>
    %c6_i32 = arith.constant 6 : i32
    %540 = arith.index_cast %c6_i32 : i32 to index
    %c0_219 = arith.constant 0 : index
    %c0_220 = arith.constant 0 : index
    %541 = vector.load %arg0[%540, %c0_219, %c0_220] : memref<8x8x8xf32, #tpu.memory_space<vmem>>, vector<1x8x8xf32>
    %542 = vector.shape_cast %541 : vector<1x8x8xf32> to vector<8x8xf32>
    %543 = arith.truncf %542 : vector<8x8xf32> to vector<8x8xbf16>
    %544 = arith.truncf %500 : vector<8x32xf32> to vector<8x32xbf16>
    %cst_221 = arith.constant dense<0.000000e+00> : vector<8x32xf32>
    %545 = tpu.matmul %543, %1, %cst_221 {dimension_numbers = #tpu.dot_dimension_numbers<[1], [0], [0], [1], [0, 0, 1, 1], [], []>} : vector<8x8xbf16>, vector<8x32xbf16>, vector<8x32xf32> -> vector<8x32xf32>
    %cst_222 = arith.constant dense<0.000000e+00> : vector<8x32xf32>
    %546 = tpu.matmul %544, %17, %cst_222 {dimension_numbers = #tpu.dot_dimension_numbers<[1], [0], [0], [1], [0, 0, 1, 1], [], []>} : vector<8x32xbf16>, vector<32x32xbf16>, vector<8x32xf32> -> vector<8x32xf32>
    %547 = arith.addf %545, %546 : vector<8x32xf32>
    %548 = arith.addf %547, %33 : vector<8x32xf32>
    %549 = arith.negf %548 : vector<8x32xf32>
    %550 = math.exp %549 : vector<8x32xf32>
    %cst_223 = arith.constant 1.000000e+00 : f32
    %551 = vector.broadcast %cst_223 : f32 to vector<8x32xf32>
    %552 = arith.addf %551, %550 : vector<8x32xf32>
    %553 = arith.divf %551, %552 : vector<8x32xf32>
    %cst_224 = arith.constant dense<0.000000e+00> : vector<8x32xf32>
    %554 = tpu.matmul %543, %3, %cst_224 {dimension_numbers = #tpu.dot_dimension_numbers<[1], [0], [0], [1], [0, 0, 1, 1], [], []>} : vector<8x8xbf16>, vector<8x32xbf16>, vector<8x32xf32> -> vector<8x32xf32>
    %cst_225 = arith.constant dense<0.000000e+00> : vector<8x32xf32>
    %555 = tpu.matmul %544, %19, %cst_225 {dimension_numbers = #tpu.dot_dimension_numbers<[1], [0], [0], [1], [0, 0, 1, 1], [], []>} : vector<8x32xbf16>, vector<32x32xbf16>, vector<8x32xf32> -> vector<8x32xf32>
    %556 = arith.addf %554, %555 : vector<8x32xf32>
    %557 = arith.addf %556, %35 : vector<8x32xf32>
    %558 = arith.negf %557 : vector<8x32xf32>
    %559 = math.exp %558 : vector<8x32xf32>
    %cst_226 = arith.constant 1.000000e+00 : f32
    %560 = vector.broadcast %cst_226 : f32 to vector<8x32xf32>
    %561 = arith.addf %560, %559 : vector<8x32xf32>
    %562 = arith.divf %560, %561 : vector<8x32xf32>
    %cst_227 = arith.constant dense<0.000000e+00> : vector<8x32xf32>
    %563 = tpu.matmul %543, %5, %cst_227 {dimension_numbers = #tpu.dot_dimension_numbers<[1], [0], [0], [1], [0, 0, 1, 1], [], []>} : vector<8x8xbf16>, vector<8x32xbf16>, vector<8x32xf32> -> vector<8x32xf32>
    %cst_228 = arith.constant dense<0.000000e+00> : vector<8x32xf32>
    %564 = tpu.matmul %544, %21, %cst_228 {dimension_numbers = #tpu.dot_dimension_numbers<[1], [0], [0], [1], [0, 0, 1, 1], [], []>} : vector<8x32xbf16>, vector<32x32xbf16>, vector<8x32xf32> -> vector<8x32xf32>
    %565 = arith.addf %563, %564 : vector<8x32xf32>
    %566 = arith.addf %565, %37 : vector<8x32xf32>
    %567 = math.tanh %566 : vector<8x32xf32>
    %cst_229 = arith.constant dense<0.000000e+00> : vector<8x32xf32>
    %568 = tpu.matmul %543, %7, %cst_229 {dimension_numbers = #tpu.dot_dimension_numbers<[1], [0], [0], [1], [0, 0, 1, 1], [], []>} : vector<8x8xbf16>, vector<8x32xbf16>, vector<8x32xf32> -> vector<8x32xf32>
    %cst_230 = arith.constant dense<0.000000e+00> : vector<8x32xf32>
    %569 = tpu.matmul %544, %23, %cst_230 {dimension_numbers = #tpu.dot_dimension_numbers<[1], [0], [0], [1], [0, 0, 1, 1], [], []>} : vector<8x32xbf16>, vector<32x32xbf16>, vector<8x32xf32> -> vector<8x32xf32>
    %570 = arith.addf %568, %569 : vector<8x32xf32>
    %571 = arith.addf %570, %39 : vector<8x32xf32>
    %572 = arith.negf %571 : vector<8x32xf32>
    %573 = math.exp %572 : vector<8x32xf32>
    %cst_231 = arith.constant 1.000000e+00 : f32
    %574 = vector.broadcast %cst_231 : f32 to vector<8x32xf32>
    %575 = arith.addf %574, %573 : vector<8x32xf32>
    %576 = arith.divf %574, %575 : vector<8x32xf32>
    %577 = arith.mulf %562, %498 : vector<8x32xf32>
    %578 = arith.mulf %553, %567 : vector<8x32xf32>
    %579 = arith.addf %577, %578 : vector<8x32xf32>
    %580 = math.tanh %579 : vector<8x32xf32>
    %581 = arith.mulf %576, %580 : vector<8x32xf32>
    %582 = arith.truncf %581 : vector<8x32xf32> to vector<8x32xbf16>
    %583 = arith.truncf %539 : vector<8x32xf32> to vector<8x32xbf16>
    %cst_232 = arith.constant dense<0.000000e+00> : vector<8x32xf32>
    %584 = tpu.matmul %582, %9, %cst_232 {dimension_numbers = #tpu.dot_dimension_numbers<[1], [0], [0], [1], [0, 0, 1, 1], [], []>} : vector<8x32xbf16>, vector<32x32xbf16>, vector<8x32xf32> -> vector<8x32xf32>
    %cst_233 = arith.constant dense<0.000000e+00> : vector<8x32xf32>
    %585 = tpu.matmul %583, %25, %cst_233 {dimension_numbers = #tpu.dot_dimension_numbers<[1], [0], [0], [1], [0, 0, 1, 1], [], []>} : vector<8x32xbf16>, vector<32x32xbf16>, vector<8x32xf32> -> vector<8x32xf32>
    %586 = arith.addf %584, %585 : vector<8x32xf32>
    %587 = arith.addf %586, %41 : vector<8x32xf32>
    %588 = arith.negf %587 : vector<8x32xf32>
    %589 = math.exp %588 : vector<8x32xf32>
    %cst_234 = arith.constant 1.000000e+00 : f32
    %590 = vector.broadcast %cst_234 : f32 to vector<8x32xf32>
    %591 = arith.addf %590, %589 : vector<8x32xf32>
    %592 = arith.divf %590, %591 : vector<8x32xf32>
    %cst_235 = arith.constant dense<0.000000e+00> : vector<8x32xf32>
    %593 = tpu.matmul %582, %11, %cst_235 {dimension_numbers = #tpu.dot_dimension_numbers<[1], [0], [0], [1], [0, 0, 1, 1], [], []>} : vector<8x32xbf16>, vector<32x32xbf16>, vector<8x32xf32> -> vector<8x32xf32>
    %cst_236 = arith.constant dense<0.000000e+00> : vector<8x32xf32>
    %594 = tpu.matmul %583, %27, %cst_236 {dimension_numbers = #tpu.dot_dimension_numbers<[1], [0], [0], [1], [0, 0, 1, 1], [], []>} : vector<8x32xbf16>, vector<32x32xbf16>, vector<8x32xf32> -> vector<8x32xf32>
    %595 = arith.addf %593, %594 : vector<8x32xf32>
    %596 = arith.addf %595, %43 : vector<8x32xf32>
    %597 = arith.negf %596 : vector<8x32xf32>
    %598 = math.exp %597 : vector<8x32xf32>
    %cst_237 = arith.constant 1.000000e+00 : f32
    %599 = vector.broadcast %cst_237 : f32 to vector<8x32xf32>
    %600 = arith.addf %599, %598 : vector<8x32xf32>
    %601 = arith.divf %599, %600 : vector<8x32xf32>
    %cst_238 = arith.constant dense<0.000000e+00> : vector<8x32xf32>
    %602 = tpu.matmul %582, %13, %cst_238 {dimension_numbers = #tpu.dot_dimension_numbers<[1], [0], [0], [1], [0, 0, 1, 1], [], []>} : vector<8x32xbf16>, vector<32x32xbf16>, vector<8x32xf32> -> vector<8x32xf32>
    %cst_239 = arith.constant dense<0.000000e+00> : vector<8x32xf32>
    %603 = tpu.matmul %583, %29, %cst_239 {dimension_numbers = #tpu.dot_dimension_numbers<[1], [0], [0], [1], [0, 0, 1, 1], [], []>} : vector<8x32xbf16>, vector<32x32xbf16>, vector<8x32xf32> -> vector<8x32xf32>
    %604 = arith.addf %602, %603 : vector<8x32xf32>
    %605 = arith.addf %604, %45 : vector<8x32xf32>
    %606 = math.tanh %605 : vector<8x32xf32>
    %cst_240 = arith.constant dense<0.000000e+00> : vector<8x32xf32>
    %607 = tpu.matmul %582, %15, %cst_240 {dimension_numbers = #tpu.dot_dimension_numbers<[1], [0], [0], [1], [0, 0, 1, 1], [], []>} : vector<8x32xbf16>, vector<32x32xbf16>, vector<8x32xf32> -> vector<8x32xf32>
    %cst_241 = arith.constant dense<0.000000e+00> : vector<8x32xf32>
    %608 = tpu.matmul %583, %31, %cst_241 {dimension_numbers = #tpu.dot_dimension_numbers<[1], [0], [0], [1], [0, 0, 1, 1], [], []>} : vector<8x32xbf16>, vector<32x32xbf16>, vector<8x32xf32> -> vector<8x32xf32>
    %609 = arith.addf %607, %608 : vector<8x32xf32>
    %610 = arith.addf %609, %47 : vector<8x32xf32>
    %611 = arith.negf %610 : vector<8x32xf32>
    %612 = math.exp %611 : vector<8x32xf32>
    %cst_242 = arith.constant 1.000000e+00 : f32
    %613 = vector.broadcast %cst_242 : f32 to vector<8x32xf32>
    %614 = arith.addf %613, %612 : vector<8x32xf32>
    %615 = arith.divf %613, %614 : vector<8x32xf32>
    %616 = arith.mulf %601, %537 : vector<8x32xf32>
    %617 = arith.mulf %592, %606 : vector<8x32xf32>
    %618 = arith.addf %616, %617 : vector<8x32xf32>
    %619 = math.tanh %618 : vector<8x32xf32>
    %620 = arith.mulf %615, %619 : vector<8x32xf32>
    %c7_i32 = arith.constant 7 : i32
    %621 = arith.index_cast %c7_i32 : i32 to index
    %c0_243 = arith.constant 0 : index
    %c0_244 = arith.constant 0 : index
    %622 = vector.load %arg0[%621, %c0_243, %c0_244] : memref<8x8x8xf32, #tpu.memory_space<vmem>>, vector<1x8x8xf32>
    %623 = vector.shape_cast %622 : vector<1x8x8xf32> to vector<8x8xf32>
    %624 = arith.truncf %623 : vector<8x8xf32> to vector<8x8xbf16>
    %625 = arith.truncf %581 : vector<8x32xf32> to vector<8x32xbf16>
    %cst_245 = arith.constant dense<0.000000e+00> : vector<8x32xf32>
    %626 = tpu.matmul %624, %1, %cst_245 {dimension_numbers = #tpu.dot_dimension_numbers<[1], [0], [0], [1], [0, 0, 1, 1], [], []>} : vector<8x8xbf16>, vector<8x32xbf16>, vector<8x32xf32> -> vector<8x32xf32>
    %cst_246 = arith.constant dense<0.000000e+00> : vector<8x32xf32>
    %627 = tpu.matmul %625, %17, %cst_246 {dimension_numbers = #tpu.dot_dimension_numbers<[1], [0], [0], [1], [0, 0, 1, 1], [], []>} : vector<8x32xbf16>, vector<32x32xbf16>, vector<8x32xf32> -> vector<8x32xf32>
    %628 = arith.addf %626, %627 : vector<8x32xf32>
    %629 = arith.addf %628, %33 : vector<8x32xf32>
    %630 = arith.negf %629 : vector<8x32xf32>
    %631 = math.exp %630 : vector<8x32xf32>
    %cst_247 = arith.constant 1.000000e+00 : f32
    %632 = vector.broadcast %cst_247 : f32 to vector<8x32xf32>
    %633 = arith.addf %632, %631 : vector<8x32xf32>
    %634 = arith.divf %632, %633 : vector<8x32xf32>
    %cst_248 = arith.constant dense<0.000000e+00> : vector<8x32xf32>
    %635 = tpu.matmul %624, %3, %cst_248 {dimension_numbers = #tpu.dot_dimension_numbers<[1], [0], [0], [1], [0, 0, 1, 1], [], []>} : vector<8x8xbf16>, vector<8x32xbf16>, vector<8x32xf32> -> vector<8x32xf32>
    %cst_249 = arith.constant dense<0.000000e+00> : vector<8x32xf32>
    %636 = tpu.matmul %625, %19, %cst_249 {dimension_numbers = #tpu.dot_dimension_numbers<[1], [0], [0], [1], [0, 0, 1, 1], [], []>} : vector<8x32xbf16>, vector<32x32xbf16>, vector<8x32xf32> -> vector<8x32xf32>
    %637 = arith.addf %635, %636 : vector<8x32xf32>
    %638 = arith.addf %637, %35 : vector<8x32xf32>
    %639 = arith.negf %638 : vector<8x32xf32>
    %640 = math.exp %639 : vector<8x32xf32>
    %cst_250 = arith.constant 1.000000e+00 : f32
    %641 = vector.broadcast %cst_250 : f32 to vector<8x32xf32>
    %642 = arith.addf %641, %640 : vector<8x32xf32>
    %643 = arith.divf %641, %642 : vector<8x32xf32>
    %cst_251 = arith.constant dense<0.000000e+00> : vector<8x32xf32>
    %644 = tpu.matmul %624, %5, %cst_251 {dimension_numbers = #tpu.dot_dimension_numbers<[1], [0], [0], [1], [0, 0, 1, 1], [], []>} : vector<8x8xbf16>, vector<8x32xbf16>, vector<8x32xf32> -> vector<8x32xf32>
    %cst_252 = arith.constant dense<0.000000e+00> : vector<8x32xf32>
    %645 = tpu.matmul %625, %21, %cst_252 {dimension_numbers = #tpu.dot_dimension_numbers<[1], [0], [0], [1], [0, 0, 1, 1], [], []>} : vector<8x32xbf16>, vector<32x32xbf16>, vector<8x32xf32> -> vector<8x32xf32>
    %646 = arith.addf %644, %645 : vector<8x32xf32>
    %647 = arith.addf %646, %37 : vector<8x32xf32>
    %648 = math.tanh %647 : vector<8x32xf32>
    %cst_253 = arith.constant dense<0.000000e+00> : vector<8x32xf32>
    %649 = tpu.matmul %624, %7, %cst_253 {dimension_numbers = #tpu.dot_dimension_numbers<[1], [0], [0], [1], [0, 0, 1, 1], [], []>} : vector<8x8xbf16>, vector<8x32xbf16>, vector<8x32xf32> -> vector<8x32xf32>
    %cst_254 = arith.constant dense<0.000000e+00> : vector<8x32xf32>
    %650 = tpu.matmul %625, %23, %cst_254 {dimension_numbers = #tpu.dot_dimension_numbers<[1], [0], [0], [1], [0, 0, 1, 1], [], []>} : vector<8x32xbf16>, vector<32x32xbf16>, vector<8x32xf32> -> vector<8x32xf32>
    %651 = arith.addf %649, %650 : vector<8x32xf32>
    %652 = arith.addf %651, %39 : vector<8x32xf32>
    %653 = arith.negf %652 : vector<8x32xf32>
    %654 = math.exp %653 : vector<8x32xf32>
    %cst_255 = arith.constant 1.000000e+00 : f32
    %655 = vector.broadcast %cst_255 : f32 to vector<8x32xf32>
    %656 = arith.addf %655, %654 : vector<8x32xf32>
    %657 = arith.divf %655, %656 : vector<8x32xf32>
    %658 = arith.mulf %643, %579 : vector<8x32xf32>
    %659 = arith.mulf %634, %648 : vector<8x32xf32>
    %660 = arith.addf %658, %659 : vector<8x32xf32>
    %661 = math.tanh %660 : vector<8x32xf32>
    %662 = arith.mulf %657, %661 : vector<8x32xf32>
    %663 = arith.truncf %662 : vector<8x32xf32> to vector<8x32xbf16>
    %664 = arith.truncf %620 : vector<8x32xf32> to vector<8x32xbf16>
    %cst_256 = arith.constant dense<0.000000e+00> : vector<8x32xf32>
    %665 = tpu.matmul %663, %9, %cst_256 {dimension_numbers = #tpu.dot_dimension_numbers<[1], [0], [0], [1], [0, 0, 1, 1], [], []>} : vector<8x32xbf16>, vector<32x32xbf16>, vector<8x32xf32> -> vector<8x32xf32>
    %cst_257 = arith.constant dense<0.000000e+00> : vector<8x32xf32>
    %666 = tpu.matmul %664, %25, %cst_257 {dimension_numbers = #tpu.dot_dimension_numbers<[1], [0], [0], [1], [0, 0, 1, 1], [], []>} : vector<8x32xbf16>, vector<32x32xbf16>, vector<8x32xf32> -> vector<8x32xf32>
    %667 = arith.addf %665, %666 : vector<8x32xf32>
    %668 = arith.addf %667, %41 : vector<8x32xf32>
    %669 = arith.negf %668 : vector<8x32xf32>
    %670 = math.exp %669 : vector<8x32xf32>
    %cst_258 = arith.constant 1.000000e+00 : f32
    %671 = vector.broadcast %cst_258 : f32 to vector<8x32xf32>
    %672 = arith.addf %671, %670 : vector<8x32xf32>
    %673 = arith.divf %671, %672 : vector<8x32xf32>
    %cst_259 = arith.constant dense<0.000000e+00> : vector<8x32xf32>
    %674 = tpu.matmul %663, %11, %cst_259 {dimension_numbers = #tpu.dot_dimension_numbers<[1], [0], [0], [1], [0, 0, 1, 1], [], []>} : vector<8x32xbf16>, vector<32x32xbf16>, vector<8x32xf32> -> vector<8x32xf32>
    %cst_260 = arith.constant dense<0.000000e+00> : vector<8x32xf32>
    %675 = tpu.matmul %664, %27, %cst_260 {dimension_numbers = #tpu.dot_dimension_numbers<[1], [0], [0], [1], [0, 0, 1, 1], [], []>} : vector<8x32xbf16>, vector<32x32xbf16>, vector<8x32xf32> -> vector<8x32xf32>
    %676 = arith.addf %674, %675 : vector<8x32xf32>
    %677 = arith.addf %676, %43 : vector<8x32xf32>
    %678 = arith.negf %677 : vector<8x32xf32>
    %679 = math.exp %678 : vector<8x32xf32>
    %cst_261 = arith.constant 1.000000e+00 : f32
    %680 = vector.broadcast %cst_261 : f32 to vector<8x32xf32>
    %681 = arith.addf %680, %679 : vector<8x32xf32>
    %682 = arith.divf %680, %681 : vector<8x32xf32>
    %cst_262 = arith.constant dense<0.000000e+00> : vector<8x32xf32>
    %683 = tpu.matmul %663, %13, %cst_262 {dimension_numbers = #tpu.dot_dimension_numbers<[1], [0], [0], [1], [0, 0, 1, 1], [], []>} : vector<8x32xbf16>, vector<32x32xbf16>, vector<8x32xf32> -> vector<8x32xf32>
    %cst_263 = arith.constant dense<0.000000e+00> : vector<8x32xf32>
    %684 = tpu.matmul %664, %29, %cst_263 {dimension_numbers = #tpu.dot_dimension_numbers<[1], [0], [0], [1], [0, 0, 1, 1], [], []>} : vector<8x32xbf16>, vector<32x32xbf16>, vector<8x32xf32> -> vector<8x32xf32>
    %685 = arith.addf %683, %684 : vector<8x32xf32>
    %686 = arith.addf %685, %45 : vector<8x32xf32>
    %687 = math.tanh %686 : vector<8x32xf32>
    %cst_264 = arith.constant dense<0.000000e+00> : vector<8x32xf32>
    %688 = tpu.matmul %663, %15, %cst_264 {dimension_numbers = #tpu.dot_dimension_numbers<[1], [0], [0], [1], [0, 0, 1, 1], [], []>} : vector<8x32xbf16>, vector<32x32xbf16>, vector<8x32xf32> -> vector<8x32xf32>
    %cst_265 = arith.constant dense<0.000000e+00> : vector<8x32xf32>
    %689 = tpu.matmul %664, %31, %cst_265 {dimension_numbers = #tpu.dot_dimension_numbers<[1], [0], [0], [1], [0, 0, 1, 1], [], []>} : vector<8x32xbf16>, vector<32x32xbf16>, vector<8x32xf32> -> vector<8x32xf32>
    %690 = arith.addf %688, %689 : vector<8x32xf32>
    %691 = arith.addf %690, %47 : vector<8x32xf32>
    %692 = arith.negf %691 : vector<8x32xf32>
    %693 = math.exp %692 : vector<8x32xf32>
    %cst_266 = arith.constant 1.000000e+00 : f32
    %694 = vector.broadcast %cst_266 : f32 to vector<8x32xf32>
    %695 = arith.addf %694, %693 : vector<8x32xf32>
    %696 = arith.divf %694, %695 : vector<8x32xf32>
    %697 = arith.mulf %682, %618 : vector<8x32xf32>
    %698 = arith.mulf %673, %687 : vector<8x32xf32>
    %699 = arith.addf %697, %698 : vector<8x32xf32>
    %700 = math.tanh %699 : vector<8x32xf32>
    %701 = arith.mulf %696, %700 : vector<8x32xf32>
    %c8_i32 = arith.constant 8 : i32
    %702 = arith.truncf %701 : vector<8x32xf32> to vector<8x32xbf16>
    %cst_267 = arith.constant dense<0.000000e+00> : vector<8x128xf32>
    %703 = tpu.matmul %702, %48, %cst_267 {dimension_numbers = #tpu.dot_dimension_numbers<[1], [0], [0], [1], [0, 0, 1, 1], [], []>} : vector<8x32xbf16>, vector<32x128xbf16>, vector<8x128xf32> -> vector<8x128xf32>
    %704 = arith.addf %703, %49 : vector<8x128xf32>
    %c0_268 = arith.constant 0 : index
    %c0_269 = arith.constant 0 : index
    %705 = vector.load %arg9[%c0_268, %c0_269] : memref<8x128xf32, #tpu.memory_space<vmem>>, vector<8x128xf32>
    tpu.vector_store %arg9[%c0_268, %c0_269], %704 {strides = array<i32>} : memref<8x128xf32, #tpu.memory_space<vmem>>, vector<8x128xf32>,
    return
  }
}

</mosaic_0001>

<bundles_post_ra>
// kernel: prediction_model_forward.1
= control target key start
LH: loop header
LB: loop body
LE: loop exit
PB: predicated region body
PF: predicated region fallthrough
CT: control target
= control target key end

     0   :  { %vm178_vm0 = vcmask 1043456   ;;  %v7933_v0 = vmov 0.0   ;;  %vm7934_vm1 = vmmov 0   ;;  %vm174_vm2 = vcmask 64512   ;;  %s9483_s1 = inlined_call_operand.vmem [shape: bf16[4,8,32], index: 1, kind: input, shape index: {}]   ;;  %s9484_s2 = inlined_call_operand.vmem [shape: bf16[4,32,32], index: 2, kind: input, shape index: {}]   ;;  %s9485_s0 = inlined_call_operand.vmem [shape: f32[8,8,8], index: 0, kind: input, shape index: {}]   ;;  %s9486_s5 = inlined_call_operand.vmem [shape: bf16[4,32,32], index: 5, kind: input, shape index: {}]   ;;  %s9487_s4 = inlined_call_operand.vmem [shape: bf16[4,32,32], index: 4, kind: input, shape index: {}]   ;;  %s9488_s3 = inlined_call_operand.vmem [shape: f32[4,8,32], index: 3, kind: input, shape index: {}]   ;;  %s9489_s6 = inlined_call_operand.vmem [shape: f32[4,8,32], index: 6, kind: input, shape index: {}]   ;;  %s9490_s7 = inlined_call_operand.vmem [shape: bf16[32,128], index: 7, kind: input, shape index: {}]   ;;  %s9491_s8 = inlined_call_operand.vmem [shape: f32[8,128], index: 8, kind: input, shape index: {}]   ;;  %s9492_s9 = inlined_call_operand.vmem [shape: f32[8,128], index: 9, kind: output, shape index: {}]  }
   0x1   :  { %6624 = vmatprep.subr.bf16.mxu1 %v7933_v0  ;;  %6616 = vmatprep.subr.bf16.mxu0 %v7933_v0  ;;  %v33_v1 = vld [vmem:[%s9483_s1] sm:$0xf]  ;;  %v7997_v3 = vld [vmem:[%s9484_s2 + $0x8] sm:$0xff]   ;;  %v8010_v6 = vld [vmem:[%s9484_s2 + $0x18] sm:$0xff]   ;;  %v7935_v11 = vmov 0   ;;  %vm130_vm3 = vcmask 261120  }
   0x2   :  { %v7992_v2 = vsel %vm178_vm0, %v33_v1, 0  ;;  %6626 = vmatprep.mubr.msk.bf16.mxu1 %vm7934_vm1, %v7933_v0  ;;  %v116_v4 = vld [vmem:[%s9485_s0] sm:$0xff]  ;;  %6620 = vmatprep.mubr.msk.bf16.mxu0 %vm7934_vm1, %v7933_v0  ;;  %v8028_v9 = vld [vmem:[%s9484_s2 + $0x10] sm:$0xff]   ;;  %v8043_v12 = vld [vmem:[%s9484_s2 + $0x28] sm:$0xff]  }
   0x3   :  { %6625 = vmatpush3.bf16.msra.mxu1 %v7992_v2  ;;  %v117_v5 = vpack.c.bf16 %v116_v4, %v116_v4  ;;  %6617 = vmatpush3.bf16.msra.mxu0 %v7997_v3  ;;  %v8017_v7 = vld [vmem:[%s9484_s2] sm:$0xff]   ;;  %v6015_v13 = vld [vmem:[%s9483_s1 + $0x8] sm:$0xf]  ;;  %v8071_v16 = vld [vmem:[%s9484_s2 + $0x38] sm:$0xff]  }
   0x4   :  { %6630 = vmatprep.subr.bf16.mxu1 %v7933_v0  ;;  %6618 = vmatprep.subr.bf16.mxu0 %v7933_v0  ;;  %v6014_v8 = vld [vmem:[%s9483_s1 + $0x4] sm:$0xf]  ;;  %v8064_v15 = vsel %vm178_vm0, %v6015_v13, 0  ;;  %v6016_v17 = vld [vmem:[%s9483_s1 + $0xc] sm:$0xf]  ;;  %v8086_v18 = vld [vmem:[%s9484_s2 + $0x30] sm:$0xff]  }
   0x5   :  { %v8036_v10 = vsel %vm178_vm0, %v6014_v8, 0  ;;  %v8058_v14 = vld [vmem:[%s9484_s2 + $0x20] sm:$0xff]   ;;  %v8092_v19 = vsel %vm178_vm0, %v6016_v17, 0  ;;  %v8110_v20 = vld [vmem:[%s9486_s5 + $0x8] sm:$0xff]   ;;  %v8124_v22 = vld [vmem:[%s9486_s5 + $0x18] sm:$0xff]  }
   0x6   :  { %6627 = vmatmul.mubr.msk.bf16.vlgmr.msra.gmra.mxu1 %vm174_vm2, %v117_v5  ;;  %v8117_v21 = vld [vmem:[%s9486_s5] sm:$0xff]   ;;  %v8134_v23 = vld [vmem:[%s9486_s5 + $0x10] sm:$0xff]   ;;  %v8141_v24 = vld [vmem:[%s9486_s5 + $0x28] sm:$0xff]  }
   0x7   :  { %6631 = vmatpush3.bf16.msra.mxu1 %v8010_v6  ;;  %6634 = vmatprep.mubr.msk.bf16.mxu1 %vm7934_vm1, %v7933_v0  ;;  %v8151_v25 = vld [vmem:[%s9486_s5 + $0x20] sm:$0xff]   ;;  %v8158_v26 = vld [vmem:[%s9486_s5 + $0x38] sm:$0xff]   ;;  %v8168_v27 = vld [vmem:[%s9486_s5 + $0x30] sm:$0xff]  }
   0x8   :  { %6619 = vmatpush3.bf16.msra.mxu0 %v8017_v7  ;;  %6632 = vmatprep.subr.bf16.mxu1 %v7933_v0  ;;  %v8175_v28 = vld [vmem:[%s9487_s4 + $0x8] sm:$0xff]   ;;  %v8185_v29 = vld [vmem:[%s9487_s4] sm:$0xff]   ;;  %v8208_v63 = vld [vmem:[%s9488_s3 + $0x10] sm:$0xff] }
   0x9   :  { %6638 = vmatprep.subr.bf16.mxu0 %v7933_v0  ;;  %v8196_v33 = vld [vmem:[%s9488_s3] sm:$0xff]  ;;  %v8202_v45 = vld [vmem:[%s9488_s3 + $0x8] sm:$0xff]  ;;  %v8214_v13 = vld [vmem:[%s9488_s3 + $0x18] sm:$0xff] }
   0xb   :  { %6621 = vmatmul.mubr.bf16.vlgmr.msra.gmra.mxu0 %v7935_v11  ;;  %6633 = vmatpush3.bf16.msra.mxu1 %v8028_v9 }
   0xc   :  { %6639 = vmatpush3.bf16.msra.mxu0 %v8036_v10  ;;  %6644 = vmatprep.subr.bf16.mxu1 %v7933_v0 }
   0xd   :  { %6640 = vmatprep.mubr.msk.bf16.mxu0 %vm7934_vm1, %v7933_v0  ;;  %6652 = vmatprep.subr.bf16.mxu0 %v7933_v0 }
   0xe   :  { %6635 = vmatmul.mubr.bf16.vlgmr.msra.gmra.mxu1 %v7935_v11 }
   0xf   :  { %6645 = vmatpush3.bf16.msra.mxu1 %v8043_v12  ;;  %6648 = vmatprep.mubr.msk.bf16.mxu1 %vm7934_vm1, %v7933_v0 }
  0x10   :  { %6646 = vmatprep.subr.bf16.mxu1 %v7933_v0 }
  0x13   :  { %6641 = vmatmul.mubr.msk.bf16.vlgmr.msra.gmra.mxu0 %vm174_vm2, %v117_v5  ;;  %6647 = vmatpush3.bf16.msra.mxu1 %v8058_v14 }
  0x14   :  { %6653 = vmatpush3.bf16.msra.mxu0 %v8064_v15  ;;  %6658 = vmatprep.subr.bf16.mxu1 %v7933_v0 }
  0x15   :  { %6654 = vmatprep.mubr.msk.bf16.mxu0 %vm7934_vm1, %v7933_v0  ;;  %6666 = vmatprep.subr.bf16.mxu0 %v7933_v0 }
  0x16   :  { %6649 = vmatmul.mubr.bf16.vlgmr.msra.gmra.mxu1 %v7935_v11 }
  0x17   :  { %6659 = vmatpush3.bf16.msra.mxu1 %v8071_v16  ;;  %6662 = vmatprep.mubr.msk.bf16.mxu1 %vm7934_vm1, %v7933_v0 }
  0x18   :  { %6660 = vmatprep.subr.bf16.mxu1 %v7933_v0 }
  0x1b   :  { %6655 = vmatmul.mubr.msk.bf16.vlgmr.msra.gmra.mxu0 %vm174_vm2, %v117_v5  ;;  %6661 = vmatpush3.bf16.msra.mxu1 %v8086_v18 }
  0x1c   :  { %6667 = vmatpush3.bf16.msra.mxu0 %v8092_v19  ;;  %6668 = vmatprep.mubr.msk.bf16.mxu0 %vm7934_vm1, %v7933_v0 }
  0x1d   :  { %6672 = vmatprep.subr.bf16.mxu1 %v7933_v0  ;;  %6680 = vmatprep.subr.bf16.mxu0 %v7933_v0 }
  0x1e   :  { %6663 = vmatmul.mubr.bf16.vlgmr.msra.gmra.mxu1 %v7935_v11 }
  0x1f   :  { %6676 = vmatprep.mubr.msk.bf16.mxu1 %vm7934_vm1, %v7933_v0  ;;  %6673 = vmatpush3.bf16.msra.mxu1 %v8110_v20 }
  0x20   :  { %6674 = vmatprep.subr.bf16.mxu1 %v7933_v0 }
  0x23   :  { %6669 = vmatmul.mubr.msk.bf16.vlgmr.msra.gmra.mxu0 %vm174_vm2, %v117_v5  ;;  %6675 = vmatpush3.bf16.msra.mxu1 %v8117_v21 }
  0x24   :  { %6684 = vmatprep.mubr.msk.bf16.mxu0 %vm7934_vm1, %v7933_v0  ;;  %6688 = vmatprep.subr.bf16.mxu1 %v7933_v0 }
  0x25   :  { %6681 = vmatpush3.bf16.msra.mxu0 %v8175_v28 }
  0x26   :  { %6677 = vmatmul.mubr.bf16.vlgmr.msra.gmra.mxu1 %v7935_v11  ;;  %6682 = vmatprep.subr.bf16.mxu0 %v7933_v0 }
  0x27   :  { %6689 = vmatpush3.bf16.msra.mxu1 %v8124_v22  ;;  %6692 = vmatprep.mubr.msk.bf16.mxu1 %vm7934_vm1, %v7933_v0 }
  0x28   :  { %6690 = vmatprep.subr.bf16.mxu1 %v7933_v0 }
  0x29   :  { %6683 = vmatpush3.bf16.msra.mxu0 %v8185_v29 }
  0x2a   :  { %6696 = vmatprep.subr.bf16.mxu0 %v7933_v0 }
  0x2b   :  { %6691 = vmatpush3.bf16.msra.mxu1 %v8134_v23 }
  0x2c   :  { %6704 = vmatprep.subr.bf16.mxu1 %v7933_v0 }
  0x2e   :  { %6693 = vmatmul.mubr.bf16.vlgmr.msra.gmra.mxu1 %v7935_v11 }
  0x2f   :  { %6705 = vmatpush3.bf16.msra.mxu1 %v8141_v24  ;;  %6708 = vmatprep.mubr.msk.bf16.mxu1 %vm7934_vm1, %v7933_v0 }
  0x30   :  { %6706 = vmatprep.subr.bf16.mxu1 %v7933_v0 }
  0x33   :  { %6707 = vmatpush3.bf16.msra.mxu1 %v8151_v25 }
  0x34   :  { %6720 = vmatprep.subr.bf16.mxu1 %v7933_v0 }
  0x36   :  { %6709 = vmatmul.mubr.bf16.vlgmr.msra.gmra.mxu1 %v7935_v11 }
  0x37   :  { %6721 = vmatpush3.bf16.msra.mxu1 %v8158_v26  ;;  %6724 = vmatprep.mubr.msk.bf16.mxu1 %vm7934_vm1, %v7933_v0 }
  0x38   :  { %6722 = vmatprep.subr.bf16.mxu1 %v7933_v0 }
  0x3b   :  { %6723 = vmatpush3.bf16.msra.mxu1 %v8168_v27 }
  0x3c   :  { %6736 = vmatprep.subr.bf16.mxu1 %v7933_v0 }
  0x3e   :  { %6725 = vmatmul.mubr.bf16.vlgmr.msra.gmra.mxu1 %v7935_v11 }
  0x3f   :  { %6737 = vmatpush3.bf16.msra.mxu1 %v7997_v3  ;;  %6740 = vmatprep.mubr.msk.bf16.mxu1 %vm7934_vm1, %v7933_v0 }
  0x40   :  { %6738 = vmatprep.subr.bf16.mxu1 %v7933_v0 }
  0x43   :  { %6739 = vmatpush3.bf16.msra.mxu1 %v8017_v7 }
  0x44   :  { %6750 = vmatprep.subr.bf16.mxu1 %v7933_v0 }
  0xc6   :  { %v216_v30 = vpop.f32.mrf.mxu1 }
  0xc8   :  { %v6628_v31 = vpop.f32.mrf.mxu1 }
  0xca   :  { %v219_v32 = vpop.f32.mrf.mxu1 }
  0xcb   :  { %v168_v34 = vpop.f32.mrf.mxu0 }
  0xcc   :  { %v217_v35 = vadd.f32 %v216_v30, %v168_v34  ;;  %v6629_v36 = vpop.f32.mrf.mxu1 }
  0xcd   :  { %v6622_v37 = vpop.f32.mrf.mxu0 }
  0xce   :  { %v222_v38 = vadd.f32 %v217_v35, %v8196_v33  ;;  %v275_v39 = vpop.f32.mrf.mxu1 }
  0xcf   :  { %v171_v40 = vpop.f32.mrf.mxu0 }
  0xd0   :  { %v6062_v41 = vmul.f32 -1.442695, %v222_v38  ;;  %v6636_v42 = vpop.f32.mrf.mxu1 }
  0xd1   :  { %v6623_v43 = vpop.f32.mrf.mxu0 }
  0xd2   :  { %v278_v44 = vpop.f32.mrf.mxu1  ;;  %7613 = vpow2.f32 %v6062_v41 }
  0xd3   :  { %v318_v46 = vpop.f32.mrf.mxu0 }
  0xd4   :  { %v319_v47 = vadd.f32 %v318_v46, %v275_v39  ;;  %v6637_v48 = vpop.f32.mrf.mxu1 }
  0xd5   :  { %v6642_v49 = vpop.f32.mrf.mxu0 }
  0xd6   :  { %v324_v50 = vadd.f32 %v8202_v45, %v319_v47  ;;  %v377_v51 = vpop.f32.mrf.mxu1 }
  0xd7   :  { %v321_v52 = vpop.f32.mrf.mxu0 }
  0xd8   :  { %v6066_v53 = vmul.f32 -1.442695, %v324_v50  ;;  %v6650_v54 = vpop.f32.mrf.mxu1 }
  0xd9   :  { %v6643_v55 = vpop.f32.mrf.mxu0 }
  0xda   :  { %7615 = vpow2.f32 %v6066_v53  ;;  %v380_v56 = vpop.f32.mrf.mxu1  ;;  %v8223_v53 = vld [vmem:[%s9487_s4 + $0x18] sm:$0xff]   ;;  %v8232_v55 = vld [vmem:[%s9487_s4 + $0x10] sm:$0xff]  }
  0xdb   :  { %v420_v57 = vpop.f32.mrf.mxu0  ;;  %v8245_v56 = vld [vmem:[%s9487_s4 + $0x28] sm:$0xff]  }
  0xdc   :  { %v6651_v58 = vpop.f32.mrf.mxu1  ;;  %v421_v61 = vadd.f32 %v420_v57, %v377_v51  ;;  %v8256_v57 = vld [vmem:[%s9487_s4 + $0x20] sm:$0xff]  }
  0xdd   :  { %v6656_v59 = vpop.f32.mrf.mxu0  ;;  %v8269_v58 = vld [vmem:[%s9487_s4 + $0x38] sm:$0xff]  }
  0xde   :  { %v474_v60 = vpop.f32.mrf.mxu1  ;;  %v426_v11 = vadd.f32 %v8208_v63, %v421_v61  ;;  %v8280_v59 = vld [vmem:[%s9487_s4 + $0x30] sm:$0xff]  }
  0xdf   :  { %v423_v62 = vpop.f32.mrf.mxu0  ;;  %v7614_v4 = vpop.eup %7613 }
  0xe0   :  { %v6664_v1 = vpop.f32.mrf.mxu1  ;;  %v226_v30 = vadd.f32 1.0, %v7614_v4  ;;  %7617 = vtanh.f32 %v426_v11 }
  0xe1   :  { %v6657_v5 = vpop.f32.mrf.mxu0 }
  0xe2   :  { %v477_v8 = vpop.f32.mrf.mxu1  ;;  %7619 = vrcp.f32 %v226_v30 }
  0xe3   :  { %v517_v17 = vpop.f32.mrf.mxu0 }
  0xe4   :  { %v518_v31 = vadd.f32 %v517_v17, %v474_v60  ;;  %v6665_v32 = vpop.f32.mrf.mxu1  ;;  %v6097_v60 = vld [vmem:[%s9485_s0 + $0x8] sm:$0xff] }
  0xe5   :  { %v6670_v34 = vpop.f32.mrf.mxu0  ;;  %v985_v61 = vpack.c.bf16 %v6097_v60, %v6097_v60  ;;  %v8338_v60 = vld [vmem:[%s9489_s6 + $0x8] sm:$0xff] }
  0xe6   :  { %v523_v35 = vadd.f32 %v8214_v13, %v518_v31  ;;  %v582_v62 = vpop.f32.mrf.mxu1 }
  0xe7   :  { %v7616_v36 = vpop.eup %7615  ;;  %v520_v37 = vpop.f32.mrf.mxu0 }
  0xe8   :  { %v328_v38 = vadd.f32 1.0, %v7616_v36  ;;  %v6073_v39 = vmul.f32 -1.442695, %v523_v35  ;;  %v6678_v1 = vpop.f32.mrf.mxu1 }
  0xe9   :  { %v6671_v40 = vpop.f32.mrf.mxu0 }
  0xea   :  { %7621 = vrcp.f32 %v328_v38  ;;  %v585_v4 = vpop.f32.mrf.mxu1  ;;  %v8332_v40 = vld [vmem:[%s9489_s6] sm:$0xff] }
  0xeb   :  { %7623 = vpow2.f32 %v6073_v39 }
  0xec   :  { %v6679_v5 = vpop.f32.mrf.mxu1 }
  0xed   :  { %v7618_v41 = vpop.eup %7617 }
  0xee   :  { %v696_v8 = vpop.f32.mrf.mxu1 }
  0xef   :  { %v7620_v42 = vpop.eup %7619 }
  0xf0   :  { %v531_v47 = vmul.f32 %v7620_v42, %v7618_v41  ;;  %v6694_v11 = vpop.f32.mrf.mxu1 }
  0xf2   :  { %v699_v17 = vpop.f32.mrf.mxu1 }
  0xf4   :  { %v6695_v30 = vpop.f32.mrf.mxu1 }
  0xf6   :  { %v807_v31 = vpop.f32.mrf.mxu1 }
  0xf7   :  { %v7622_v43 = vpop.eup %7621 }
  0xf8   :  { %v7624_v44 = vpop.eup %7623  ;;  %v530_v46 = vmul.f32 0.0, %v7622_v43  ;;  %v6710_v32 = vpop.f32.mrf.mxu1 }
  0xf9   :  { %v527_v48 = vadd.f32 1.0, %v7624_v44 }
  0xfa   :  { %v8217_v49 = vadd.f32 %v531_v47, %v530_v46  ;;  %v810_v34 = vpop.f32.mrf.mxu1 }
  0xfb   :  { %7625 = vrcp.f32 %v527_v48 }
  0xfc   :  { %7627 = vtanh.f32 %v8217_v49  ;;  %v6711_v35 = vpop.f32.mrf.mxu1 }
  0xfe   :  { %v913_v36 = vpop.f32.mrf.mxu1 }
 0x100   :  { %v6726_v37 = vpop.f32.mrf.mxu1 }
 0x102   :  { %v916_v38 = vpop.f32.mrf.mxu1 }
 0x104   :  { %v6727_v39 = vpop.f32.mrf.mxu1 }
 0x108   :  { %v7626_v50 = vpop.eup %7625 }
 0x109   :  { %v7628_v51 = vpop.eup %7627 }
 0x10a   :  { %v534_v52 = vmul.f32 %v7628_v51, %v7626_v50 }
 0x10c   :  { %v535_v54 = vpack.c.bf16 %v534_v52, %v534_v52 }
 0x10e   :  { %6685 = vmatmul.mubr.msk.bf16.vlgmr.msra.gmra.mxu0 %vm130_vm3, %v535_v54  ;;  %6741 = vmatmul.mubr.msk.bf16.vlgmr.msra.gmra.mxu1 %vm130_vm3, %v535_v54 }
 0x10f   :  { %6697 = vmatpush3.bf16.msra.mxu0 %v8223_v53  ;;  %6751 = vmatpush3.bf16.msra.mxu1 %v8010_v6 }
 0x110   :  { %6698 = vmatprep.subr.bf16.mxu0 %v7933_v0  ;;  %6752 = vmatprep.subr.bf16.mxu1 %v7933_v0 }
 0x111   :  { %6700 = vmatprep.mubr.msk.bf16.mxu0 %vm7934_vm1, %v7933_v0  ;;  %6754 = vmatprep.mubr.msk.bf16.mxu1 %vm7934_vm1, %v7933_v0 }
 0x113   :  { %6699 = vmatpush3.bf16.msra.mxu0 %v8232_v55  ;;  %6753 = vmatpush3.bf16.msra.mxu1 %v8028_v9 }
 0x114   :  { %6712 = vmatprep.subr.bf16.mxu0 %v7933_v0  ;;  %6764 = vmatprep.subr.bf16.mxu1 %v7933_v0 }
 0x116   :  { %6701 = vmatmul.mubr.msk.bf16.vlgmr.msra.gmra.mxu0 %vm130_vm3, %v535_v54  ;;  %6755 = vmatmul.mubr.msk.bf16.vlgmr.msra.gmra.mxu1 %vm130_vm3, %v535_v54 }
 0x117   :  { %6713 = vmatpush3.bf16.msra.mxu0 %v8245_v56  ;;  %6765 = vmatpush3.bf16.msra.mxu1 %v8043_v12 }
 0x118   :  { %6714 = vmatprep.subr.bf16.mxu0 %v7933_v0  ;;  %6766 = vmatprep.subr.bf16.mxu1 %v7933_v0 }
 0x119   :  { %6716 = vmatprep.mubr.msk.bf16.mxu0 %vm7934_vm1, %v7933_v0  ;;  %6768 = vmatprep.mubr.msk.bf16.mxu1 %vm7934_vm1, %v7933_v0 }
 0x11b   :  { %6715 = vmatpush3.bf16.msra.mxu0 %v8256_v57  ;;  %6767 = vmatpush3.bf16.msra.mxu1 %v8058_v14 }
 0x11c   :  { %6728 = vmatprep.subr.bf16.mxu0 %v7933_v0  ;;  %6778 = vmatprep.subr.bf16.mxu1 %v7933_v0 }
 0x11e   :  { %6717 = vmatmul.mubr.msk.bf16.vlgmr.msra.gmra.mxu0 %vm130_vm3, %v535_v54  ;;  %6769 = vmatmul.mubr.msk.bf16.vlgmr.msra.gmra.mxu1 %vm130_vm3, %v535_v54 }
 0x11f   :  { %6729 = vmatpush3.bf16.msra.mxu0 %v8269_v58  ;;  %6779 = vmatpush3.bf16.msra.mxu1 %v8071_v16 }
 0x120   :  { %6730 = vmatprep.subr.bf16.mxu0 %v7933_v0  ;;  %6780 = vmatprep.subr.bf16.mxu1 %v7933_v0 }
 0x121   :  { %6732 = vmatprep.mubr.msk.bf16.mxu0 %vm7934_vm1, %v7933_v0  ;;  %6782 = vmatprep.mubr.msk.bf16.mxu1 %vm7934_vm1, %v7933_v0 }
 0x123   :  { %6731 = vmatpush3.bf16.msra.mxu0 %v8280_v59  ;;  %6781 = vmatpush3.bf16.msra.mxu1 %v8086_v18 }
 0x124   :  { %6744 = vmatprep.subr.bf16.mxu0 %v7933_v0  ;;  %6792 = vmatprep.subr.bf16.mxu1 %v7933_v0 }
 0x126   :  { %6733 = vmatmul.mubr.msk.bf16.vlgmr.msra.gmra.mxu0 %vm130_vm3, %v535_v54  ;;  %6783 = vmatmul.mubr.msk.bf16.vlgmr.msra.gmra.mxu1 %vm130_vm3, %v535_v54 }
 0x127   :  { %6745 = vmatpush3.bf16.msra.mxu0 %v7992_v2  ;;  %6746 = vmatprep.mubr.msk.bf16.mxu0 %vm7934_vm1, %v7933_v0 }
 0x128   :  { %6758 = vmatprep.subr.bf16.mxu0 %v7933_v0  ;;  %6793 = vmatpush3.bf16.msra.mxu1 %v8110_v20 }
 0x129   :  { %6794 = vmatprep.subr.bf16.mxu1 %v7933_v0  ;;  %6796 = vmatprep.mubr.msk.bf16.mxu1 %vm7934_vm1, %v7933_v0 }
 0x12c   :  { %6795 = vmatpush3.bf16.msra.mxu1 %v8117_v21 }
 0x12d   :  { %6808 = vmatprep.subr.bf16.mxu1 %v7933_v0 }
 0x12e   :  { %6747 = vmatmul.mubr.msk.bf16.vlgmr.msra.gmra.mxu0 %vm174_vm2, %v985_v61 }
 0x12f   :  { %6759 = vmatpush3.bf16.msra.mxu0 %v8036_v10  ;;  %6760 = vmatprep.mubr.msk.bf16.mxu0 %vm7934_vm1, %v7933_v0 }
 0x130   :  { %6772 = vmatprep.subr.bf16.mxu0 %v7933_v0 }
 0x136   :  { %6761 = vmatmul.mubr.msk.bf16.vlgmr.msra.gmra.mxu0 %vm174_vm2, %v985_v61 }
 0x137   :  { %6773 = vmatpush3.bf16.msra.mxu0 %v8064_v15  ;;  %6774 = vmatprep.mubr.msk.bf16.mxu0 %vm7934_vm1, %v7933_v0 }
 0x138   :  { %6786 = vmatprep.subr.bf16.mxu0 %v7933_v0 }
 0x13e   :  { %6775 = vmatmul.mubr.msk.bf16.vlgmr.msra.gmra.mxu0 %vm174_vm2, %v985_v61 }
 0x13f   :  { %6787 = vmatpush3.bf16.msra.mxu0 %v8092_v19  ;;  %6788 = vmatprep.mubr.msk.bf16.mxu0 %vm7934_vm1, %v7933_v0 }
 0x140   :  { %6800 = vmatprep.subr.bf16.mxu0 %v7933_v0 }
 0x146   :  { %6789 = vmatmul.mubr.msk.bf16.vlgmr.msra.gmra.mxu0 %vm174_vm2, %v985_v61 }
 0x147   :  { %6801 = vmatpush3.bf16.msra.mxu0 %v8175_v28  ;;  %6804 = vmatprep.mubr.msk.bf16.mxu0 %vm7934_vm1, %v7933_v0 }
 0x148   :  { %6802 = vmatprep.subr.bf16.mxu0 %v7933_v0 }
 0x14b   :  { %6803 = vmatpush3.bf16.msra.mxu0 %v8185_v29 }
 0x14c   :  { %6816 = vmatprep.subr.bf16.mxu0 %v7933_v0 }
 0x1ce   :  { %v637_v41 = vpop.f32.mrf.mxu0  ;;  %v1020_v42 = vpop.f32.mrf.mxu1 }
 0x1cf   :  { %v638_v43 = vadd.f32 %v637_v41, %v582_v62 }
 0x1d0   :  { %v6686_v44 = vpop.f32.mrf.mxu0  ;;  %v6742_v46 = vpop.f32.mrf.mxu1 }
 0x1d1   :  { %v643_v47 = vadd.f32 %v638_v43, %v8332_v40 }
 0x1d2   :  { %v640_v48 = vpop.f32.mrf.mxu0  ;;  %v1023_v50 = vpop.f32.mrf.mxu1 }
 0x1d3   :  { %v6079_v51 = vmul.f32 -1.442695, %v643_v47  ;;  %v8344_v50 = vld [vmem:[%s9489_s6 + $0x10] sm:$0xff] }
 0x1d4   :  { %v6687_v52 = vpop.f32.mrf.mxu0  ;;  %v6743_v54 = vpop.f32.mrf.mxu1 }
 0x1d5   :  { %7629 = vpow2.f32 %v6079_v51  ;;  %v8349_v51 = vld [vmem:[%s9489_s6 + $0x18] sm:$0xff] }
 0x1d6   :  { %v748_v61 = vpop.f32.mrf.mxu0  ;;  %v1110_v1 = vpop.f32.mrf.mxu1 }
 0x1d7   :  { %v749_v4 = vadd.f32 %v748_v61, %v696_v8 }
 0x1d8   :  { %v6702_v5 = vpop.f32.mrf.mxu0  ;;  %v6756_v62 = vpop.f32.mrf.mxu1 }
 0x1d9   :  { %v754_v11 = vadd.f32 %v8338_v60, %v749_v4 }
 0x1da   :  { %v751_v17 = vpop.f32.mrf.mxu0  ;;  %v1113_v30 = vpop.f32.mrf.mxu1 }
 0x1db   :  { %v6085_v32 = vmul.f32 -1.442695, %v754_v11 }
 0x1dc   :  { %v6703_v34 = vpop.f32.mrf.mxu0  ;;  %v6757_v35 = vpop.f32.mrf.mxu1 }
 0x1dd   :  { %7631 = vpow2.f32 %v6085_v32 }
 0x1de   :  { %v859_v37 = vpop.f32.mrf.mxu0  ;;  %v1197_v38 = vpop.f32.mrf.mxu1 }
 0x1df   :  { %v860_v47 = vadd.f32 %v859_v37, %v807_v31 }
 0x1e0   :  { %v6718_v39 = vpop.f32.mrf.mxu0  ;;  %v6770_v41 = vpop.f32.mrf.mxu1 }
 0x1e1   :  { %v865_v5 = vadd.f32 %v8344_v50, %v860_v47 }
 0x1e2   :  { %v862_v43 = vpop.f32.mrf.mxu0  ;;  %v1200_v44 = vpop.f32.mrf.mxu1 }
 0x1e3   :  { %v7630_v46 = vpop.eup %7629 }
 0x1e4   :  { %v6719_v48 = vpop.f32.mrf.mxu0  ;;  %v6771_v8 = vpop.f32.mrf.mxu1  ;;  %v647_v61 = vadd.f32 1.0, %v7630_v46 }
 0x1e6   :  { %v965_v52 = vpop.f32.mrf.mxu0  ;;  %v1279_v54 = vpop.f32.mrf.mxu1  ;;  %7633 = vrcp.f32 %v647_v61 }
 0x1e7   :  { %v966_v4 = vadd.f32 %v965_v52, %v913_v36  ;;  %7635 = vtanh.f32 %v865_v5 }
 0x1e8   :  { %v6734_v62 = vpop.f32.mrf.mxu0  ;;  %v6784_v31 = vpop.f32.mrf.mxu1 }
 0x1e9   :  { %v971_v11 = vadd.f32 %v8349_v51, %v966_v4 }
 0x1ea   :  { %v7632_v17 = vpop.eup %7631  ;;  %v968_v30 = vpop.f32.mrf.mxu0 }
 0x1eb   :  { %v1282_v32 = vpop.f32.mrf.mxu1  ;;  %v758_v34 = vadd.f32 1.0, %v7632_v17  ;;  %v6096_v35 = vmul.f32 -1.442695, %v971_v11 }
 0x1ec   :  { %v6735_v37 = vpop.f32.mrf.mxu0 }
 0x1ed   :  { %v6785_v39 = vpop.f32.mrf.mxu1  ;;  %7637 = vrcp.f32 %v758_v34 }
 0x1ee   :  { %7639 = vpow2.f32 %v6096_v35  ;;  %v1063_v41 = vpop.f32.mrf.mxu0 }
 0x1ef   :  { %v1064_v43 = vadd.f32 %v1063_v41, %v1020_v42 }
 0x1f0   :  { %v6748_v36 = vpop.f32.mrf.mxu0 }
 0x1f1   :  { %v1069_v44 = vadd.f32 %v1064_v43, %v8196_v33 }
 0x1f2   :  { %v1066_v46 = vpop.f32.mrf.mxu0 }
 0x1f3   :  { %v6100_v47 = vmul.f32 -1.442695, %v1069_v44  ;;  %v7634_v4 = vpop.eup %7633 }
 0x1f4   :  { %v6749_v48 = vpop.f32.mrf.mxu0  ;;  %v7636_v62 = vpop.eup %7635 }
 0x1f5   :  { %7641 = vpow2.f32 %v6100_v47  ;;  %v979_v32 = vmul.f32 %v7636_v62, %v7634_v4 }
 0x1f6   :  { %v1150_v8 = vpop.f32.mrf.mxu0 }
 0x1f7   :  { %v1151_v52 = vadd.f32 %v1150_v8, %v1110_v1 }
 0x1f8   :  { %v6762_v61 = vpop.f32.mrf.mxu0 }
 0x1f9   :  { %v1156_v5 = vadd.f32 %v8202_v45, %v1151_v52 }
 0x1fa   :  { %v7638_v31 = vpop.eup %7637  ;;  %v1153_v11 = vpop.f32.mrf.mxu0 }
 0x1fb   :  { %v7640_v17 = vpop.eup %7639  ;;  %v978_v30 = vmul.f32 0.0, %v7638_v31  ;;  %v6103_v42 = vmul.f32 -1.442695, %v1156_v5 }
 0x1fc   :  { %v975_v34 = vadd.f32 1.0, %v7640_v17  ;;  %v6763_v35 = vpop.f32.mrf.mxu0 }
 0x1fd   :  { %v8355_v37 = vadd.f32 %v979_v32, %v978_v30  ;;  %7643 = vpow2.f32 %v6103_v42 }
 0x1fe   :  { %7645 = vrcp.f32 %v975_v34  ;;  %v1237_v39 = vpop.f32.mrf.mxu0 }
 0x1ff   :  { %7647 = vtanh.f32 %v8355_v37  ;;  %v1238_v36 = vadd.f32 %v1237_v39, %v1197_v38 }
 0x200   :  { %v6776_v1 = vpop.f32.mrf.mxu0 }
 0x201   :  { %v1243_v8 = vadd.f32 %v8208_v63, %v1238_v36 }
 0x202   :  { %v1240_v41 = vpop.f32.mrf.mxu0  ;;  %v7642_v43 = vpop.eup %7641 }
 0x203   :  { %v1073_v47 = vadd.f32 1.0, %v7642_v43 }
 0x204   :  { %v6777_v44 = vpop.f32.mrf.mxu0 }
 0x205   :  { %7649 = vrcp.f32 %v1073_v47 }
 0x206   :  { %v1319_v46 = vpop.f32.mrf.mxu0  ;;  %7651 = vtanh.f32 %v1243_v8 }
 0x207   :  { %v1320_v48 = vadd.f32 %v1319_v46, %v1279_v54 }
 0x208   :  { %v6790_v52 = vpop.f32.mrf.mxu0 }
 0x209   :  { %v1325_v4 = vadd.f32 %v8214_v13, %v1320_v48 }
 0x20a   :  { %v7644_v61 = vpop.eup %7643  ;;  %v1322_v62 = vpop.f32.mrf.mxu0 }
 0x20b   :  { %v7646_v5 = vpop.eup %7645  ;;  %v1160_v31 = vadd.f32 1.0, %v7644_v61  ;;  %v6108_v11 = vmul.f32 -1.442695, %v1325_v4 }
 0x20c   :  { %v7648_v17 = vpop.eup %7647  ;;  %v6791_v30 = vpop.f32.mrf.mxu0 }
 0x20d   :  { %7653 = vrcp.f32 %v1160_v31  ;;  %v982_v38 = vmul.f32 %v7648_v17, %v7646_v5 }
 0x20e   :  { %7655 = vpow2.f32 %v6108_v11 }
 0x20f   :  { %v1338_v32 = vpack.c.bf16 %v982_v38, %v982_v38 }
 0x211   :  { %6797 = vmatmul.mubr.msk.bf16.vlgmr.msra.gmra.mxu1 %vm130_vm3, %v1338_v32 }
 0x212   :  { %6809 = vmatpush3.bf16.msra.mxu1 %v8124_v22  ;;  %6812 = vmatprep.mubr.msk.bf16.mxu1 %vm7934_vm1, %v7933_v0  ;;  %v7650_v54 = vpop.eup %7649 }
 0x213   :  { %6810 = vmatprep.subr.bf16.mxu1 %v7933_v0  ;;  %v7652_v42 = vpop.eup %7651 }
 0x214   :  { %v1333_v39 = vmul.f32 %v7652_v42, %v7650_v54 }
 0x216   :  { %6811 = vmatpush3.bf16.msra.mxu1 %v8134_v23 }
 0x217   :  { %6824 = vmatprep.subr.bf16.mxu1 %v7933_v0 }
 0x219   :  { %6813 = vmatmul.mubr.msk.bf16.vlgmr.msra.gmra.mxu1 %vm130_vm3, %v1338_v32 }
 0x21a   :  { %v7654_v34 = vpop.eup %7653  ;;  %6825 = vmatpush3.bf16.msra.mxu1 %v8141_v24  ;;  %6828 = vmatprep.mubr.msk.bf16.mxu1 %vm7934_vm1, %v7933_v0 }
 0x21b   :  { %v7656_v22 = vpop.eup %7655  ;;  %v1332_v35 = vmul.f32 %v7654_v34, %v8217_v49  ;;  %6826 = vmatprep.subr.bf16.mxu1 %v7933_v0 }
 0x21c   :  { %v1329_v1 = vadd.f32 1.0, %v7656_v22 }
 0x21d   :  { %v8373_v23 = vadd.f32 %v1333_v39, %v1332_v35 }
 0x21e   :  { %7657 = vrcp.f32 %v1329_v1  ;;  %6827 = vmatpush3.bf16.msra.mxu1 %v8151_v25 }
 0x21f   :  { %7659 = vtanh.f32 %v8373_v23  ;;  %6840 = vmatprep.subr.bf16.mxu1 %v7933_v0 }
 0x221   :  { %6829 = vmatmul.mubr.msk.bf16.vlgmr.msra.gmra.mxu1 %vm130_vm3, %v1338_v32 }
 0x222   :  { %6841 = vmatpush3.bf16.msra.mxu1 %v8158_v26  ;;  %6844 = vmatprep.mubr.msk.bf16.mxu1 %vm7934_vm1, %v7933_v0 }
 0x223   :  { %6842 = vmatprep.subr.bf16.mxu1 %v7933_v0 }
 0x226   :  { %6843 = vmatpush3.bf16.msra.mxu1 %v8168_v27 }
 0x227   :  { %6856 = vmatprep.subr.bf16.mxu1 %v7933_v0 }
 0x229   :  { %6845 = vmatmul.mubr.msk.bf16.vlgmr.msra.gmra.mxu1 %vm130_vm3, %v1338_v32 }
 0x22a   :  { %6857 = vmatpush3.bf16.msra.mxu1 %v7997_v3  ;;  %6860 = vmatprep.mubr.msk.bf16.mxu1 %vm7934_vm1, %v7933_v0  ;;  %v6120_v3 = vld [vmem:[%s9485_s0 + $0x10] sm:$0xff] }
 0x22b   :  { %v7658_v24 = vpop.eup %7657  ;;  %6858 = vmatprep.subr.bf16.mxu1 %v7933_v0 }
 0x22c   :  { %v7660_v25 = vpop.eup %7659 }
 0x22d   :  { %v1336_v26 = vmul.f32 %v7660_v25, %v7658_v24 }
 0x22e   :  { %6859 = vmatpush3.bf16.msra.mxu1 %v8017_v7 }
 0x22f   :  { %v1337_v49 = vpack.c.bf16 %v1336_v26, %v1336_v26  ;;  %6870 = vmatprep.subr.bf16.mxu1 %v7933_v0 }
 0x231   :  { %6805 = vmatmul.mubr.msk.bf16.vlgmr.msra.gmra.mxu0 %vm130_vm3, %v1337_v49  ;;  %6861 = vmatmul.mubr.msk.bf16.vlgmr.msra.gmra.mxu1 %vm130_vm3, %v1337_v49 }
 0x232   :  { %6817 = vmatpush3.bf16.msra.mxu0 %v8223_v53  ;;  %6871 = vmatpush3.bf16.msra.mxu1 %v8010_v6  ;;  %v1695_v6 = vpack.c.bf16 %v6120_v3, %v6120_v3 }
 0x233   :  { %6818 = vmatprep.subr.bf16.mxu0 %v7933_v0  ;;  %6872 = vmatprep.subr.bf16.mxu1 %v7933_v0 }
 0x234   :  { %6820 = vmatprep.mubr.msk.bf16.mxu0 %vm7934_vm1, %v7933_v0  ;;  %6874 = vmatprep.mubr.msk.bf16.mxu1 %vm7934_vm1, %v7933_v0 }
 0x236   :  { %6819 = vmatpush3.bf16.msra.mxu0 %v8232_v55  ;;  %6873 = vmatpush3.bf16.msra.mxu1 %v8028_v9 }
 0x237   :  { %6832 = vmatprep.subr.bf16.mxu0 %v7933_v0  ;;  %6884 = vmatprep.subr.bf16.mxu1 %v7933_v0 }
 0x239   :  { %6821 = vmatmul.mubr.msk.bf16.vlgmr.msra.gmra.mxu0 %vm130_vm3, %v1337_v49  ;;  %6875 = vmatmul.mubr.msk.bf16.vlgmr.msra.gmra.mxu1 %vm130_vm3, %v1337_v49 }
 0x23a   :  { %6833 = vmatpush3.bf16.msra.mxu0 %v8245_v56  ;;  %6885 = vmatpush3.bf16.msra.mxu1 %v8043_v12 }
 0x23b   :  { %6834 = vmatprep.subr.bf16.mxu0 %v7933_v0  ;;  %6886 = vmatprep.subr.bf16.mxu1 %v7933_v0 }
 0x23c   :  { %6836 = vmatprep.mubr.msk.bf16.mxu0 %vm7934_vm1, %v7933_v0  ;;  %6888 = vmatprep.mubr.msk.bf16.mxu1 %vm7934_vm1, %v7933_v0 }
 0x23e   :  { %6835 = vmatpush3.bf16.msra.mxu0 %v8256_v57  ;;  %6887 = vmatpush3.bf16.msra.mxu1 %v8058_v14 }
 0x23f   :  { %6848 = vmatprep.subr.bf16.mxu0 %v7933_v0  ;;  %6898 = vmatprep.subr.bf16.mxu1 %v7933_v0 }
 0x241   :  { %6837 = vmatmul.mubr.msk.bf16.vlgmr.msra.gmra.mxu0 %vm130_vm3, %v1337_v49  ;;  %6889 = vmatmul.mubr.msk.bf16.vlgmr.msra.gmra.mxu1 %vm130_vm3, %v1337_v49 }
 0x242   :  { %6849 = vmatpush3.bf16.msra.mxu0 %v8269_v58  ;;  %6899 = vmatpush3.bf16.msra.mxu1 %v8071_v16 }
 0x243   :  { %6850 = vmatprep.subr.bf16.mxu0 %v7933_v0  ;;  %6900 = vmatprep.subr.bf16.mxu1 %v7933_v0 }
 0x244   :  { %6852 = vmatprep.mubr.msk.bf16.mxu0 %vm7934_vm1, %v7933_v0  ;;  %6902 = vmatprep.mubr.msk.bf16.mxu1 %vm7934_vm1, %v7933_v0 }
 0x246   :  { %6851 = vmatpush3.bf16.msra.mxu0 %v8280_v59  ;;  %6901 = vmatpush3.bf16.msra.mxu1 %v8086_v18 }
 0x247   :  { %6864 = vmatprep.subr.bf16.mxu0 %v7933_v0  ;;  %6912 = vmatprep.subr.bf16.mxu1 %v7933_v0 }
 0x249   :  { %6853 = vmatmul.mubr.msk.bf16.vlgmr.msra.gmra.mxu0 %vm130_vm3, %v1337_v49  ;;  %6903 = vmatmul.mubr.msk.bf16.vlgmr.msra.gmra.mxu1 %vm130_vm3, %v1337_v49 }
 0x24a   :  { %6865 = vmatpush3.bf16.msra.mxu0 %v7992_v2  ;;  %6866 = vmatprep.mubr.msk.bf16.mxu0 %vm7934_vm1, %v7933_v0 }
 0x24b   :  { %6878 = vmatprep.subr.bf16.mxu0 %v7933_v0  ;;  %6913 = vmatpush3.bf16.msra.mxu1 %v8110_v20 }
 0x24c   :  { %6914 = vmatprep.subr.bf16.mxu1 %v7933_v0  ;;  %6916 = vmatprep.mubr.msk.bf16.mxu1 %vm7934_vm1, %v7933_v0 }
 0x24f   :  { %6915 = vmatpush3.bf16.msra.mxu1 %v8117_v21 }
 0x250   :  { %6928 = vmatprep.subr.bf16.mxu1 %v7933_v0 }
 0x251   :  { %6867 = vmatmul.mubr.msk.bf16.vlgmr.msra.gmra.mxu0 %vm174_vm2, %v1695_v6 }
 0x252   :  { %6879 = vmatpush3.bf16.msra.mxu0 %v8036_v10  ;;  %6880 = vmatprep.mubr.msk.bf16.mxu0 %vm7934_vm1, %v7933_v0 }
 0x253   :  { %6892 = vmatprep.subr.bf16.mxu0 %v7933_v0 }
 0x259   :  { %6881 = vmatmul.mubr.msk.bf16.vlgmr.msra.gmra.mxu0 %vm174_vm2, %v1695_v6 }
 0x25a   :  { %6893 = vmatpush3.bf16.msra.mxu0 %v8064_v15  ;;  %6894 = vmatprep.mubr.msk.bf16.mxu0 %vm7934_vm1, %v7933_v0 }
 0x25b   :  { %6906 = vmatprep.subr.bf16.mxu0 %v7933_v0 }
 0x261   :  { %6895 = vmatmul.mubr.msk.bf16.vlgmr.msra.gmra.mxu0 %vm174_vm2, %v1695_v6 }
 0x262   :  { %6907 = vmatpush3.bf16.msra.mxu0 %v8092_v19  ;;  %6908 = vmatprep.mubr.msk.bf16.mxu0 %vm7934_vm1, %v7933_v0 }
 0x263   :  { %6920 = vmatprep.subr.bf16.mxu0 %v7933_v0 }
 0x269   :  { %6909 = vmatmul.mubr.msk.bf16.vlgmr.msra.gmra.mxu0 %vm174_vm2, %v1695_v6 }
 0x26a   :  { %6921 = vmatpush3.bf16.msra.mxu0 %v8175_v28  ;;  %6924 = vmatprep.mubr.msk.bf16.mxu0 %vm7934_vm1, %v7933_v0 }
 0x26b   :  { %6922 = vmatprep.subr.bf16.mxu0 %v7933_v0 }
 0x26e   :  { %6923 = vmatpush3.bf16.msra.mxu0 %v8185_v29 }
 0x26f   :  { %6936 = vmatprep.subr.bf16.mxu0 %v7933_v0 }
 0x2d1   :  { %v1376_v7 = vpop.f32.mrf.mxu1 }
 0x2d3   :  { %v6798_v9 = vpop.f32.mrf.mxu1 }
 0x2d5   :  { %v1379_v12 = vpop.f32.mrf.mxu1 }
 0x2d7   :  { %v6799_v14 = vpop.f32.mrf.mxu1 }
 0x2d9   :  { %v1466_v16 = vpop.f32.mrf.mxu1 }
 0x2db   :  { %v6814_v18 = vpop.f32.mrf.mxu1 }
 0x2dd   :  { %v1469_v20 = vpop.f32.mrf.mxu1 }
 0x2df   :  { %v6815_v21 = vpop.f32.mrf.mxu1 }
 0x2e1   :  { %v1553_v27 = vpop.f32.mrf.mxu1 }
 0x2e3   :  { %v6830_v41 = vpop.f32.mrf.mxu1 }
 0x2e5   :  { %v1556_v28 = vpop.f32.mrf.mxu1 }
 0x2e7   :  { %v6831_v43 = vpop.f32.mrf.mxu1 }
 0x2e9   :  { %v1635_v36 = vpop.f32.mrf.mxu1 }
 0x2eb   :  { %v6846_v44 = vpop.f32.mrf.mxu1 }
 0x2ed   :  { %v1638_v46 = vpop.f32.mrf.mxu1 }
 0x2ef   :  { %v6847_v47 = vpop.f32.mrf.mxu1 }
 0x2f1   :  { %v1419_v48 = vpop.f32.mrf.mxu0  ;;  %v1730_v29 = vpop.f32.mrf.mxu1 }
 0x2f2   :  { %v1420_v8 = vadd.f32 %v1419_v48, %v1376_v7 }
 0x2f3   :  { %v6806_v52 = vpop.f32.mrf.mxu0  ;;  %v6862_v4 = vpop.f32.mrf.mxu1 }
 0x2f4   :  { %v1425_v61 = vadd.f32 %v1420_v8, %v8332_v40 }
 0x2f5   :  { %v1422_v62 = vpop.f32.mrf.mxu0  ;;  %v1733_v5 = vpop.f32.mrf.mxu1 }
 0x2f6   :  { %v6111_v31 = vmul.f32 -1.442695, %v1425_v61 }
 0x2f7   :  { %v6807_v11 = vpop.f32.mrf.mxu0  ;;  %v6863_v17 = vpop.f32.mrf.mxu1 }
 0x2f8   :  { %7661 = vpow2.f32 %v6111_v31 }
 0x2f9   :  { %v1506_v30 = vpop.f32.mrf.mxu0  ;;  %v1820_v38 = vpop.f32.mrf.mxu1 }
 0x2fa   :  { %v1507_v32 = vadd.f32 %v1506_v30, %v1466_v16 }
 0x2fb   :  { %v6822_v54 = vpop.f32.mrf.mxu0  ;;  %v6876_v42 = vpop.f32.mrf.mxu1 }
 0x2fc   :  { %v1512_v34 = vadd.f32 %v8338_v60, %v1507_v32 }
 0x2fd   :  { %v1509_v22 = vpop.f32.mrf.mxu0  ;;  %v1823_v35 = vpop.f32.mrf.mxu1 }
 0x2fe   :  { %v6114_v39 = vmul.f32 -1.442695, %v1512_v34 }
 0x2ff   :  { %v6823_v1 = vpop.f32.mrf.mxu0  ;;  %v6877_v24 = vpop.f32.mrf.mxu1 }
 0x300   :  { %7663 = vpow2.f32 %v6114_v39 }
 0x301   :  { %v1593_v25 = vpop.f32.mrf.mxu0  ;;  %v1907_v26 = vpop.f32.mrf.mxu1 }
 0x302   :  { %v1594_v12 = vadd.f32 %v1593_v25, %v1553_v27 }
 0x303   :  { %v6838_v49 = vpop.f32.mrf.mxu0  ;;  %v6890_v3 = vpop.f32.mrf.mxu1 }
 0x304   :  { %v1599_v28 = vadd.f32 %v8344_v50, %v1594_v12 }
 0x305   :  { %v1596_v6 = vpop.f32.mrf.mxu0  ;;  %v1910_v7 = vpop.f32.mrf.mxu1 }
 0x306   :  { %v7662_v9 = vpop.eup %7661 }
 0x307   :  { %v6839_v14 = vpop.f32.mrf.mxu0  ;;  %v6891_v16 = vpop.f32.mrf.mxu1  ;;  %v1429_v21 = vadd.f32 1.0, %v7662_v9 }
 0x309   :  { %v1675_v18 = vpop.f32.mrf.mxu0  ;;  %v1989_v20 = vpop.f32.mrf.mxu1  ;;  %7665 = vrcp.f32 %v1429_v21 }
 0x30a   :  { %v1676_v41 = vadd.f32 %v1675_v18, %v1635_v36  ;;  %7667 = vtanh.f32 %v1599_v28 }
 0x30b   :  { %v6854_v43 = vpop.f32.mrf.mxu0  ;;  %v6904_v44 = vpop.f32.mrf.mxu1 }
 0x30c   :  { %v1681_v46 = vadd.f32 %v8349_v51, %v1676_v41 }
 0x30d   :  { %v7664_v47 = vpop.eup %7663  ;;  %v1678_v48 = vpop.f32.mrf.mxu0 }
 0x30e   :  { %v1992_v8 = vpop.f32.mrf.mxu1  ;;  %v1516_v52 = vadd.f32 1.0, %v7664_v47  ;;  %v6119_v4 = vmul.f32 -1.442695, %v1681_v46 }
 0x30f   :  { %v6855_v27 = vpop.f32.mrf.mxu0 }
 0x310   :  { %v6905_v61 = vpop.f32.mrf.mxu1  ;;  %7669 = vrcp.f32 %v1516_v52 }
 0x311   :  { %7671 = vpow2.f32 %v6119_v4  ;;  %v1773_v62 = vpop.f32.mrf.mxu0 }
 0x312   :  { %v1774_v5 = vadd.f32 %v1773_v62, %v1730_v29  ;;  %v8504_v62 = vld [vmem:[%s9486_s5 + $0x28] sm:$0xff]  }
 0x313   :  { %v6868_v36 = vpop.f32.mrf.mxu0 }
 0x314   :  { %v1779_v31 = vadd.f32 %v1774_v5, %v8196_v33 }
 0x315   :  { %v1776_v11 = vpop.f32.mrf.mxu0 }
 0x316   :  { %v6123_v17 = vmul.f32 -1.442695, %v1779_v31  ;;  %v7666_v42 = vpop.eup %7665 }
 0x317   :  { %v6869_v30 = vpop.f32.mrf.mxu0  ;;  %v7668_v22 = vpop.eup %7667 }
 0x318   :  { %7673 = vpow2.f32 %v6123_v17  ;;  %v1689_v29 = vmul.f32 %v7668_v22, %v7666_v42  ;;  %v8516_v30 = vld [vmem:[%s9486_s5 + $0x20] sm:$0xff]  }
 0x319   :  { %v1860_v32 = vpop.f32.mrf.mxu0 }
 0x31a   :  { %v1861_v54 = vadd.f32 %v1860_v32, %v1820_v38  ;;  %v8534_v32 = vld [vmem:[%s9486_s5 + $0x30] sm:$0xff]  }
 0x31b   :  { %v6882_v34 = vpop.f32.mrf.mxu0 }
 0x31c   :  { %v1866_v35 = vadd.f32 %v8202_v45, %v1861_v54  ;;  %v8542_v54 = vld [vmem:[%s9484_s2 + $0x8] sm:$0xff]  }
 0x31d   :  { %v7670_v39 = vpop.eup %7669  ;;  %v1863_v1 = vpop.f32.mrf.mxu0 }
 0x31e   :  { %v7672_v24 = vpop.eup %7671  ;;  %v1688_v25 = vmul.f32 %v7670_v39, %v8355_v37  ;;  %v6126_v49 = vmul.f32 -1.442695, %v1866_v35  ;;  %v8551_v35 = vld [vmem:[%s9484_s2] sm:$0xff]   ;;  %v8561_v1 = vld [vmem:[%s9484_s2 + $0x18] sm:$0xff]  }
 0x31f   :  { %v1685_v3 = vadd.f32 1.0, %v7672_v24  ;;  %v6883_v33 = vpop.f32.mrf.mxu0  ;;  %v8639_v24 = vld [vmem:[%s9486_s5 + $0x8] sm:$0xff]  }
 0x320   :  { %v8478_v6 = vadd.f32 %v1689_v29, %v1688_v25  ;;  %7675 = vpow2.f32 %v6126_v49  ;;  %v8648_v29 = vld [vmem:[%s9486_s5] sm:$0xff]   ;;  %v8671_v49 = vld [vmem:[%s9487_s4 + $0x8] sm:$0xff]  }
 0x321   :  { %7677 = vrcp.f32 %v1685_v3  ;;  %v1947_v7 = vpop.f32.mrf.mxu0  ;;  %v8680_v3 = vld [vmem:[%s9487_s4] sm:$0xff]  }
 0x322   :  { %7679 = vtanh.f32 %v8478_v6  ;;  %v1948_v45 = vadd.f32 %v1947_v7, %v1907_v26 }
 0x323   :  { %v6896_v38 = vpop.f32.mrf.mxu0 }
 0x324   :  { %v1953_v37 = vadd.f32 %v8208_v63, %v1948_v45  ;;  %v8487_v63 = vld [vmem:[%s9486_s5 + $0x18] sm:$0xff]  }
 0x325   :  { %v1950_v9 = vpop.f32.mrf.mxu0  ;;  %v7674_v12 = vpop.eup %7673 }
 0x326   :  { %v1783_v18 = vadd.f32 1.0, %v7674_v12 }
 0x327   :  { %v6897_v14 = vpop.f32.mrf.mxu0 }
 0x328   :  { %7681 = vrcp.f32 %v1783_v18 }
 0x329   :  { %v2029_v16 = vpop.f32.mrf.mxu0  ;;  %7683 = vtanh.f32 %v1953_v37 }
 0x32a   :  { %v2030_v21 = vadd.f32 %v2029_v16, %v1989_v20 }
 0x32b   :  { %v6910_v41 = vpop.f32.mrf.mxu0 }
 0x32c   :  { %v2035_v28 = vadd.f32 %v8214_v13, %v2030_v21  ;;  %v8496_v13 = vld [vmem:[%s9486_s5 + $0x10] sm:$0xff]  }
 0x32d   :  { %v7676_v43 = vpop.eup %7675  ;;  %v2032_v44 = vpop.f32.mrf.mxu0 }
 0x32e   :  { %v7678_v46 = vpop.eup %7677  ;;  %v1870_v47 = vadd.f32 1.0, %v7676_v43  ;;  %v6131_v48 = vmul.f32 -1.442695, %v2035_v28 }
 0x32f   :  { %v7680_v8 = vpop.eup %7679  ;;  %v6911_v52 = vpop.f32.mrf.mxu0 }
 0x330   :  { %7685 = vrcp.f32 %v1870_v47  ;;  %v1692_v26 = vmul.f32 %v7680_v8, %v7678_v46 }
 0x331   :  { %7687 = vpow2.f32 %v6131_v48 }
 0x332   :  { %v2048_v4 = vpack.c.bf16 %v1692_v26, %v1692_v26 }
 0x334   :  { %6917 = vmatmul.mubr.msk.bf16.vlgmr.msra.gmra.mxu1 %vm130_vm3, %v2048_v4 }
 0x335   :  { %6929 = vmatpush3.bf16.msra.mxu1 %v8487_v63  ;;  %6932 = vmatprep.mubr.msk.bf16.mxu1 %vm7934_vm1, %v7933_v0  ;;  %v7682_v20 = vpop.eup %7681 }
 0x336   :  { %6930 = vmatprep.subr.bf16.mxu1 %v7933_v0  ;;  %v7684_v27 = vpop.eup %7683 }
 0x337   :  { %v2043_v31 = vmul.f32 %v7684_v27, %v7682_v20 }
 0x339   :  { %6931 = vmatpush3.bf16.msra.mxu1 %v8496_v13 }
 0x33a   :  { %6944 = vmatprep.subr.bf16.mxu1 %v7933_v0 }
 0x33c   :  { %6933 = vmatmul.mubr.msk.bf16.vlgmr.msra.gmra.mxu1 %vm130_vm3, %v2048_v4 }
 0x33d   :  { %v7686_v61 = vpop.eup %7685  ;;  %6945 = vmatpush3.bf16.msra.mxu1 %v8504_v62  ;;  %6948 = vmatprep.mubr.msk.bf16.mxu1 %vm7934_vm1, %v7933_v0 }
 0x33e   :  { %v7688_v5 = vpop.eup %7687  ;;  %v2042_v36 = vmul.f32 %v7686_v61, %v8373_v23  ;;  %6946 = vmatprep.subr.bf16.mxu1 %v7933_v0  ;;  %v8525_v23 = vld [vmem:[%s9486_s5 + $0x38] sm:$0xff]  }
 0x33f   :  { %v2039_v11 = vadd.f32 1.0, %v7688_v5 }
 0x340   :  { %v8511_v17 = vadd.f32 %v2043_v31, %v2042_v36 }
 0x341   :  { %7689 = vrcp.f32 %v2039_v11  ;;  %6947 = vmatpush3.bf16.msra.mxu1 %v8516_v30 }
 0x342   :  { %7691 = vtanh.f32 %v8511_v17  ;;  %6960 = vmatprep.subr.bf16.mxu1 %v7933_v0 }
 0x344   :  { %6949 = vmatmul.mubr.msk.bf16.vlgmr.msra.gmra.mxu1 %vm130_vm3, %v2048_v4 }
 0x345   :  { %6961 = vmatpush3.bf16.msra.mxu1 %v8525_v23  ;;  %6964 = vmatprep.mubr.msk.bf16.mxu1 %vm7934_vm1, %v7933_v0 }
 0x346   :  { %6962 = vmatprep.subr.bf16.mxu1 %v7933_v0 }
 0x349   :  { %6963 = vmatpush3.bf16.msra.mxu1 %v8534_v32 }
 0x34a   :  { %6976 = vmatprep.subr.bf16.mxu1 %v7933_v0 }
 0x34c   :  { %6965 = vmatmul.mubr.msk.bf16.vlgmr.msra.gmra.mxu1 %vm130_vm3, %v2048_v4 }
 0x34d   :  { %6977 = vmatpush3.bf16.msra.mxu1 %v8542_v54  ;;  %6980 = vmatprep.mubr.msk.bf16.mxu1 %vm7934_vm1, %v7933_v0 }
 0x34e   :  { %v7690_v42 = vpop.eup %7689  ;;  %6978 = vmatprep.subr.bf16.mxu1 %v7933_v0 }
 0x34f   :  { %v7692_v34 = vpop.eup %7691 }
 0x350   :  { %v2046_v22 = vmul.f32 %v7692_v34, %v7690_v42 }
 0x351   :  { %6979 = vmatpush3.bf16.msra.mxu1 %v8551_v35 }
 0x352   :  { %v2047_v39 = vpack.c.bf16 %v2046_v22, %v2046_v22  ;;  %6990 = vmatprep.subr.bf16.mxu1 %v7933_v0 }
 0x354   :  { %6925 = vmatmul.mubr.msk.bf16.vlgmr.msra.gmra.mxu0 %vm130_vm3, %v2047_v39  ;;  %6981 = vmatmul.mubr.msk.bf16.vlgmr.msra.gmra.mxu1 %vm130_vm3, %v2047_v39 }
 0x355   :  { %6937 = vmatpush3.bf16.msra.mxu0 %v8223_v53  ;;  %6991 = vmatpush3.bf16.msra.mxu1 %v8561_v1  ;;  %v8574_v53 = vld [vmem:[%s9484_s2 + $0x10] sm:$0xff]  }
 0x356   :  { %6938 = vmatprep.subr.bf16.mxu0 %v7933_v0  ;;  %6992 = vmatprep.subr.bf16.mxu1 %v7933_v0 }
 0x357   :  { %6940 = vmatprep.mubr.msk.bf16.mxu0 %vm7934_vm1, %v7933_v0  ;;  %6994 = vmatprep.mubr.msk.bf16.mxu1 %vm7934_vm1, %v7933_v0 }
 0x359   :  { %6939 = vmatpush3.bf16.msra.mxu0 %v8232_v55  ;;  %6993 = vmatpush3.bf16.msra.mxu1 %v8574_v53  ;;  %v8585_v55 = vld [vmem:[%s9484_s2 + $0x28] sm:$0xff]  }
 0x35a   :  { %6952 = vmatprep.subr.bf16.mxu0 %v7933_v0  ;;  %7004 = vmatprep.subr.bf16.mxu1 %v7933_v0 }
 0x35c   :  { %6941 = vmatmul.mubr.msk.bf16.vlgmr.msra.gmra.mxu0 %vm130_vm3, %v2047_v39  ;;  %6995 = vmatmul.mubr.msk.bf16.vlgmr.msra.gmra.mxu1 %vm130_vm3, %v2047_v39 }
 0x35d   :  { %6953 = vmatpush3.bf16.msra.mxu0 %v8245_v56  ;;  %7005 = vmatpush3.bf16.msra.mxu1 %v8585_v55  ;;  %v8598_v56 = vld [vmem:[%s9484_s2 + $0x20] sm:$0xff]  }
 0x35e   :  { %6954 = vmatprep.subr.bf16.mxu0 %v7933_v0  ;;  %7006 = vmatprep.subr.bf16.mxu1 %v7933_v0 }
 0x35f   :  { %6956 = vmatprep.mubr.msk.bf16.mxu0 %vm7934_vm1, %v7933_v0  ;;  %7008 = vmatprep.mubr.msk.bf16.mxu1 %vm7934_vm1, %v7933_v0 }
 0x361   :  { %6955 = vmatpush3.bf16.msra.mxu0 %v8256_v57  ;;  %7007 = vmatpush3.bf16.msra.mxu1 %v8598_v56  ;;  %v8609_v57 = vld [vmem:[%s9484_s2 + $0x38] sm:$0xff]  }
 0x362   :  { %6968 = vmatprep.subr.bf16.mxu0 %v7933_v0  ;;  %7018 = vmatprep.subr.bf16.mxu1 %v7933_v0 }
 0x364   :  { %6957 = vmatmul.mubr.msk.bf16.vlgmr.msra.gmra.mxu0 %vm130_vm3, %v2047_v39  ;;  %7009 = vmatmul.mubr.msk.bf16.vlgmr.msra.gmra.mxu1 %vm130_vm3, %v2047_v39 }
 0x365   :  { %6969 = vmatpush3.bf16.msra.mxu0 %v8269_v58  ;;  %7019 = vmatpush3.bf16.msra.mxu1 %v8609_v57  ;;  %v8622_v58 = vld [vmem:[%s9484_s2 + $0x30] sm:$0xff]  }
 0x366   :  { %6970 = vmatprep.subr.bf16.mxu0 %v7933_v0  ;;  %7020 = vmatprep.subr.bf16.mxu1 %v7933_v0 }
 0x367   :  { %6972 = vmatprep.mubr.msk.bf16.mxu0 %vm7934_vm1, %v7933_v0  ;;  %7022 = vmatprep.mubr.msk.bf16.mxu1 %vm7934_vm1, %v7933_v0 }
 0x369   :  { %6971 = vmatpush3.bf16.msra.mxu0 %v8280_v59  ;;  %7021 = vmatpush3.bf16.msra.mxu1 %v8622_v58  ;;  %v6143_v59 = vld [vmem:[%s9485_s0 + $0x18] sm:$0xff] }
 0x36a   :  { %6984 = vmatprep.subr.bf16.mxu0 %v7933_v0  ;;  %7032 = vmatprep.subr.bf16.mxu1 %v7933_v0  ;;  %v2405_v25 = vpack.c.bf16 %v6143_v59, %v6143_v59 }
 0x36c   :  { %6973 = vmatmul.mubr.msk.bf16.vlgmr.msra.gmra.mxu0 %vm130_vm3, %v2047_v39  ;;  %7023 = vmatmul.mubr.msk.bf16.vlgmr.msra.gmra.mxu1 %vm130_vm3, %v2047_v39 }
 0x36d   :  { %6985 = vmatpush3.bf16.msra.mxu0 %v7992_v2  ;;  %6986 = vmatprep.mubr.msk.bf16.mxu0 %vm7934_vm1, %v7933_v0 }
 0x36e   :  { %6998 = vmatprep.subr.bf16.mxu0 %v7933_v0  ;;  %7033 = vmatpush3.bf16.msra.mxu1 %v8639_v24 }
 0x36f   :  { %7034 = vmatprep.subr.bf16.mxu1 %v7933_v0  ;;  %7036 = vmatprep.mubr.msk.bf16.mxu1 %vm7934_vm1, %v7933_v0 }
 0x372   :  { %7035 = vmatpush3.bf16.msra.mxu1 %v8648_v29 }
 0x373   :  { %7048 = vmatprep.subr.bf16.mxu1 %v7933_v0 }
 0x374   :  { %6987 = vmatmul.mubr.msk.bf16.vlgmr.msra.gmra.mxu0 %vm174_vm2, %v2405_v25 }
 0x375   :  { %6999 = vmatpush3.bf16.msra.mxu0 %v8036_v10  ;;  %7000 = vmatprep.mubr.msk.bf16.mxu0 %vm7934_vm1, %v7933_v0 }
 0x376   :  { %7012 = vmatprep.subr.bf16.mxu0 %v7933_v0 }
 0x37c   :  { %7001 = vmatmul.mubr.msk.bf16.vlgmr.msra.gmra.mxu0 %vm174_vm2, %v2405_v25 }
 0x37d   :  { %7013 = vmatpush3.bf16.msra.mxu0 %v8064_v15  ;;  %7014 = vmatprep.mubr.msk.bf16.mxu0 %vm7934_vm1, %v7933_v0 }
 0x37e   :  { %7026 = vmatprep.subr.bf16.mxu0 %v7933_v0 }
 0x384   :  { %7015 = vmatmul.mubr.msk.bf16.vlgmr.msra.gmra.mxu0 %vm174_vm2, %v2405_v25 }
 0x385   :  { %7027 = vmatpush3.bf16.msra.mxu0 %v8092_v19  ;;  %7028 = vmatprep.mubr.msk.bf16.mxu0 %vm7934_vm1, %v7933_v0 }
 0x386   :  { %7040 = vmatprep.subr.bf16.mxu0 %v7933_v0 }
 0x38c   :  { %7029 = vmatmul.mubr.msk.bf16.vlgmr.msra.gmra.mxu0 %vm174_vm2, %v2405_v25 }
 0x38d   :  { %7041 = vmatpush3.bf16.msra.mxu0 %v8671_v49  ;;  %7044 = vmatprep.mubr.msk.bf16.mxu0 %vm7934_vm1, %v7933_v0 }
 0x38e   :  { %7042 = vmatprep.subr.bf16.mxu0 %v7933_v0 }
 0x391   :  { %7043 = vmatpush3.bf16.msra.mxu0 %v8680_v3 }
 0x392   :  { %7056 = vmatprep.subr.bf16.mxu0 %v7933_v0 }
 0x3f4   :  { %v2086_v33 = vpop.f32.mrf.mxu1 }
 0x3f6   :  { %v6918_v7 = vpop.f32.mrf.mxu1 }
 0x3f8   :  { %v2089_v38 = vpop.f32.mrf.mxu1 }
 0x3fa   :  { %v6919_v9 = vpop.f32.mrf.mxu1 }
 0x3fc   :  { %v2176_v12 = vpop.f32.mrf.mxu1 }
 0x3fe   :  { %v6934_v45 = vpop.f32.mrf.mxu1 }
 0x400   :  { %v2179_v14 = vpop.f32.mrf.mxu1 }
 0x402   :  { %v6935_v16 = vpop.f32.mrf.mxu1 }
 0x404   :  { %v2263_v18 = vpop.f32.mrf.mxu1 }
 0x406   :  { %v6950_v21 = vpop.f32.mrf.mxu1 }
 0x408   :  { %v2266_v37 = vpop.f32.mrf.mxu1 }
 0x40a   :  { %v6951_v41 = vpop.f32.mrf.mxu1 }
 0x40c   :  { %v2345_v28 = vpop.f32.mrf.mxu1 }
 0x40e   :  { %v6966_v43 = vpop.f32.mrf.mxu1 }
 0x410   :  { %v2348_v44 = vpop.f32.mrf.mxu1 }
 0x412   :  { %v6967_v46 = vpop.f32.mrf.mxu1 }
 0x414   :  { %v2129_v47 = vpop.f32.mrf.mxu0  ;;  %v2440_v48 = vpop.f32.mrf.mxu1 }
 0x415   :  { %v2130_v8 = vadd.f32 %v2129_v47, %v2086_v33 }
 0x416   :  { %v6926_v52 = vpop.f32.mrf.mxu0  ;;  %v6982_v26 = vpop.f32.mrf.mxu1 }
 0x417   :  { %v2135_v4 = vadd.f32 %v2130_v8, %v8332_v40 }
 0x418   :  { %v2132_v20 = vpop.f32.mrf.mxu0  ;;  %v2443_v27 = vpop.f32.mrf.mxu1 }
 0x419   :  { %v6134_v61 = vmul.f32 -1.442695, %v2135_v4 }
 0x41a   :  { %v6927_v5 = vpop.f32.mrf.mxu0  ;;  %v6983_v36 = vpop.f32.mrf.mxu1 }
 0x41b   :  { %7693 = vpow2.f32 %v6134_v61 }
 0x41c   :  { %v2216_v31 = vpop.f32.mrf.mxu0  ;;  %v2530_v11 = vpop.f32.mrf.mxu1 }
 0x41d   :  { %v2217_v42 = vadd.f32 %v2216_v31, %v2176_v12 }
 0x41e   :  { %v6942_v34 = vpop.f32.mrf.mxu0  ;;  %v6996_v22 = vpop.f32.mrf.mxu1 }
 0x41f   :  { %v2222_v39 = vadd.f32 %v8338_v60, %v2217_v42 }
 0x420   :  { %v2219_v59 = vpop.f32.mrf.mxu0  ;;  %v2533_v25 = vpop.f32.mrf.mxu1 }
 0x421   :  { %v6137_v33 = vmul.f32 -1.442695, %v2222_v39 }
 0x422   :  { %v6943_v7 = vpop.f32.mrf.mxu0  ;;  %v6997_v38 = vpop.f32.mrf.mxu1 }
 0x423   :  { %7695 = vpow2.f32 %v6137_v33 }
 0x424   :  { %v2303_v40 = vpop.f32.mrf.mxu0  ;;  %v2617_v9 = vpop.f32.mrf.mxu1 }
 0x425   :  { %v2304_v41 = vadd.f32 %v2303_v40, %v2263_v18 }
 0x426   :  { %v6958_v45 = vpop.f32.mrf.mxu0  ;;  %v7010_v14 = vpop.f32.mrf.mxu1 }
 0x427   :  { %v2309_v8 = vadd.f32 %v8344_v50, %v2304_v41  ;;  %v8691_v50 = vld [vmem:[%s9488_s3] sm:$0xff] }
 0x428   :  { %v2306_v16 = vpop.f32.mrf.mxu0  ;;  %v2620_v21 = vpop.f32.mrf.mxu1 }
 0x429   :  { %v7694_v37 = vpop.eup %7693 }
 0x42a   :  { %v6959_v43 = vpop.f32.mrf.mxu0  ;;  %v7011_v12 = vpop.f32.mrf.mxu1  ;;  %v2139_v47 = vadd.f32 1.0, %v7694_v37 }
 0x42c   :  { %v2385_v44 = vpop.f32.mrf.mxu0  ;;  %v2699_v46 = vpop.f32.mrf.mxu1  ;;  %7697 = vrcp.f32 %v2139_v47 }
 0x42d   :  { %v2386_v60 = vadd.f32 %v2385_v44, %v2345_v28  ;;  %7699 = vtanh.f32 %v2309_v8 }
 0x42e   :  { %v6974_v52 = vpop.f32.mrf.mxu0  ;;  %v7024_v26 = vpop.f32.mrf.mxu1 }
 0x42f   :  { %v2391_v4 = vadd.f32 %v8349_v51, %v2386_v60 }
 0x430   :  { %v7696_v20 = vpop.eup %7695  ;;  %v2388_v27 = vpop.f32.mrf.mxu0 }
 0x431   :  { %v2702_v61 = vpop.f32.mrf.mxu1  ;;  %v2226_v5 = vadd.f32 1.0, %v7696_v20  ;;  %v6142_v36 = vmul.f32 -1.442695, %v2391_v4 }
 0x432   :  { %v6975_v18 = vpop.f32.mrf.mxu0 }
 0x433   :  { %v7025_v31 = vpop.f32.mrf.mxu1  ;;  %7701 = vrcp.f32 %v2226_v5  ;;  %v8713_v18 = vld [vmem:[%s9488_s3 + $0x18] sm:$0xff] }
 0x434   :  { %7703 = vpow2.f32 %v6142_v36  ;;  %v2483_v42 = vpop.f32.mrf.mxu0 }
 0x435   :  { %v2484_v34 = vadd.f32 %v2483_v42, %v2440_v48  ;;  %v8697_v48 = vld [vmem:[%s9488_s3 + $0x8] sm:$0xff] }
 0x436   :  { %v6988_v28 = vpop.f32.mrf.mxu0 }
 0x437   :  { %v2489_v51 = vadd.f32 %v8691_v50, %v2484_v34 }
 0x438   :  { %v2486_v22 = vpop.f32.mrf.mxu0 }
 0x439   :  { %v6146_v39 = vmul.f32 -1.442695, %v2489_v51  ;;  %v7698_v7 = vpop.eup %7697 }
 0x43a   :  { %v6989_v59 = vpop.f32.mrf.mxu0  ;;  %v7700_v40 = vpop.eup %7699 }
 0x43b   :  { %7705 = vpow2.f32 %v6146_v39  ;;  %v2399_v41 = vmul.f32 %v7700_v40, %v7698_v7 }
 0x43c   :  { %v2570_v25 = vpop.f32.mrf.mxu0 }
 0x43d   :  { %v2571_v33 = vadd.f32 %v2570_v25, %v2530_v11 }
 0x43e   :  { %v7002_v38 = vpop.f32.mrf.mxu0 }
 0x43f   :  { %v2576_v45 = vadd.f32 %v8697_v48, %v2571_v33 }
 0x440   :  { %v7702_v14 = vpop.eup %7701  ;;  %v2573_v16 = vpop.f32.mrf.mxu0 }
 0x441   :  { %v7704_v21 = vpop.eup %7703  ;;  %v2398_v37 = vmul.f32 %v7702_v14, %v8478_v6  ;;  %v6149_v43 = vmul.f32 -1.442695, %v2576_v45  ;;  %v8707_v6 = vld [vmem:[%s9488_s3 + $0x10] sm:$0xff] }
 0x442   :  { %v2395_v12 = vadd.f32 1.0, %v7704_v21  ;;  %v7003_v44 = vpop.f32.mrf.mxu0 }
 0x443   :  { %v8701_v11 = vadd.f32 %v2399_v41, %v2398_v37  ;;  %7707 = vpow2.f32 %v6149_v43  ;;  %v8753_v43 = vld [vmem:[%s9487_s4 + $0x18] sm:$0xff]   ;;  %v8777_v44 = vld [vmem:[%s9487_s4 + $0x28] sm:$0xff]  }
 0x444   :  { %7709 = vrcp.f32 %v2395_v12  ;;  %v2657_v47 = vpop.f32.mrf.mxu0  ;;  %v8766_v12 = vld [vmem:[%s9487_s4 + $0x10] sm:$0xff]  }
 0x445   :  { %7711 = vtanh.f32 %v8701_v11  ;;  %v2658_v26 = vadd.f32 %v2657_v47, %v2617_v9  ;;  %v8790_v47 = vld [vmem:[%s9487_s4 + $0x20] sm:$0xff]  }
 0x446   :  { %v7016_v60 = vpop.f32.mrf.mxu0 }
 0x447   :  { %v2663_v5 = vadd.f32 %v8707_v6, %v2658_v26  ;;  %v8801_v60 = vld [vmem:[%s9487_s4 + $0x38] sm:$0xff]  }
 0x448   :  { %v2660_v8 = vpop.f32.mrf.mxu0  ;;  %v7706_v52 = vpop.eup %7705 }
 0x449   :  { %v2493_v27 = vadd.f32 1.0, %v7706_v52  ;;  %v8814_v8 = vld [vmem:[%s9487_s4 + $0x30] sm:$0xff]   ;;  %v6166_v52 = vld [vmem:[%s9485_s0 + $0x20] sm:$0xff] }
 0x44a   :  { %v7017_v4 = vpop.f32.mrf.mxu0  ;;  %v3115_v26 = vpack.c.bf16 %v6166_v52, %v6166_v52 }
 0x44b   :  { %7713 = vrcp.f32 %v2493_v27 }
 0x44c   :  { %v2739_v20 = vpop.f32.mrf.mxu0  ;;  %7715 = vtanh.f32 %v2663_v5 }
 0x44d   :  { %v2740_v61 = vadd.f32 %v2739_v20, %v2699_v46 }
 0x44e   :  { %v7030_v36 = vpop.f32.mrf.mxu0 }
 0x44f   :  { %v2745_v31 = vadd.f32 %v8713_v18, %v2740_v61 }
 0x450   :  { %v7708_v9 = vpop.eup %7707  ;;  %v2742_v42 = vpop.f32.mrf.mxu0 }
 0x451   :  { %v7710_v34 = vpop.eup %7709  ;;  %v2580_v46 = vadd.f32 1.0, %v7708_v9  ;;  %v6154_v28 = vmul.f32 -1.442695, %v2745_v31 }
 0x452   :  { %v7712_v51 = vpop.eup %7711  ;;  %v7031_v22 = vpop.f32.mrf.mxu0 }
 0x453   :  { %7717 = vrcp.f32 %v2580_v46  ;;  %v2402_v39 = vmul.f32 %v7712_v51, %v7710_v34 }
 0x454   :  { %7719 = vpow2.f32 %v6154_v28 }
 0x455   :  { %v2758_v59 = vpack.c.bf16 %v2402_v39, %v2402_v39 }
 0x457   :  { %7037 = vmatmul.mubr.msk.bf16.vlgmr.msra.gmra.mxu1 %vm130_vm3, %v2758_v59 }
 0x458   :  { %7049 = vmatpush3.bf16.msra.mxu1 %v8487_v63  ;;  %7052 = vmatprep.mubr.msk.bf16.mxu1 %vm7934_vm1, %v7933_v0  ;;  %v7714_v25 = vpop.eup %7713 }
 0x459   :  { %7050 = vmatprep.subr.bf16.mxu1 %v7933_v0  ;;  %v7716_v33 = vpop.eup %7715 }
 0x45a   :  { %v2753_v45 = vmul.f32 %v7716_v33, %v7714_v25 }
 0x45c   :  { %7051 = vmatpush3.bf16.msra.mxu1 %v8496_v13 }
 0x45d   :  { %7064 = vmatprep.subr.bf16.mxu1 %v7933_v0 }
 0x45f   :  { %7053 = vmatmul.mubr.msk.bf16.vlgmr.msra.gmra.mxu1 %vm130_vm3, %v2758_v59 }
 0x460   :  { %v7718_v7 = vpop.eup %7717  ;;  %7065 = vmatpush3.bf16.msra.mxu1 %v8504_v62  ;;  %7068 = vmatprep.mubr.msk.bf16.mxu1 %vm7934_vm1, %v7933_v0 }
 0x461   :  { %v7720_v38 = vpop.eup %7719  ;;  %v2752_v40 = vmul.f32 %v7718_v7, %v8511_v17  ;;  %7066 = vmatprep.subr.bf16.mxu1 %v7933_v0 }
 0x462   :  { %v2749_v14 = vadd.f32 1.0, %v7720_v38 }
 0x463   :  { %v8729_v16 = vadd.f32 %v2753_v45, %v2752_v40  ;;  %v8860_v45 = vld [vmem:[%s9489_s6] sm:$0xff] }
 0x464   :  { %7721 = vrcp.f32 %v2749_v14  ;;  %7067 = vmatpush3.bf16.msra.mxu1 %v8516_v30 }
 0x465   :  { %7723 = vtanh.f32 %v8729_v16  ;;  %7080 = vmatprep.subr.bf16.mxu1 %v7933_v0 }
 0x467   :  { %7069 = vmatmul.mubr.msk.bf16.vlgmr.msra.gmra.mxu1 %vm130_vm3, %v2758_v59 }
 0x468   :  { %7081 = vmatpush3.bf16.msra.mxu1 %v8525_v23  ;;  %7084 = vmatprep.mubr.msk.bf16.mxu1 %vm7934_vm1, %v7933_v0 }
 0x469   :  { %7082 = vmatprep.subr.bf16.mxu1 %v7933_v0 }
 0x46c   :  { %7083 = vmatpush3.bf16.msra.mxu1 %v8534_v32 }
 0x46d   :  { %7096 = vmatprep.subr.bf16.mxu1 %v7933_v0 }
 0x46f   :  { %7085 = vmatmul.mubr.msk.bf16.vlgmr.msra.gmra.mxu1 %vm130_vm3, %v2758_v59 }
 0x470   :  { %7097 = vmatpush3.bf16.msra.mxu1 %v8542_v54  ;;  %7100 = vmatprep.mubr.msk.bf16.mxu1 %vm7934_vm1, %v7933_v0 }
 0x471   :  { %v7722_v17 = vpop.eup %7721  ;;  %7098 = vmatprep.subr.bf16.mxu1 %v7933_v0 }
 0x472   :  { %v7724_v21 = vpop.eup %7723 }
 0x473   :  { %v2756_v37 = vmul.f32 %v7724_v21, %v7722_v17 }
 0x474   :  { %7099 = vmatpush3.bf16.msra.mxu1 %v8551_v35 }
 0x475   :  { %v2757_v41 = vpack.c.bf16 %v2756_v37, %v2756_v37  ;;  %7110 = vmatprep.subr.bf16.mxu1 %v7933_v0 }
 0x477   :  { %7045 = vmatmul.mubr.msk.bf16.vlgmr.msra.gmra.mxu0 %vm130_vm3, %v2757_v41  ;;  %7101 = vmatmul.mubr.msk.bf16.vlgmr.msra.gmra.mxu1 %vm130_vm3, %v2757_v41 }
 0x478   :  { %7057 = vmatpush3.bf16.msra.mxu0 %v8753_v43  ;;  %7111 = vmatpush3.bf16.msra.mxu1 %v8561_v1 }
 0x479   :  { %7058 = vmatprep.subr.bf16.mxu0 %v7933_v0  ;;  %7112 = vmatprep.subr.bf16.mxu1 %v7933_v0 }
 0x47a   :  { %7060 = vmatprep.mubr.msk.bf16.mxu0 %vm7934_vm1, %v7933_v0  ;;  %7114 = vmatprep.mubr.msk.bf16.mxu1 %vm7934_vm1, %v7933_v0 }
 0x47c   :  { %7059 = vmatpush3.bf16.msra.mxu0 %v8766_v12  ;;  %7113 = vmatpush3.bf16.msra.mxu1 %v8574_v53 }
 0x47d   :  { %7072 = vmatprep.subr.bf16.mxu0 %v7933_v0  ;;  %7124 = vmatprep.subr.bf16.mxu1 %v7933_v0 }
 0x47f   :  { %7061 = vmatmul.mubr.msk.bf16.vlgmr.msra.gmra.mxu0 %vm130_vm3, %v2757_v41  ;;  %7115 = vmatmul.mubr.msk.bf16.vlgmr.msra.gmra.mxu1 %vm130_vm3, %v2757_v41 }
 0x480   :  { %7073 = vmatpush3.bf16.msra.mxu0 %v8777_v44  ;;  %7125 = vmatpush3.bf16.msra.mxu1 %v8585_v55 }
 0x481   :  { %7074 = vmatprep.subr.bf16.mxu0 %v7933_v0  ;;  %7126 = vmatprep.subr.bf16.mxu1 %v7933_v0 }
 0x482   :  { %7076 = vmatprep.mubr.msk.bf16.mxu0 %vm7934_vm1, %v7933_v0  ;;  %7128 = vmatprep.mubr.msk.bf16.mxu1 %vm7934_vm1, %v7933_v0 }
 0x484   :  { %7075 = vmatpush3.bf16.msra.mxu0 %v8790_v47  ;;  %7127 = vmatpush3.bf16.msra.mxu1 %v8598_v56 }
 0x485   :  { %7088 = vmatprep.subr.bf16.mxu0 %v7933_v0  ;;  %7138 = vmatprep.subr.bf16.mxu1 %v7933_v0 }
 0x487   :  { %7077 = vmatmul.mubr.msk.bf16.vlgmr.msra.gmra.mxu0 %vm130_vm3, %v2757_v41  ;;  %7129 = vmatmul.mubr.msk.bf16.vlgmr.msra.gmra.mxu1 %vm130_vm3, %v2757_v41 }
 0x488   :  { %7089 = vmatpush3.bf16.msra.mxu0 %v8801_v60  ;;  %7139 = vmatpush3.bf16.msra.mxu1 %v8609_v57 }
 0x489   :  { %7090 = vmatprep.subr.bf16.mxu0 %v7933_v0  ;;  %7140 = vmatprep.subr.bf16.mxu1 %v7933_v0 }
 0x48a   :  { %7092 = vmatprep.mubr.msk.bf16.mxu0 %vm7934_vm1, %v7933_v0  ;;  %7142 = vmatprep.mubr.msk.bf16.mxu1 %vm7934_vm1, %v7933_v0 }
 0x48c   :  { %7091 = vmatpush3.bf16.msra.mxu0 %v8814_v8  ;;  %7141 = vmatpush3.bf16.msra.mxu1 %v8622_v58 }
 0x48d   :  { %7104 = vmatprep.subr.bf16.mxu0 %v7933_v0  ;;  %7152 = vmatprep.subr.bf16.mxu1 %v7933_v0 }
 0x48f   :  { %7093 = vmatmul.mubr.msk.bf16.vlgmr.msra.gmra.mxu0 %vm130_vm3, %v2757_v41  ;;  %7143 = vmatmul.mubr.msk.bf16.vlgmr.msra.gmra.mxu1 %vm130_vm3, %v2757_v41 }
 0x490   :  { %7105 = vmatpush3.bf16.msra.mxu0 %v7992_v2  ;;  %7106 = vmatprep.mubr.msk.bf16.mxu0 %vm7934_vm1, %v7933_v0 }
 0x491   :  { %7118 = vmatprep.subr.bf16.mxu0 %v7933_v0  ;;  %7153 = vmatpush3.bf16.msra.mxu1 %v8639_v24 }
 0x492   :  { %7154 = vmatprep.subr.bf16.mxu1 %v7933_v0  ;;  %7156 = vmatprep.mubr.msk.bf16.mxu1 %vm7934_vm1, %v7933_v0 }
 0x495   :  { %7155 = vmatpush3.bf16.msra.mxu1 %v8648_v29 }
 0x496   :  { %7168 = vmatprep.subr.bf16.mxu1 %v7933_v0 }
 0x497   :  { %7107 = vmatmul.mubr.msk.bf16.vlgmr.msra.gmra.mxu0 %vm174_vm2, %v3115_v26 }
 0x498   :  { %7119 = vmatpush3.bf16.msra.mxu0 %v8036_v10  ;;  %7120 = vmatprep.mubr.msk.bf16.mxu0 %vm7934_vm1, %v7933_v0 }
 0x499   :  { %7132 = vmatprep.subr.bf16.mxu0 %v7933_v0 }
 0x49f   :  { %7121 = vmatmul.mubr.msk.bf16.vlgmr.msra.gmra.mxu0 %vm174_vm2, %v3115_v26 }
 0x4a0   :  { %7133 = vmatpush3.bf16.msra.mxu0 %v8064_v15  ;;  %7134 = vmatprep.mubr.msk.bf16.mxu0 %vm7934_vm1, %v7933_v0 }
 0x4a1   :  { %7146 = vmatprep.subr.bf16.mxu0 %v7933_v0 }
 0x4a7   :  { %7135 = vmatmul.mubr.msk.bf16.vlgmr.msra.gmra.mxu0 %vm174_vm2, %v3115_v26 }
 0x4a8   :  { %7147 = vmatpush3.bf16.msra.mxu0 %v8092_v19  ;;  %7148 = vmatprep.mubr.msk.bf16.mxu0 %vm7934_vm1, %v7933_v0 }
 0x4a9   :  { %7160 = vmatprep.subr.bf16.mxu0 %v7933_v0 }
 0x4af   :  { %7149 = vmatmul.mubr.msk.bf16.vlgmr.msra.gmra.mxu0 %vm174_vm2, %v3115_v26 }
 0x4b0   :  { %7161 = vmatpush3.bf16.msra.mxu0 %v8671_v49  ;;  %7164 = vmatprep.mubr.msk.bf16.mxu0 %vm7934_vm1, %v7933_v0 }
 0x4b1   :  { %7162 = vmatprep.subr.bf16.mxu0 %v7933_v0 }
 0x4b4   :  { %7163 = vmatpush3.bf16.msra.mxu0 %v8680_v3 }
 0x4b5   :  { %7176 = vmatprep.subr.bf16.mxu0 %v7933_v0 }
 0x517   :  { %v2796_v4 = vpop.f32.mrf.mxu1 }
 0x519   :  { %v7038_v20 = vpop.f32.mrf.mxu1 }
 0x51b   :  { %v2799_v27 = vpop.f32.mrf.mxu1 }
 0x51d   :  { %v7039_v61 = vpop.f32.mrf.mxu1 }
 0x51f   :  { %v2886_v5 = vpop.f32.mrf.mxu1 }
 0x521   :  { %v7054_v36 = vpop.f32.mrf.mxu1 }
 0x522   :  { %v8866_v36 = vld [vmem:[%s9489_s6 + $0x8] sm:$0xff] }
 0x523   :  { %v2889_v31 = vpop.f32.mrf.mxu1 }
 0x525   :  { %v7055_v9 = vpop.f32.mrf.mxu1 }
 0x527   :  { %v2973_v42 = vpop.f32.mrf.mxu1 }
 0x529   :  { %v7070_v34 = vpop.f32.mrf.mxu1 }
 0x52b   :  { %v2976_v46 = vpop.f32.mrf.mxu1 }
 0x52d   :  { %v7071_v28 = vpop.f32.mrf.mxu1 }
 0x52f   :  { %v3055_v51 = vpop.f32.mrf.mxu1 }
 0x531   :  { %v7086_v22 = vpop.f32.mrf.mxu1 }
 0x533   :  { %v3058_v39 = vpop.f32.mrf.mxu1 }
 0x535   :  { %v7087_v59 = vpop.f32.mrf.mxu1 }
 0x537   :  { %v2839_v25 = vpop.f32.mrf.mxu0  ;;  %v3150_v33 = vpop.f32.mrf.mxu1 }
 0x538   :  { %v2840_v7 = vadd.f32 %v2839_v25, %v2796_v4 }
 0x539   :  { %v7046_v38 = vpop.f32.mrf.mxu0  ;;  %v7102_v40 = vpop.f32.mrf.mxu1 }
 0x53a   :  { %v2845_v14 = vadd.f32 %v8860_v45, %v2840_v7 }
 0x53b   :  { %v2842_v17 = vpop.f32.mrf.mxu0  ;;  %v3153_v21 = vpop.f32.mrf.mxu1 }
 0x53c   :  { %v6157_v37 = vmul.f32 -1.442695, %v2845_v14 }
 0x53d   :  { %v7047_v41 = vpop.f32.mrf.mxu0  ;;  %v7103_v52 = vpop.f32.mrf.mxu1 }
 0x53e   :  { %7725 = vpow2.f32 %v6157_v37 }
 0x53f   :  { %v2926_v26 = vpop.f32.mrf.mxu0  ;;  %v3240_v20 = vpop.f32.mrf.mxu1 }
 0x540   :  { %v2927_v27 = vadd.f32 %v2926_v26, %v2886_v5 }
 0x541   :  { %v7062_v61 = vpop.f32.mrf.mxu0  ;;  %v7116_v4 = vpop.f32.mrf.mxu1 }
 0x542   :  { %v2932_v31 = vadd.f32 %v8866_v36, %v2927_v27  ;;  %v8872_v27 = vld [vmem:[%s9489_s6 + $0x10] sm:$0xff] }
 0x543   :  { %v2929_v9 = vpop.f32.mrf.mxu0  ;;  %v3243_v34 = vpop.f32.mrf.mxu1 }
 0x544   :  { %v6160_v46 = vmul.f32 -1.442695, %v2932_v31  ;;  %v8878_v9 = vld [vmem:[%s9489_s6 + $0x18] sm:$0xff] }
 0x545   :  { %v7063_v28 = vpop.f32.mrf.mxu0  ;;  %v7117_v22 = vpop.f32.mrf.mxu1 }
 0x546   :  { %7727 = vpow2.f32 %v6160_v46 }
 0x547   :  { %v3013_v39 = vpop.f32.mrf.mxu0  ;;  %v3327_v59 = vpop.f32.mrf.mxu1 }
 0x548   :  { %v3014_v14 = vadd.f32 %v3013_v39, %v2973_v42 }
 0x549   :  { %v7078_v25 = vpop.f32.mrf.mxu0  ;;  %v7130_v7 = vpop.f32.mrf.mxu1 }
 0x54a   :  { %v3019_v61 = vadd.f32 %v8872_v27, %v3014_v14 }
 0x54b   :  { %v3016_v5 = vpop.f32.mrf.mxu0  ;;  %v3330_v38 = vpop.f32.mrf.mxu1 }
 0x54c   :  { %v7726_v40 = vpop.eup %7725 }
 0x54d   :  { %v7079_v17 = vpop.f32.mrf.mxu0  ;;  %v7131_v21 = vpop.f32.mrf.mxu1  ;;  %v2849_v52 = vadd.f32 1.0, %v7726_v40 }
 0x54f   :  { %v3095_v37 = vpop.f32.mrf.mxu0  ;;  %v3409_v41 = vpop.f32.mrf.mxu1  ;;  %7729 = vrcp.f32 %v2849_v52 }
 0x550   :  { %v3096_v26 = vadd.f32 %v3095_v37, %v3055_v51  ;;  %7731 = vtanh.f32 %v3019_v61 }
 0x551   :  { %v7094_v4 = vpop.f32.mrf.mxu0  ;;  %v7144_v31 = vpop.f32.mrf.mxu1 }
 0x552   :  { %v3101_v42 = vadd.f32 %v8878_v9, %v3096_v26 }
 0x553   :  { %v7728_v34 = vpop.eup %7727  ;;  %v3098_v46 = vpop.f32.mrf.mxu0 }
 0x554   :  { %v3412_v28 = vpop.f32.mrf.mxu1  ;;  %v2936_v51 = vadd.f32 1.0, %v7728_v34  ;;  %v6165_v22 = vmul.f32 -1.442695, %v3101_v42 }
 0x555   :  { %v7095_v39 = vpop.f32.mrf.mxu0 }
 0x556   :  { %v7145_v25 = vpop.f32.mrf.mxu1  ;;  %7733 = vrcp.f32 %v2936_v51 }
 0x557   :  { %7735 = vpow2.f32 %v6165_v22  ;;  %v3193_v7 = vpop.f32.mrf.mxu0 }
 0x558   :  { %v3194_v5 = vadd.f32 %v3193_v7, %v3150_v33 }
 0x559   :  { %v7108_v38 = vpop.f32.mrf.mxu0 }
 0x55a   :  { %v3199_v40 = vadd.f32 %v8691_v50, %v3194_v5 }
 0x55b   :  { %v3196_v14 = vpop.f32.mrf.mxu0 }
 0x55c   :  { %v6169_v17 = vmul.f32 -1.442695, %v3199_v40  ;;  %v7730_v4 = vpop.eup %7729 }
 0x55d   :  { %v7109_v21 = vpop.f32.mrf.mxu0  ;;  %v7732_v31 = vpop.eup %7731 }
 0x55e   :  { %7737 = vpow2.f32 %v6169_v17  ;;  %v3109_v33 = vmul.f32 %v7732_v31, %v7730_v4 }
 0x55f   :  { %v3280_v37 = vpop.f32.mrf.mxu0 }
 0x560   :  { %v3281_v26 = vadd.f32 %v3280_v37, %v3240_v20 }
 0x561   :  { %v7122_v52 = vpop.f32.mrf.mxu0 }
 0x562   :  { %v3286_v61 = vadd.f32 %v8697_v48, %v3281_v26 }
 0x563   :  { %v7734_v42 = vpop.eup %7733  ;;  %v3283_v34 = vpop.f32.mrf.mxu0 }
 0x564   :  { %v7736_v46 = vpop.eup %7735  ;;  %v3108_v28 = vmul.f32 %v7734_v42, %v8701_v11  ;;  %v6172_v51 = vmul.f32 -1.442695, %v3286_v61 }
 0x565   :  { %v3105_v22 = vadd.f32 1.0, %v7736_v46  ;;  %v7123_v39 = vpop.f32.mrf.mxu0 }
 0x566   :  { %v8884_v25 = vadd.f32 %v3109_v33, %v3108_v28  ;;  %7739 = vpow2.f32 %v6172_v51 }
 0x567   :  { %7741 = vrcp.f32 %v3105_v22  ;;  %v3367_v7 = vpop.f32.mrf.mxu0 }
 0x568   :  { %7743 = vtanh.f32 %v8884_v25  ;;  %v3368_v40 = vadd.f32 %v3367_v7, %v3327_v59 }
 0x569   :  { %v7136_v20 = vpop.f32.mrf.mxu0 }
 0x56a   :  { %v3373_v11 = vadd.f32 %v8707_v6, %v3368_v40 }
 0x56b   :  { %v3370_v5 = vpop.f32.mrf.mxu0  ;;  %v7738_v38 = vpop.eup %7737 }
 0x56c   :  { %v3203_v21 = vadd.f32 1.0, %v7738_v38 }
 0x56d   :  { %v7137_v14 = vpop.f32.mrf.mxu0 }
 0x56e   :  { %7745 = vrcp.f32 %v3203_v21 }
 0x56f   :  { %v3449_v17 = vpop.f32.mrf.mxu0  ;;  %7747 = vtanh.f32 %v3373_v11 }
 0x570   :  { %v3450_v37 = vadd.f32 %v3449_v17, %v3409_v41 }
 0x571   :  { %v7150_v26 = vpop.f32.mrf.mxu0 }
 0x572   :  { %v3455_v4 = vadd.f32 %v8713_v18, %v3450_v37 }
 0x573   :  { %v7740_v52 = vpop.eup %7739  ;;  %v3452_v31 = vpop.f32.mrf.mxu0 }
 0x574   :  { %v7742_v61 = vpop.eup %7741  ;;  %v3290_v42 = vadd.f32 1.0, %v7740_v52  ;;  %v6177_v34 = vmul.f32 -1.442695, %v3455_v4 }
 0x575   :  { %v7744_v46 = vpop.eup %7743  ;;  %v7151_v28 = vpop.f32.mrf.mxu0 }
 0x576   :  { %7749 = vrcp.f32 %v3290_v42  ;;  %v3112_v59 = vmul.f32 %v7744_v46, %v7742_v61 }
 0x577   :  { %7751 = vpow2.f32 %v6177_v34 }
 0x578   :  { %v3468_v33 = vpack.c.bf16 %v3112_v59, %v3112_v59 }
 0x57a   :  { %7157 = vmatmul.mubr.msk.bf16.vlgmr.msra.gmra.mxu1 %vm130_vm3, %v3468_v33 }
 0x57b   :  { %7169 = vmatpush3.bf16.msra.mxu1 %v8487_v63  ;;  %7172 = vmatprep.mubr.msk.bf16.mxu1 %vm7934_vm1, %v7933_v0  ;;  %v7746_v41 = vpop.eup %7745 }
 0x57c   :  { %7170 = vmatprep.subr.bf16.mxu1 %v7933_v0  ;;  %v7748_v51 = vpop.eup %7747 }
 0x57d   :  { %v3463_v7 = vmul.f32 %v7748_v51, %v7746_v41 }
 0x57f   :  { %7171 = vmatpush3.bf16.msra.mxu1 %v8496_v13 }
 0x580   :  { %7184 = vmatprep.subr.bf16.mxu1 %v7933_v0 }
 0x582   :  { %7173 = vmatmul.mubr.msk.bf16.vlgmr.msra.gmra.mxu1 %vm130_vm3, %v3468_v33 }
 0x583   :  { %v7750_v22 = vpop.eup %7749  ;;  %7185 = vmatpush3.bf16.msra.mxu1 %v8504_v62  ;;  %7188 = vmatprep.mubr.msk.bf16.mxu1 %vm7934_vm1, %v7933_v0 }
 0x584   :  { %v7752_v63 = vpop.eup %7751  ;;  %v3462_v39 = vmul.f32 %v7750_v22, %v8729_v16  ;;  %7186 = vmatprep.subr.bf16.mxu1 %v7933_v0 }
 0x585   :  { %v3459_v20 = vadd.f32 1.0, %v7752_v63 }
 0x586   :  { %v8902_v13 = vadd.f32 %v3463_v7, %v3462_v39 }
 0x587   :  { %7753 = vrcp.f32 %v3459_v20  ;;  %7187 = vmatpush3.bf16.msra.mxu1 %v8516_v30 }
 0x588   :  { %7755 = vtanh.f32 %v8902_v13  ;;  %7200 = vmatprep.subr.bf16.mxu1 %v7933_v0 }
 0x58a   :  { %7189 = vmatmul.mubr.msk.bf16.vlgmr.msra.gmra.mxu1 %vm130_vm3, %v3468_v33 }
 0x58b   :  { %7201 = vmatpush3.bf16.msra.mxu1 %v8525_v23  ;;  %7204 = vmatprep.mubr.msk.bf16.mxu1 %vm7934_vm1, %v7933_v0 }
 0x58c   :  { %7202 = vmatprep.subr.bf16.mxu1 %v7933_v0 }
 0x58f   :  { %7203 = vmatpush3.bf16.msra.mxu1 %v8534_v32  ;;  %v6189_v32 = vld [vmem:[%s9485_s0 + $0x28] sm:$0xff] }
 0x590   :  { %7216 = vmatprep.subr.bf16.mxu1 %v7933_v0 }
 0x592   :  { %7205 = vmatmul.mubr.msk.bf16.vlgmr.msra.gmra.mxu1 %vm130_vm3, %v3468_v33 }
 0x593   :  { %7217 = vmatpush3.bf16.msra.mxu1 %v8542_v54  ;;  %7220 = vmatprep.mubr.msk.bf16.mxu1 %vm7934_vm1, %v7933_v0  ;;  %v3825_v54 = vpack.c.bf16 %v6189_v32, %v6189_v32 }
 0x594   :  { %v7754_v62 = vpop.eup %7753  ;;  %7218 = vmatprep.subr.bf16.mxu1 %v7933_v0 }
 0x595   :  { %v7756_v30 = vpop.eup %7755 }
 0x596   :  { %v3466_v23 = vmul.f32 %v7756_v30, %v7754_v62 }
 0x597   :  { %7219 = vmatpush3.bf16.msra.mxu1 %v8551_v35 }
 0x598   :  { %v3467_v16 = vpack.c.bf16 %v3466_v23, %v3466_v23  ;;  %7230 = vmatprep.subr.bf16.mxu1 %v7933_v0 }
 0x59a   :  { %7165 = vmatmul.mubr.msk.bf16.vlgmr.msra.gmra.mxu0 %vm130_vm3, %v3467_v16  ;;  %7221 = vmatmul.mubr.msk.bf16.vlgmr.msra.gmra.mxu1 %vm130_vm3, %v3467_v16 }
 0x59b   :  { %7177 = vmatpush3.bf16.msra.mxu0 %v8753_v43  ;;  %7231 = vmatpush3.bf16.msra.mxu1 %v8561_v1 }
 0x59c   :  { %7178 = vmatprep.subr.bf16.mxu0 %v7933_v0  ;;  %7232 = vmatprep.subr.bf16.mxu1 %v7933_v0 }
 0x59d   :  { %7180 = vmatprep.mubr.msk.bf16.mxu0 %vm7934_vm1, %v7933_v0  ;;  %7234 = vmatprep.mubr.msk.bf16.mxu1 %vm7934_vm1, %v7933_v0 }
 0x59f   :  { %7179 = vmatpush3.bf16.msra.mxu0 %v8766_v12  ;;  %7233 = vmatpush3.bf16.msra.mxu1 %v8574_v53 }
 0x5a0   :  { %7192 = vmatprep.subr.bf16.mxu0 %v7933_v0  ;;  %7244 = vmatprep.subr.bf16.mxu1 %v7933_v0 }
 0x5a2   :  { %7181 = vmatmul.mubr.msk.bf16.vlgmr.msra.gmra.mxu0 %vm130_vm3, %v3467_v16  ;;  %7235 = vmatmul.mubr.msk.bf16.vlgmr.msra.gmra.mxu1 %vm130_vm3, %v3467_v16 }
 0x5a3   :  { %7193 = vmatpush3.bf16.msra.mxu0 %v8777_v44  ;;  %7245 = vmatpush3.bf16.msra.mxu1 %v8585_v55 }
 0x5a4   :  { %7194 = vmatprep.subr.bf16.mxu0 %v7933_v0  ;;  %7246 = vmatprep.subr.bf16.mxu1 %v7933_v0 }
 0x5a5   :  { %7196 = vmatprep.mubr.msk.bf16.mxu0 %vm7934_vm1, %v7933_v0  ;;  %7248 = vmatprep.mubr.msk.bf16.mxu1 %vm7934_vm1, %v7933_v0 }
 0x5a7   :  { %7195 = vmatpush3.bf16.msra.mxu0 %v8790_v47  ;;  %7247 = vmatpush3.bf16.msra.mxu1 %v8598_v56 }
 0x5a8   :  { %7208 = vmatprep.subr.bf16.mxu0 %v7933_v0  ;;  %7258 = vmatprep.subr.bf16.mxu1 %v7933_v0 }
 0x5aa   :  { %7197 = vmatmul.mubr.msk.bf16.vlgmr.msra.gmra.mxu0 %vm130_vm3, %v3467_v16  ;;  %7249 = vmatmul.mubr.msk.bf16.vlgmr.msra.gmra.mxu1 %vm130_vm3, %v3467_v16 }
 0x5ab   :  { %7209 = vmatpush3.bf16.msra.mxu0 %v8801_v60  ;;  %7259 = vmatpush3.bf16.msra.mxu1 %v8609_v57 }
 0x5ac   :  { %7210 = vmatprep.subr.bf16.mxu0 %v7933_v0  ;;  %7260 = vmatprep.subr.bf16.mxu1 %v7933_v0 }
 0x5ad   :  { %7212 = vmatprep.mubr.msk.bf16.mxu0 %vm7934_vm1, %v7933_v0  ;;  %7262 = vmatprep.mubr.msk.bf16.mxu1 %vm7934_vm1, %v7933_v0 }
 0x5af   :  { %7211 = vmatpush3.bf16.msra.mxu0 %v8814_v8  ;;  %7261 = vmatpush3.bf16.msra.mxu1 %v8622_v58 }
 0x5b0   :  { %7224 = vmatprep.subr.bf16.mxu0 %v7933_v0  ;;  %7272 = vmatprep.subr.bf16.mxu1 %v7933_v0 }
 0x5b2   :  { %7213 = vmatmul.mubr.msk.bf16.vlgmr.msra.gmra.mxu0 %vm130_vm3, %v3467_v16  ;;  %7263 = vmatmul.mubr.msk.bf16.vlgmr.msra.gmra.mxu1 %vm130_vm3, %v3467_v16 }
 0x5b3   :  { %7225 = vmatpush3.bf16.msra.mxu0 %v7992_v2  ;;  %7226 = vmatprep.mubr.msk.bf16.mxu0 %vm7934_vm1, %v7933_v0 }
 0x5b4   :  { %7238 = vmatprep.subr.bf16.mxu0 %v7933_v0  ;;  %7273 = vmatpush3.bf16.msra.mxu1 %v8639_v24 }
 0x5b5   :  { %7274 = vmatprep.subr.bf16.mxu1 %v7933_v0  ;;  %7276 = vmatprep.mubr.msk.bf16.mxu1 %vm7934_vm1, %v7933_v0 }
 0x5b8   :  { %7275 = vmatpush3.bf16.msra.mxu1 %v8648_v29 }
 0x5b9   :  { %7288 = vmatprep.subr.bf16.mxu1 %v7933_v0 }
 0x5ba   :  { %7227 = vmatmul.mubr.msk.bf16.vlgmr.msra.gmra.mxu0 %vm174_vm2, %v3825_v54 }
 0x5bb   :  { %7239 = vmatpush3.bf16.msra.mxu0 %v8036_v10  ;;  %7240 = vmatprep.mubr.msk.bf16.mxu0 %vm7934_vm1, %v7933_v0 }
 0x5bc   :  { %7252 = vmatprep.subr.bf16.mxu0 %v7933_v0 }
 0x5c2   :  { %7241 = vmatmul.mubr.msk.bf16.vlgmr.msra.gmra.mxu0 %vm174_vm2, %v3825_v54 }
 0x5c3   :  { %7253 = vmatpush3.bf16.msra.mxu0 %v8064_v15  ;;  %7254 = vmatprep.mubr.msk.bf16.mxu0 %vm7934_vm1, %v7933_v0 }
 0x5c4   :  { %7266 = vmatprep.subr.bf16.mxu0 %v7933_v0 }
 0x5ca   :  { %7255 = vmatmul.mubr.msk.bf16.vlgmr.msra.gmra.mxu0 %vm174_vm2, %v3825_v54 }
 0x5cb   :  { %7267 = vmatpush3.bf16.msra.mxu0 %v8092_v19  ;;  %7268 = vmatprep.mubr.msk.bf16.mxu0 %vm7934_vm1, %v7933_v0 }
 0x5cc   :  { %7280 = vmatprep.subr.bf16.mxu0 %v7933_v0 }
 0x5d2   :  { %7269 = vmatmul.mubr.msk.bf16.vlgmr.msra.gmra.mxu0 %vm174_vm2, %v3825_v54 }
 0x5d3   :  { %7281 = vmatpush3.bf16.msra.mxu0 %v8671_v49  ;;  %7284 = vmatprep.mubr.msk.bf16.mxu0 %vm7934_vm1, %v7933_v0 }
 0x5d4   :  { %7282 = vmatprep.subr.bf16.mxu0 %v7933_v0 }
 0x5d7   :  { %7283 = vmatpush3.bf16.msra.mxu0 %v8680_v3 }
 0x5d8   :  { %7296 = vmatprep.subr.bf16.mxu0 %v7933_v0 }
 0x63a   :  { %v3506_v35 = vpop.f32.mrf.mxu1 }
 0x63c   :  { %v7158_v1 = vpop.f32.mrf.mxu1 }
 0x63e   :  { %v3509_v53 = vpop.f32.mrf.mxu1 }
 0x640   :  { %v7159_v55 = vpop.f32.mrf.mxu1 }
 0x642   :  { %v3596_v56 = vpop.f32.mrf.mxu1 }
 0x644   :  { %v7174_v57 = vpop.f32.mrf.mxu1 }
 0x646   :  { %v3599_v58 = vpop.f32.mrf.mxu1 }
 0x648   :  { %v7175_v24 = vpop.f32.mrf.mxu1 }
 0x64a   :  { %v3683_v29 = vpop.f32.mrf.mxu1 }
 0x64c   :  { %v7190_v5 = vpop.f32.mrf.mxu1 }
 0x64e   :  { %v3686_v49 = vpop.f32.mrf.mxu1 }
 0x650   :  { %v7191_v38 = vpop.f32.mrf.mxu1 }
 0x652   :  { %v3765_v40 = vpop.f32.mrf.mxu1 }
 0x654   :  { %v7206_v14 = vpop.f32.mrf.mxu1 }
 0x656   :  { %v3768_v17 = vpop.f32.mrf.mxu1 }
 0x658   :  { %v7207_v21 = vpop.f32.mrf.mxu1 }
 0x65a   :  { %v3549_v37 = vpop.f32.mrf.mxu0  ;;  %v3860_v3 = vpop.f32.mrf.mxu1 }
 0x65b   :  { %v3550_v11 = vadd.f32 %v3549_v37, %v3506_v35 }
 0x65c   :  { %v7166_v26 = vpop.f32.mrf.mxu0  ;;  %v7222_v4 = vpop.f32.mrf.mxu1 }
 0x65d   :  { %v3555_v52 = vadd.f32 %v8860_v45, %v3550_v11 }
 0x65e   :  { %v3552_v31 = vpop.f32.mrf.mxu0  ;;  %v3863_v61 = vpop.f32.mrf.mxu1 }
 0x65f   :  { %v6180_v42 = vmul.f32 -1.442695, %v3555_v52 }
 0x660   :  { %v7167_v34 = vpop.f32.mrf.mxu0  ;;  %v7223_v46 = vpop.f32.mrf.mxu1 }
 0x661   :  { %7757 = vpow2.f32 %v6180_v42 }
 0x662   :  { %v3636_v28 = vpop.f32.mrf.mxu0  ;;  %v3950_v59 = vpop.f32.mrf.mxu1 }
 0x663   :  { %v3637_v33 = vadd.f32 %v3636_v28, %v3596_v56 }
 0x664   :  { %v7182_v41 = vpop.f32.mrf.mxu0  ;;  %v7236_v51 = vpop.f32.mrf.mxu1 }
 0x665   :  { %v3642_v22 = vadd.f32 %v8866_v36, %v3637_v33 }
 0x666   :  { %v3639_v63 = vpop.f32.mrf.mxu0  ;;  %v3953_v39 = vpop.f32.mrf.mxu1 }
 0x667   :  { %v6183_v7 = vmul.f32 -1.442695, %v3642_v22 }
 0x668   :  { %v7183_v20 = vpop.f32.mrf.mxu0  ;;  %v7237_v62 = vpop.f32.mrf.mxu1 }
 0x669   :  { %7759 = vpow2.f32 %v6183_v7 }
 0x66a   :  { %v3723_v30 = vpop.f32.mrf.mxu0  ;;  %v4037_v23 = vpop.f32.mrf.mxu1 }
 0x66b   :  { %v3724_v53 = vadd.f32 %v3723_v30, %v3683_v29 }
 0x66c   :  { %v7198_v16 = vpop.f32.mrf.mxu0  ;;  %v7250_v32 = vpop.f32.mrf.mxu1 }
 0x66d   :  { %v3729_v49 = vadd.f32 %v8872_v27, %v3724_v53 }
 0x66e   :  { %v3726_v54 = vpop.f32.mrf.mxu0  ;;  %v4040_v35 = vpop.f32.mrf.mxu1 }
 0x66f   :  { %v7758_v1 = vpop.eup %7757 }
 0x670   :  { %v7199_v55 = vpop.f32.mrf.mxu0  ;;  %v7251_v56 = vpop.f32.mrf.mxu1  ;;  %v3559_v24 = vadd.f32 1.0, %v7758_v1 }
 0x672   :  { %v3805_v57 = vpop.f32.mrf.mxu0  ;;  %v4119_v58 = vpop.f32.mrf.mxu1  ;;  %7761 = vrcp.f32 %v3559_v24 }
 0x673   :  { %v3806_v5 = vadd.f32 %v3805_v57, %v3765_v40  ;;  %7763 = vtanh.f32 %v3729_v49 }
 0x674   :  { %v7214_v38 = vpop.f32.mrf.mxu0  ;;  %v7264_v14 = vpop.f32.mrf.mxu1 }
 0x675   :  { %v3811_v17 = vadd.f32 %v8878_v9, %v3806_v5 }
 0x676   :  { %v7760_v21 = vpop.eup %7759  ;;  %v3808_v37 = vpop.f32.mrf.mxu0 }
 0x677   :  { %v4122_v11 = vpop.f32.mrf.mxu1  ;;  %v3646_v26 = vadd.f32 1.0, %v7760_v21  ;;  %v6188_v4 = vmul.f32 -1.442695, %v3811_v17 }
 0x678   :  { %v7215_v29 = vpop.f32.mrf.mxu0 }
 0x679   :  { %v7265_v52 = vpop.f32.mrf.mxu1  ;;  %7765 = vrcp.f32 %v3646_v26 }
 0x67a   :  { %7767 = vpow2.f32 %v6188_v4  ;;  %v3903_v31 = vpop.f32.mrf.mxu0 }
 0x67b   :  { %v3904_v61 = vadd.f32 %v3903_v31, %v3860_v3  ;;  %v9033_v31 = vld [vmem:[%s9486_s5 + $0x28] sm:$0xff]  }
 0x67c   :  { %v7228_v40 = vpop.f32.mrf.mxu0 }
 0x67d   :  { %v3909_v42 = vadd.f32 %v8691_v50, %v3904_v61 }
 0x67e   :  { %v3906_v34 = vpop.f32.mrf.mxu0 }
 0x67f   :  { %v6192_v46 = vmul.f32 -1.442695, %v3909_v42  ;;  %v7762_v51 = vpop.eup %7761 }
 0x680   :  { %v7229_v28 = vpop.f32.mrf.mxu0  ;;  %v7764_v63 = vpop.eup %7763 }
 0x681   :  { %7769 = vpow2.f32 %v6192_v46  ;;  %v3819_v3 = vmul.f32 %v7764_v63, %v7762_v51  ;;  %v9045_v28 = vld [vmem:[%s9486_s5 + $0x20] sm:$0xff]  }
 0x682   :  { %v3990_v33 = vpop.f32.mrf.mxu0 }
 0x683   :  { %v3991_v41 = vadd.f32 %v3990_v33, %v3950_v59  ;;  %v9063_v33 = vld [vmem:[%s9486_s5 + $0x30] sm:$0xff]  }
 0x684   :  { %v7242_v22 = vpop.f32.mrf.mxu0 }
 0x685   :  { %v3996_v39 = vadd.f32 %v8697_v48, %v3991_v41  ;;  %v9071_v41 = vld [vmem:[%s9484_s2 + $0x8] sm:$0xff]  }
 0x686   :  { %v7766_v7 = vpop.eup %7765  ;;  %v3993_v20 = vpop.f32.mrf.mxu0 }
 0x687   :  { %v7768_v62 = vpop.eup %7767  ;;  %v3818_v30 = vmul.f32 %v7766_v7, %v8884_v25  ;;  %v6195_v16 = vmul.f32 -1.442695, %v3996_v39  ;;  %v9080_v39 = vld [vmem:[%s9484_s2] sm:$0xff]   ;;  %v9090_v20 = vld [vmem:[%s9484_s2 + $0x18] sm:$0xff]  }
 0x688   :  { %v3815_v32 = vadd.f32 1.0, %v7768_v62  ;;  %v7243_v50 = vpop.f32.mrf.mxu0  ;;  %v9168_v62 = vld [vmem:[%s9486_s5 + $0x8] sm:$0xff]  }
 0x689   :  { %v9007_v54 = vadd.f32 %v3819_v3, %v3818_v30  ;;  %7771 = vpow2.f32 %v6195_v16  ;;  %v9177_v3 = vld [vmem:[%s9486_s5] sm:$0xff]   ;;  %v9200_v16 = vld [vmem:[%s9487_s4 + $0x8] sm:$0xff]  }
 0x68a   :  { %7773 = vrcp.f32 %v3815_v32  ;;  %v4077_v35 = vpop.f32.mrf.mxu0  ;;  %v9209_v32 = vld [vmem:[%s9487_s4] sm:$0xff]  }
 0x68b   :  { %7775 = vtanh.f32 %v9007_v54  ;;  %v4078_v48 = vadd.f32 %v4077_v35, %v4037_v23 }
 0x68c   :  { %v7256_v59 = vpop.f32.mrf.mxu0 }
 0x68d   :  { %v4083_v25 = vadd.f32 %v8707_v6, %v4078_v48  ;;  %v9016_v6 = vld [vmem:[%s9486_s5 + $0x18] sm:$0xff]  }
 0x68e   :  { %v4080_v1 = vpop.f32.mrf.mxu0  ;;  %v7770_v53 = vpop.eup %7769 }
 0x68f   :  { %v3913_v57 = vadd.f32 1.0, %v7770_v53 }
 0x690   :  { %v7257_v55 = vpop.f32.mrf.mxu0 }
 0x691   :  { %7777 = vrcp.f32 %v3913_v57 }
 0x692   :  { %v4159_v56 = vpop.f32.mrf.mxu0  ;;  %7779 = vtanh.f32 %v4083_v25 }
 0x693   :  { %v4160_v24 = vadd.f32 %v4159_v56, %v4119_v58 }
 0x694   :  { %v7270_v5 = vpop.f32.mrf.mxu0 }
 0x695   :  { %v4165_v49 = vadd.f32 %v8713_v18, %v4160_v24  ;;  %v9025_v18 = vld [vmem:[%s9486_s5 + $0x10] sm:$0xff]  }
 0x696   :  { %v7772_v38 = vpop.eup %7771  ;;  %v4162_v14 = vpop.f32.mrf.mxu0 }
 0x697   :  { %v7774_v17 = vpop.eup %7773  ;;  %v4000_v21 = vadd.f32 1.0, %v7772_v38  ;;  %v6200_v37 = vmul.f32 -1.442695, %v4165_v49 }
 0x698   :  { %v7776_v11 = vpop.eup %7775  ;;  %v7271_v26 = vpop.f32.mrf.mxu0 }
 0x699   :  { %7781 = vrcp.f32 %v4000_v21  ;;  %v3822_v23 = vmul.f32 %v7776_v11, %v7774_v17 }
 0x69a   :  { %7783 = vpow2.f32 %v6200_v37 }
 0x69b   :  { %v4178_v4 = vpack.c.bf16 %v3822_v23, %v3822_v23 }
 0x69d   :  { %7277 = vmatmul.mubr.msk.bf16.vlgmr.msra.gmra.mxu1 %vm130_vm3, %v4178_v4 }
 0x69e   :  { %7289 = vmatpush3.bf16.msra.mxu1 %v9016_v6  ;;  %7292 = vmatprep.mubr.msk.bf16.mxu1 %vm7934_vm1, %v7933_v0  ;;  %v7778_v58 = vpop.eup %7777 }
 0x69f   :  { %7290 = vmatprep.subr.bf16.mxu1 %v7933_v0  ;;  %v7780_v29 = vpop.eup %7779 }
 0x6a0   :  { %v4173_v42 = vmul.f32 %v7780_v29, %v7778_v58 }
 0x6a2   :  { %7291 = vmatpush3.bf16.msra.mxu1 %v9025_v18 }
 0x6a3   :  { %7304 = vmatprep.subr.bf16.mxu1 %v7933_v0 }
 0x6a5   :  { %7293 = vmatmul.mubr.msk.bf16.vlgmr.msra.gmra.mxu1 %vm130_vm3, %v4178_v4 }
 0x6a6   :  { %v7782_v52 = vpop.eup %7781  ;;  %7305 = vmatpush3.bf16.msra.mxu1 %v9033_v31  ;;  %7308 = vmatprep.mubr.msk.bf16.mxu1 %vm7934_vm1, %v7933_v0 }
 0x6a7   :  { %v7784_v61 = vpop.eup %7783  ;;  %v4172_v40 = vmul.f32 %v7782_v52, %v8902_v13  ;;  %7306 = vmatprep.subr.bf16.mxu1 %v7933_v0  ;;  %v9054_v13 = vld [vmem:[%s9486_s5 + $0x38] sm:$0xff]  }
 0x6a8   :  { %v4169_v34 = vadd.f32 1.0, %v7784_v61 }
 0x6a9   :  { %v9040_v46 = vadd.f32 %v4173_v42, %v4172_v40 }
 0x6aa   :  { %7785 = vrcp.f32 %v4169_v34  ;;  %7307 = vmatpush3.bf16.msra.mxu1 %v9045_v28 }
 0x6ab   :  { %7787 = vtanh.f32 %v9040_v46  ;;  %7320 = vmatprep.subr.bf16.mxu1 %v7933_v0 }
 0x6ad   :  { %7309 = vmatmul.mubr.msk.bf16.vlgmr.msra.gmra.mxu1 %vm130_vm3, %v4178_v4 }
 0x6ae   :  { %7321 = vmatpush3.bf16.msra.mxu1 %v9054_v13  ;;  %7324 = vmatprep.mubr.msk.bf16.mxu1 %vm7934_vm1, %v7933_v0 }
 0x6af   :  { %7322 = vmatprep.subr.bf16.mxu1 %v7933_v0 }
 0x6b2   :  { %7323 = vmatpush3.bf16.msra.mxu1 %v9063_v33 }
 0x6b3   :  { %7336 = vmatprep.subr.bf16.mxu1 %v7933_v0 }
 0x6b5   :  { %7325 = vmatmul.mubr.msk.bf16.vlgmr.msra.gmra.mxu1 %vm130_vm3, %v4178_v4 }
 0x6b6   :  { %7337 = vmatpush3.bf16.msra.mxu1 %v9071_v41  ;;  %7340 = vmatprep.mubr.msk.bf16.mxu1 %vm7934_vm1, %v7933_v0 }
 0x6b7   :  { %v7786_v51 = vpop.eup %7785  ;;  %7338 = vmatprep.subr.bf16.mxu1 %v7933_v0 }
 0x6b8   :  { %v7788_v22 = vpop.eup %7787 }
 0x6b9   :  { %v4176_v63 = vmul.f32 %v7788_v22, %v7786_v51 }
 0x6ba   :  { %7339 = vmatpush3.bf16.msra.mxu1 %v9080_v39 }
 0x6bb   :  { %v4177_v7 = vpack.c.bf16 %v4176_v63, %v4176_v63  ;;  %7350 = vmatprep.subr.bf16.mxu1 %v7933_v0 }
 0x6bd   :  { %7285 = vmatmul.mubr.msk.bf16.vlgmr.msra.gmra.mxu0 %vm130_vm3, %v4177_v7  ;;  %7341 = vmatmul.mubr.msk.bf16.vlgmr.msra.gmra.mxu1 %vm130_vm3, %v4177_v7 }
 0x6be   :  { %7297 = vmatpush3.bf16.msra.mxu0 %v8753_v43  ;;  %7351 = vmatpush3.bf16.msra.mxu1 %v9090_v20  ;;  %v9103_v43 = vld [vmem:[%s9484_s2 + $0x10] sm:$0xff]  }
 0x6bf   :  { %7298 = vmatprep.subr.bf16.mxu0 %v7933_v0  ;;  %7352 = vmatprep.subr.bf16.mxu1 %v7933_v0 }
 0x6c0   :  { %7300 = vmatprep.mubr.msk.bf16.mxu0 %vm7934_vm1, %v7933_v0  ;;  %7354 = vmatprep.mubr.msk.bf16.mxu1 %vm7934_vm1, %v7933_v0 }
 0x6c2   :  { %7299 = vmatpush3.bf16.msra.mxu0 %v8766_v12  ;;  %7353 = vmatpush3.bf16.msra.mxu1 %v9103_v43  ;;  %v9114_v12 = vld [vmem:[%s9484_s2 + $0x28] sm:$0xff]  }
 0x6c3   :  { %7312 = vmatprep.subr.bf16.mxu0 %v7933_v0  ;;  %7364 = vmatprep.subr.bf16.mxu1 %v7933_v0 }
 0x6c5   :  { %7301 = vmatmul.mubr.msk.bf16.vlgmr.msra.gmra.mxu0 %vm130_vm3, %v4177_v7  ;;  %7355 = vmatmul.mubr.msk.bf16.vlgmr.msra.gmra.mxu1 %vm130_vm3, %v4177_v7 }
 0x6c6   :  { %7313 = vmatpush3.bf16.msra.mxu0 %v8777_v44  ;;  %7365 = vmatpush3.bf16.msra.mxu1 %v9114_v12  ;;  %v9127_v44 = vld [vmem:[%s9484_s2 + $0x20] sm:$0xff]  }
 0x6c7   :  { %7314 = vmatprep.subr.bf16.mxu0 %v7933_v0  ;;  %7366 = vmatprep.subr.bf16.mxu1 %v7933_v0 }
 0x6c8   :  { %7316 = vmatprep.mubr.msk.bf16.mxu0 %vm7934_vm1, %v7933_v0  ;;  %7368 = vmatprep.mubr.msk.bf16.mxu1 %vm7934_vm1, %v7933_v0 }
 0x6ca   :  { %7315 = vmatpush3.bf16.msra.mxu0 %v8790_v47  ;;  %7367 = vmatpush3.bf16.msra.mxu1 %v9127_v44  ;;  %v9138_v47 = vld [vmem:[%s9484_s2 + $0x38] sm:$0xff]  }
 0x6cb   :  { %7328 = vmatprep.subr.bf16.mxu0 %v7933_v0  ;;  %7378 = vmatprep.subr.bf16.mxu1 %v7933_v0 }
 0x6cd   :  { %7317 = vmatmul.mubr.msk.bf16.vlgmr.msra.gmra.mxu0 %vm130_vm3, %v4177_v7  ;;  %7369 = vmatmul.mubr.msk.bf16.vlgmr.msra.gmra.mxu1 %vm130_vm3, %v4177_v7 }
 0x6ce   :  { %7329 = vmatpush3.bf16.msra.mxu0 %v8801_v60  ;;  %7379 = vmatpush3.bf16.msra.mxu1 %v9138_v47  ;;  %v9151_v60 = vld [vmem:[%s9484_s2 + $0x30] sm:$0xff]  }
 0x6cf   :  { %7330 = vmatprep.subr.bf16.mxu0 %v7933_v0  ;;  %7380 = vmatprep.subr.bf16.mxu1 %v7933_v0 }
 0x6d0   :  { %7332 = vmatprep.mubr.msk.bf16.mxu0 %vm7934_vm1, %v7933_v0  ;;  %7382 = vmatprep.mubr.msk.bf16.mxu1 %vm7934_vm1, %v7933_v0 }
 0x6d2   :  { %7331 = vmatpush3.bf16.msra.mxu0 %v8814_v8  ;;  %7381 = vmatpush3.bf16.msra.mxu1 %v9151_v60  ;;  %v6212_v8 = vld [vmem:[%s9485_s0 + $0x30] sm:$0xff] }
 0x6d3   :  { %7344 = vmatprep.subr.bf16.mxu0 %v7933_v0  ;;  %7392 = vmatprep.subr.bf16.mxu1 %v7933_v0  ;;  %v4535_v30 = vpack.c.bf16 %v6212_v8, %v6212_v8 }
 0x6d5   :  { %7333 = vmatmul.mubr.msk.bf16.vlgmr.msra.gmra.mxu0 %vm130_vm3, %v4177_v7  ;;  %7383 = vmatmul.mubr.msk.bf16.vlgmr.msra.gmra.mxu1 %vm130_vm3, %v4177_v7 }
 0x6d6   :  { %7345 = vmatpush3.bf16.msra.mxu0 %v7992_v2  ;;  %7346 = vmatprep.mubr.msk.bf16.mxu0 %vm7934_vm1, %v7933_v0 }
 0x6d7   :  { %7358 = vmatprep.subr.bf16.mxu0 %v7933_v0  ;;  %7393 = vmatpush3.bf16.msra.mxu1 %v9168_v62 }
 0x6d8   :  { %7394 = vmatprep.subr.bf16.mxu1 %v7933_v0  ;;  %7396 = vmatprep.mubr.msk.bf16.mxu1 %vm7934_vm1, %v7933_v0 }
 0x6db   :  { %7395 = vmatpush3.bf16.msra.mxu1 %v9177_v3 }
 0x6dc   :  { %7408 = vmatprep.subr.bf16.mxu1 %v7933_v0 }
 0x6dd   :  { %7347 = vmatmul.mubr.msk.bf16.vlgmr.msra.gmra.mxu0 %vm174_vm2, %v4535_v30 }
 0x6de   :  { %7359 = vmatpush3.bf16.msra.mxu0 %v8036_v10  ;;  %7360 = vmatprep.mubr.msk.bf16.mxu0 %vm7934_vm1, %v7933_v0 }
 0x6df   :  { %7372 = vmatprep.subr.bf16.mxu0 %v7933_v0 }
 0x6e5   :  { %7361 = vmatmul.mubr.msk.bf16.vlgmr.msra.gmra.mxu0 %vm174_vm2, %v4535_v30 }
 0x6e6   :  { %7373 = vmatpush3.bf16.msra.mxu0 %v8064_v15  ;;  %7374 = vmatprep.mubr.msk.bf16.mxu0 %vm7934_vm1, %v7933_v0 }
 0x6e7   :  { %7386 = vmatprep.subr.bf16.mxu0 %v7933_v0 }
 0x6ed   :  { %7375 = vmatmul.mubr.msk.bf16.vlgmr.msra.gmra.mxu0 %vm174_vm2, %v4535_v30 }
 0x6ee   :  { %7387 = vmatpush3.bf16.msra.mxu0 %v8092_v19  ;;  %7388 = vmatprep.mubr.msk.bf16.mxu0 %vm7934_vm1, %v7933_v0 }
 0x6ef   :  { %7400 = vmatprep.subr.bf16.mxu0 %v7933_v0 }
 0x6f5   :  { %7389 = vmatmul.mubr.msk.bf16.vlgmr.msra.gmra.mxu0 %vm174_vm2, %v4535_v30 }
 0x6f6   :  { %7401 = vmatpush3.bf16.msra.mxu0 %v9200_v16  ;;  %7404 = vmatprep.mubr.msk.bf16.mxu0 %vm7934_vm1, %v7933_v0 }
 0x6f7   :  { %7402 = vmatprep.subr.bf16.mxu0 %v7933_v0 }
 0x6fa   :  { %7403 = vmatpush3.bf16.msra.mxu0 %v9209_v32 }
 0x6fb   :  { %7416 = vmatprep.subr.bf16.mxu0 %v7933_v0 }
 0x75d   :  { %v4216_v50 = vpop.f32.mrf.mxu1 }
 0x75f   :  { %v7278_v35 = vpop.f32.mrf.mxu1 }
 0x761   :  { %v4219_v59 = vpop.f32.mrf.mxu1 }
 0x763   :  { %v7279_v1 = vpop.f32.mrf.mxu1 }
 0x765   :  { %v4306_v53 = vpop.f32.mrf.mxu1 }
 0x767   :  { %v7294_v48 = vpop.f32.mrf.mxu1 }
 0x769   :  { %v4309_v55 = vpop.f32.mrf.mxu1 }
 0x76b   :  { %v7295_v56 = vpop.f32.mrf.mxu1 }
 0x76d   :  { %v4393_v57 = vpop.f32.mrf.mxu1 }
 0x76f   :  { %v7310_v24 = vpop.f32.mrf.mxu1 }
 0x771   :  { %v4396_v25 = vpop.f32.mrf.mxu1 }
 0x773   :  { %v7311_v5 = vpop.f32.mrf.mxu1 }
 0x775   :  { %v4475_v49 = vpop.f32.mrf.mxu1 }
 0x777   :  { %v7326_v38 = vpop.f32.mrf.mxu1 }
 0x779   :  { %v4478_v14 = vpop.f32.mrf.mxu1 }
 0x77b   :  { %v7327_v17 = vpop.f32.mrf.mxu1 }
 0x77d   :  { %v4259_v21 = vpop.f32.mrf.mxu0  ;;  %v4570_v37 = vpop.f32.mrf.mxu1 }
 0x77e   :  { %v4260_v11 = vadd.f32 %v4259_v21, %v4216_v50 }
 0x77f   :  { %v7286_v26 = vpop.f32.mrf.mxu0  ;;  %v7342_v23 = vpop.f32.mrf.mxu1 }
 0x780   :  { %v4265_v4 = vadd.f32 %v8860_v45, %v4260_v11 }
 0x781   :  { %v4262_v58 = vpop.f32.mrf.mxu0  ;;  %v4573_v29 = vpop.f32.mrf.mxu1 }
 0x782   :  { %v6203_v52 = vmul.f32 -1.442695, %v4265_v4 }
 0x783   :  { %v7287_v61 = vpop.f32.mrf.mxu0  ;;  %v7343_v40 = vpop.f32.mrf.mxu1 }
 0x784   :  { %7789 = vpow2.f32 %v6203_v52 }
 0x785   :  { %v4346_v42 = vpop.f32.mrf.mxu0  ;;  %v4660_v34 = vpop.f32.mrf.mxu1 }
 0x786   :  { %v4347_v51 = vadd.f32 %v4346_v42, %v4306_v53 }
 0x787   :  { %v7302_v22 = vpop.f32.mrf.mxu0  ;;  %v7356_v63 = vpop.f32.mrf.mxu1 }
 0x788   :  { %v4352_v7 = vadd.f32 %v8866_v36, %v4347_v51 }
 0x789   :  { %v4349_v8 = vpop.f32.mrf.mxu0  ;;  %v4663_v30 = vpop.f32.mrf.mxu1 }
 0x78a   :  { %v6206_v50 = vmul.f32 -1.442695, %v4352_v7 }
 0x78b   :  { %v7303_v35 = vpop.f32.mrf.mxu0  ;;  %v7357_v59 = vpop.f32.mrf.mxu1 }
 0x78c   :  { %7791 = vpow2.f32 %v6206_v50 }
 0x78d   :  { %v4433_v45 = vpop.f32.mrf.mxu0  ;;  %v4747_v1 = vpop.f32.mrf.mxu1 }
 0x78e   :  { %v4434_v5 = vadd.f32 %v4433_v45, %v4393_v57 }
 0x78f   :  { %v7318_v48 = vpop.f32.mrf.mxu0  ;;  %v7370_v55 = vpop.f32.mrf.mxu1 }
 0x790   :  { %v4439_v11 = vadd.f32 %v8872_v27, %v4434_v5  ;;  %v9220_v27 = vld [vmem:[%s9488_s3] sm:$0xff] }
 0x791   :  { %v4436_v56 = vpop.f32.mrf.mxu0  ;;  %v4750_v24 = vpop.f32.mrf.mxu1 }
 0x792   :  { %v7790_v25 = vpop.eup %7789 }
 0x793   :  { %v7319_v38 = vpop.f32.mrf.mxu0  ;;  %v7371_v53 = vpop.f32.mrf.mxu1  ;;  %v4269_v21 = vadd.f32 1.0, %v7790_v25 }
 0x795   :  { %v4515_v14 = vpop.f32.mrf.mxu0  ;;  %v4829_v17 = vpop.f32.mrf.mxu1  ;;  %7793 = vrcp.f32 %v4269_v21 }
 0x796   :  { %v4516_v36 = vadd.f32 %v4515_v14, %v4475_v49  ;;  %7795 = vtanh.f32 %v4439_v11 }
 0x797   :  { %v7334_v26 = vpop.f32.mrf.mxu0  ;;  %v7384_v23 = vpop.f32.mrf.mxu1 }
 0x798   :  { %v4521_v4 = vadd.f32 %v8878_v9, %v4516_v36 }
 0x799   :  { %v7792_v58 = vpop.eup %7791  ;;  %v4518_v29 = vpop.f32.mrf.mxu0 }
 0x79a   :  { %v4832_v52 = vpop.f32.mrf.mxu1  ;;  %v4356_v61 = vadd.f32 1.0, %v7792_v58  ;;  %v6211_v40 = vmul.f32 -1.442695, %v4521_v4 }
 0x79b   :  { %v7335_v57 = vpop.f32.mrf.mxu0 }
 0x79c   :  { %v7385_v42 = vpop.f32.mrf.mxu1  ;;  %7797 = vrcp.f32 %v4356_v61  ;;  %v9242_v57 = vld [vmem:[%s9488_s3 + $0x18] sm:$0xff] }
 0x79d   :  { %7799 = vpow2.f32 %v6211_v40  ;;  %v4613_v51 = vpop.f32.mrf.mxu0 }
 0x79e   :  { %v4614_v22 = vadd.f32 %v4613_v51, %v4570_v37  ;;  %v9226_v37 = vld [vmem:[%s9488_s3 + $0x8] sm:$0xff] }
 0x79f   :  { %v7348_v49 = vpop.f32.mrf.mxu0 }
 0x7a0   :  { %v4619_v9 = vadd.f32 %v9220_v27, %v4614_v22 }
 0x7a1   :  { %v4616_v63 = vpop.f32.mrf.mxu0 }
 0x7a2   :  { %v6215_v7 = vmul.f32 -1.442695, %v4619_v9  ;;  %v7794_v35 = vpop.eup %7793 }
 0x7a3   :  { %v7349_v8 = vpop.f32.mrf.mxu0  ;;  %v7796_v45 = vpop.eup %7795 }
 0x7a4   :  { %7801 = vpow2.f32 %v6215_v7  ;;  %v4529_v5 = vmul.f32 %v7796_v45, %v7794_v35 }
 0x7a5   :  { %v4700_v30 = vpop.f32.mrf.mxu0 }
 0x7a6   :  { %v4701_v50 = vadd.f32 %v4700_v30, %v4660_v34 }
 0x7a7   :  { %v7362_v59 = vpop.f32.mrf.mxu0 }
 0x7a8   :  { %v4706_v48 = vadd.f32 %v9226_v37, %v4701_v50 }
 0x7a9   :  { %v7798_v55 = vpop.eup %7797  ;;  %v4703_v56 = vpop.f32.mrf.mxu0 }
 0x7aa   :  { %v7800_v24 = vpop.eup %7799  ;;  %v4528_v25 = vmul.f32 %v7798_v55, %v9007_v54  ;;  %v6218_v38 = vmul.f32 -1.442695, %v4706_v48  ;;  %v9236_v54 = vld [vmem:[%s9488_s3 + $0x10] sm:$0xff] }
 0x7ab   :  { %v4525_v53 = vadd.f32 1.0, %v7800_v24  ;;  %v7363_v14 = vpop.f32.mrf.mxu0 }
 0x7ac   :  { %v9230_v34 = vadd.f32 %v4529_v5, %v4528_v25  ;;  %7803 = vpow2.f32 %v6218_v38 }
 0x7ad   :  { %7805 = vrcp.f32 %v4525_v53  ;;  %v4787_v21 = vpop.f32.mrf.mxu0 }
 0x7ae   :  { %7807 = vtanh.f32 %v9230_v34  ;;  %v4788_v23 = vadd.f32 %v4787_v21, %v4747_v1 }
 0x7af   :  { %v7376_v36 = vpop.f32.mrf.mxu0 }
 0x7b0   :  { %v4793_v61 = vadd.f32 %v9236_v54, %v4788_v23 }
 0x7b1   :  { %v4790_v11 = vpop.f32.mrf.mxu0  ;;  %v7802_v26 = vpop.eup %7801 }
 0x7b2   :  { %v4623_v29 = vadd.f32 1.0, %v7802_v26 }
 0x7b3   :  { %v7377_v4 = vpop.f32.mrf.mxu0 }
 0x7b4   :  { %7809 = vrcp.f32 %v4623_v29 }
 0x7b5   :  { %v4869_v58 = vpop.f32.mrf.mxu0  ;;  %7811 = vtanh.f32 %v4793_v61 }
 0x7b6   :  { %v4870_v52 = vadd.f32 %v4869_v58, %v4829_v17 }
 0x7b7   :  { %v7390_v40 = vpop.f32.mrf.mxu0 }
 0x7b8   :  { %v4875_v42 = vadd.f32 %v9242_v57, %v4870_v52  ;;  %v9389_v40 = vld [vmem:[%s9489_s6] sm:$0xff] }
 0x7b9   :  { %v7804_v1 = vpop.eup %7803  ;;  %v4872_v51 = vpop.f32.mrf.mxu0 }
 0x7ba   :  { %v7806_v22 = vpop.eup %7805  ;;  %v4710_v17 = vadd.f32 1.0, %v7804_v1  ;;  %v6223_v49 = vmul.f32 -1.442695, %v4875_v42 }
 0x7bb   :  { %v7808_v9 = vpop.eup %7807  ;;  %v7391_v63 = vpop.f32.mrf.mxu0 }
 0x7bc   :  { %7813 = vrcp.f32 %v4710_v17  ;;  %v4532_v7 = vmul.f32 %v7808_v9, %v7806_v22 }
 0x7bd   :  { %7815 = vpow2.f32 %v6223_v49 }
 0x7be   :  { %v4888_v8 = vpack.c.bf16 %v4532_v7, %v4532_v7 }
 0x7c0   :  { %7397 = vmatmul.mubr.msk.bf16.vlgmr.msra.gmra.mxu1 %vm130_vm3, %v4888_v8 }
 0x7c1   :  { %7409 = vmatpush3.bf16.msra.mxu1 %v9016_v6  ;;  %7412 = vmatprep.mubr.msk.bf16.mxu1 %vm7934_vm1, %v7933_v0  ;;  %v7810_v30 = vpop.eup %7809 }
 0x7c2   :  { %7410 = vmatprep.subr.bf16.mxu1 %v7933_v0  ;;  %v7812_v50 = vpop.eup %7811 }
 0x7c3   :  { %v4883_v48 = vmul.f32 %v7812_v50, %v7810_v30  ;;  %v9395_v50 = vld [vmem:[%s9489_s6 + $0x8] sm:$0xff] }
 0x7c5   :  { %7411 = vmatpush3.bf16.msra.mxu1 %v9025_v18 }
 0x7c6   :  { %7424 = vmatprep.subr.bf16.mxu1 %v7933_v0 }
 0x7c8   :  { %7413 = vmatmul.mubr.msk.bf16.vlgmr.msra.gmra.mxu1 %vm130_vm3, %v4888_v8 }
 0x7c9   :  { %v7814_v35 = vpop.eup %7813  ;;  %7425 = vmatpush3.bf16.msra.mxu1 %v9033_v31  ;;  %7428 = vmatprep.mubr.msk.bf16.mxu1 %vm7934_vm1, %v7933_v0 }
 0x7ca   :  { %v7816_v59 = vpop.eup %7815  ;;  %v4882_v45 = vmul.f32 %v7814_v35, %v9040_v46  ;;  %7426 = vmatprep.subr.bf16.mxu1 %v7933_v0 }
 0x7cb   :  { %v4879_v55 = vadd.f32 1.0, %v7816_v59 }
 0x7cc   :  { %v9258_v56 = vadd.f32 %v4883_v48, %v4882_v45 }
 0x7cd   :  { %7817 = vrcp.f32 %v4879_v55  ;;  %7427 = vmatpush3.bf16.msra.mxu1 %v9045_v28 }
 0x7ce   :  { %7819 = vtanh.f32 %v9258_v56  ;;  %7440 = vmatprep.subr.bf16.mxu1 %v7933_v0 }
 0x7d0   :  { %7429 = vmatmul.mubr.msk.bf16.vlgmr.msra.gmra.mxu1 %vm130_vm3, %v4888_v8 }
 0x7d1   :  { %7441 = vmatpush3.bf16.msra.mxu1 %v9054_v13  ;;  %7444 = vmatprep.mubr.msk.bf16.mxu1 %vm7934_vm1, %v7933_v0 }
 0x7d2   :  { %7442 = vmatprep.subr.bf16.mxu1 %v7933_v0 }
 0x7d5   :  { %7443 = vmatpush3.bf16.msra.mxu1 %v9063_v33 }
 0x7d6   :  { %7456 = vmatprep.subr.bf16.mxu1 %v7933_v0 }
 0x7d8   :  { %7445 = vmatmul.mubr.msk.bf16.vlgmr.msra.gmra.mxu1 %vm130_vm3, %v4888_v8 }
 0x7d9   :  { %7457 = vmatpush3.bf16.msra.mxu1 %v9071_v41  ;;  %7460 = vmatprep.mubr.msk.bf16.mxu1 %vm7934_vm1, %v7933_v0  ;;  %v9282_v41 = vld [vmem:[%s9487_s4 + $0x18] sm:$0xff]  }
 0x7da   :  { %v7818_v46 = vpop.eup %7817  ;;  %7458 = vmatprep.subr.bf16.mxu1 %v7933_v0 }
 0x7db   :  { %v7820_v24 = vpop.eup %7819 }
 0x7dc   :  { %v4886_v25 = vmul.f32 %v7820_v24, %v7818_v46 }
 0x7dd   :  { %7459 = vmatpush3.bf16.msra.mxu1 %v9080_v39  ;;  %v9295_v39 = vld [vmem:[%s9487_s4 + $0x10] sm:$0xff]  }
 0x7de   :  { %v4887_v5 = vpack.c.bf16 %v4886_v25, %v4886_v25  ;;  %7470 = vmatprep.subr.bf16.mxu1 %v7933_v0 }
 0x7e0   :  { %7405 = vmatmul.mubr.msk.bf16.vlgmr.msra.gmra.mxu0 %vm130_vm3, %v4887_v5  ;;  %7461 = vmatmul.mubr.msk.bf16.vlgmr.msra.gmra.mxu1 %vm130_vm3, %v4887_v5 }
 0x7e1   :  { %7417 = vmatpush3.bf16.msra.mxu0 %v9282_v41  ;;  %7471 = vmatpush3.bf16.msra.mxu1 %v9090_v20  ;;  %v9306_v20 = vld [vmem:[%s9487_s4 + $0x28] sm:$0xff]  }
 0x7e2   :  { %7418 = vmatprep.subr.bf16.mxu0 %v7933_v0  ;;  %7472 = vmatprep.subr.bf16.mxu1 %v7933_v0 }
 0x7e3   :  { %7420 = vmatprep.mubr.msk.bf16.mxu0 %vm7934_vm1, %v7933_v0  ;;  %7474 = vmatprep.mubr.msk.bf16.mxu1 %vm7934_vm1, %v7933_v0 }
 0x7e5   :  { %7419 = vmatpush3.bf16.msra.mxu0 %v9295_v39  ;;  %7473 = vmatpush3.bf16.msra.mxu1 %v9103_v43  ;;  %v9319_v43 = vld [vmem:[%s9487_s4 + $0x20] sm:$0xff]  }
 0x7e6   :  { %7432 = vmatprep.subr.bf16.mxu0 %v7933_v0  ;;  %7484 = vmatprep.subr.bf16.mxu1 %v7933_v0 }
 0x7e8   :  { %7421 = vmatmul.mubr.msk.bf16.vlgmr.msra.gmra.mxu0 %vm130_vm3, %v4887_v5  ;;  %7475 = vmatmul.mubr.msk.bf16.vlgmr.msra.gmra.mxu1 %vm130_vm3, %v4887_v5 }
 0x7e9   :  { %7433 = vmatpush3.bf16.msra.mxu0 %v9306_v20  ;;  %7485 = vmatpush3.bf16.msra.mxu1 %v9114_v12  ;;  %v9330_v12 = vld [vmem:[%s9487_s4 + $0x38] sm:$0xff]  }
 0x7ea   :  { %7434 = vmatprep.subr.bf16.mxu0 %v7933_v0  ;;  %7486 = vmatprep.subr.bf16.mxu1 %v7933_v0 }
 0x7eb   :  { %7436 = vmatprep.mubr.msk.bf16.mxu0 %vm7934_vm1, %v7933_v0  ;;  %7488 = vmatprep.mubr.msk.bf16.mxu1 %vm7934_vm1, %v7933_v0 }
 0x7ed   :  { %7435 = vmatpush3.bf16.msra.mxu0 %v9319_v43  ;;  %7487 = vmatpush3.bf16.msra.mxu1 %v9127_v44  ;;  %v9343_v44 = vld [vmem:[%s9487_s4 + $0x30] sm:$0xff]  }
 0x7ee   :  { %7448 = vmatprep.subr.bf16.mxu0 %v7933_v0  ;;  %7498 = vmatprep.subr.bf16.mxu1 %v7933_v0 }
 0x7f0   :  { %7437 = vmatmul.mubr.msk.bf16.vlgmr.msra.gmra.mxu0 %vm130_vm3, %v4887_v5  ;;  %7489 = vmatmul.mubr.msk.bf16.vlgmr.msra.gmra.mxu1 %vm130_vm3, %v4887_v5 }
 0x7f1   :  { %7449 = vmatpush3.bf16.msra.mxu0 %v9330_v12  ;;  %7499 = vmatpush3.bf16.msra.mxu1 %v9138_v47  ;;  %v6235_v47 = vld [vmem:[%s9485_s0 + $0x38] sm:$0xff] }
 0x7f2   :  { %7450 = vmatprep.subr.bf16.mxu0 %v7933_v0  ;;  %7500 = vmatprep.subr.bf16.mxu1 %v7933_v0 }
 0x7f3   :  { %7452 = vmatprep.mubr.msk.bf16.mxu0 %vm7934_vm1, %v7933_v0  ;;  %7502 = vmatprep.mubr.msk.bf16.mxu1 %vm7934_vm1, %v7933_v0 }
 0x7f5   :  { %7451 = vmatpush3.bf16.msra.mxu0 %v9343_v44  ;;  %7501 = vmatpush3.bf16.msra.mxu1 %v9151_v60  ;;  %v5245_v60 = vpack.c.bf16 %v6235_v47, %v6235_v47 }
 0x7f6   :  { %7464 = vmatprep.subr.bf16.mxu0 %v7933_v0  ;;  %7512 = vmatprep.subr.bf16.mxu1 %v7933_v0 }
 0x7f8   :  { %7453 = vmatmul.mubr.msk.bf16.vlgmr.msra.gmra.mxu0 %vm130_vm3, %v4887_v5  ;;  %7503 = vmatmul.mubr.msk.bf16.vlgmr.msra.gmra.mxu1 %vm130_vm3, %v4887_v5 }
 0x7f9   :  { %7465 = vmatpush3.bf16.msra.mxu0 %v7992_v2  ;;  %7466 = vmatprep.mubr.msk.bf16.mxu0 %vm7934_vm1, %v7933_v0 }
 0x7fa   :  { %7478 = vmatprep.subr.bf16.mxu0 %v7933_v0  ;;  %7513 = vmatpush3.bf16.msra.mxu1 %v9168_v62 }
 0x7fb   :  { %7514 = vmatprep.subr.bf16.mxu1 %v7933_v0  ;;  %7516 = vmatprep.mubr.msk.bf16.mxu1 %vm7934_vm1, %v7933_v0 }
 0x7fe   :  { %7515 = vmatpush3.bf16.msra.mxu1 %v9177_v3 }
 0x7ff   :  { %7528 = vmatprep.subr.bf16.mxu1 %v7933_v0 }
 0x800   :  { %7467 = vmatmul.mubr.msk.bf16.vlgmr.msra.gmra.mxu0 %vm174_vm2, %v5245_v60 }
 0x801   :  { %7479 = vmatpush3.bf16.msra.mxu0 %v8036_v10  ;;  %7480 = vmatprep.mubr.msk.bf16.mxu0 %vm7934_vm1, %v7933_v0 }
 0x802   :  { %7492 = vmatprep.subr.bf16.mxu0 %v7933_v0 }
 0x808   :  { %7481 = vmatmul.mubr.msk.bf16.vlgmr.msra.gmra.mxu0 %vm174_vm2, %v5245_v60 }
 0x809   :  { %7493 = vmatpush3.bf16.msra.mxu0 %v8064_v15  ;;  %7494 = vmatprep.mubr.msk.bf16.mxu0 %vm7934_vm1, %v7933_v0 }
 0x80a   :  { %7506 = vmatprep.subr.bf16.mxu0 %v7933_v0 }
 0x810   :  { %7495 = vmatmul.mubr.msk.bf16.vlgmr.msra.gmra.mxu0 %vm174_vm2, %v5245_v60 }
 0x811   :  { %7507 = vmatpush3.bf16.msra.mxu0 %v8092_v19  ;;  %7508 = vmatprep.mubr.msk.bf16.mxu0 %vm7934_vm1, %v7933_v0 }
 0x812   :  { %7520 = vmatprep.subr.bf16.mxu0 %v7933_v0 }
 0x818   :  { %7509 = vmatmul.mubr.msk.bf16.vlgmr.msra.gmra.mxu0 %vm174_vm2, %v5245_v60 }
 0x819   :  { %7521 = vmatpush3.bf16.msra.mxu0 %v9200_v16  ;;  %7524 = vmatprep.mubr.msk.bf16.mxu0 %vm7934_vm1, %v7933_v0 }
 0x81a   :  { %7522 = vmatprep.subr.bf16.mxu0 %v7933_v0 }
 0x81d   :  { %7523 = vmatpush3.bf16.msra.mxu0 %v9209_v32 }
 0x81e   :  { %7536 = vmatprep.subr.bf16.mxu0 %v7933_v0 }
 0x880   :  { %v4926_v2 = vpop.f32.mrf.mxu1 }
 0x882   :  { %v7398_v10 = vpop.f32.mrf.mxu1 }
 0x884   :  { %v4929_v15 = vpop.f32.mrf.mxu1 }
 0x886   :  { %v7399_v19 = vpop.f32.mrf.mxu1 }
 0x888   :  { %v5016_v62 = vpop.f32.mrf.mxu1 }
 0x88a   :  { %v7414_v3 = vpop.f32.mrf.mxu1 }
 0x88c   :  { %v5019_v38 = vpop.f32.mrf.mxu1 }
 0x88e   :  { %v7415_v53 = vpop.f32.mrf.mxu1 }
 0x890   :  { %v5103_v14 = vpop.f32.mrf.mxu1 }
 0x892   :  { %v7430_v21 = vpop.f32.mrf.mxu1 }
 0x894   :  { %v5106_v16 = vpop.f32.mrf.mxu1 }
 0x895   :  { %v9401_v16 = vld [vmem:[%s9489_s6 + $0x10] sm:$0xff] }
 0x896   :  { %v7431_v36 = vpop.f32.mrf.mxu1 }
 0x898   :  { %v5185_v11 = vpop.f32.mrf.mxu1 }
 0x89a   :  { %v7446_v26 = vpop.f32.mrf.mxu1 }
 0x89c   :  { %v5188_v23 = vpop.f32.mrf.mxu1 }
 0x89e   :  { %v7447_v4 = vpop.f32.mrf.mxu1 }
 0x89f   :  { %v9407_v4 = vld [vmem:[%s9489_s6 + $0x18] sm:$0xff] }
 0x8a0   :  { %v4969_v58 = vpop.f32.mrf.mxu0  ;;  %v5280_v32 = vpop.f32.mrf.mxu1 }
 0x8a1   :  { %v4970_v29 = vadd.f32 %v4969_v58, %v4926_v2 }
 0x8a2   :  { %v7406_v52 = vpop.f32.mrf.mxu0  ;;  %v7462_v61 = vpop.f32.mrf.mxu1 }
 0x8a3   :  { %v4975_v42 = vadd.f32 %v9389_v40, %v4970_v29 }
 0x8a4   :  { %v4972_v1 = vpop.f32.mrf.mxu0  ;;  %v5283_v51 = vpop.f32.mrf.mxu1 }
 0x8a5   :  { %v6226_v22 = vmul.f32 -1.442695, %v4975_v42 }
 0x8a6   :  { %v7407_v17 = vpop.f32.mrf.mxu0  ;;  %v7463_v49 = vpop.f32.mrf.mxu1 }
 0x8a7   :  { %7821 = vpow2.f32 %v6226_v22 }
 0x8a8   :  { %v5056_v9 = vpop.f32.mrf.mxu0  ;;  %v5370_v63 = vpop.f32.mrf.mxu1 }
 0x8a9   :  { %v5057_v7 = vadd.f32 %v5056_v9, %v5016_v62 }
 0x8aa   :  { %v7422_v8 = vpop.f32.mrf.mxu0  ;;  %v7476_v30 = vpop.f32.mrf.mxu1 }
 0x8ab   :  { %v5062_v35 = vadd.f32 %v9395_v50, %v5057_v7 }
 0x8ac   :  { %v5059_v59 = vpop.f32.mrf.mxu0  ;;  %v5373_v45 = vpop.f32.mrf.mxu1 }
 0x8ad   :  { %v6229_v48 = vmul.f32 -1.442695, %v5062_v35 }
 0x8ae   :  { %v7423_v55 = vpop.f32.mrf.mxu0  ;;  %v7477_v46 = vpop.f32.mrf.mxu1 }
 0x8af   :  { %7823 = vpow2.f32 %v6229_v48 }
 0x8b0   :  { %v5143_v24 = vpop.f32.mrf.mxu0  ;;  %v5457_v25 = vpop.f32.mrf.mxu1 }
 0x8b1   :  { %v5144_v15 = vadd.f32 %v5143_v24, %v5103_v14 }
 0x8b2   :  { %v7438_v5 = vpop.f32.mrf.mxu0  ;;  %v7490_v47 = vpop.f32.mrf.mxu1 }
 0x8b3   :  { %v5149_v36 = vadd.f32 %v9401_v16, %v5144_v15 }
 0x8b4   :  { %v5146_v60 = vpop.f32.mrf.mxu0  ;;  %v5460_v2 = vpop.f32.mrf.mxu1 }
 0x8b5   :  { %v7822_v10 = vpop.eup %7821 }
 0x8b6   :  { %v7439_v19 = vpop.f32.mrf.mxu0  ;;  %v7491_v62 = vpop.f32.mrf.mxu1  ;;  %v4979_v53 = vadd.f32 1.0, %v7822_v10 }
 0x8b8   :  { %v5225_v3 = vpop.f32.mrf.mxu0  ;;  %v5539_v38 = vpop.f32.mrf.mxu1  ;;  %7825 = vrcp.f32 %v4979_v53 }
 0x8b9   :  { %v5226_v21 = vadd.f32 %v5225_v3, %v5185_v11  ;;  %7827 = vtanh.f32 %v5149_v36 }
 0x8ba   :  { %v7454_v26 = vpop.f32.mrf.mxu0  ;;  %v7504_v23 = vpop.f32.mrf.mxu1 }
 0x8bb   :  { %v5231_v14 = vadd.f32 %v9407_v4, %v5226_v21 }
 0x8bc   :  { %v7824_v58 = vpop.eup %7823  ;;  %v5228_v29 = vpop.f32.mrf.mxu0 }
 0x8bd   :  { %v5542_v52 = vpop.f32.mrf.mxu1  ;;  %v5066_v11 = vadd.f32 1.0, %v7824_v58  ;;  %v6234_v61 = vmul.f32 -1.442695, %v5231_v14 }
 0x8be   :  { %v7455_v42 = vpop.f32.mrf.mxu0 }
 0x8bf   :  { %v7505_v1 = vpop.f32.mrf.mxu1  ;;  %7829 = vrcp.f32 %v5066_v11 }
 0x8c0   :  { %7831 = vpow2.f32 %v6234_v61  ;;  %v5323_v51 = vpop.f32.mrf.mxu0 }
 0x8c1   :  { %v5324_v22 = vadd.f32 %v5323_v51, %v5280_v32 }
 0x8c2   :  { %v7468_v17 = vpop.f32.mrf.mxu0 }
 0x8c3   :  { %v5329_v49 = vadd.f32 %v9220_v27, %v5324_v22 }
 0x8c4   :  { %v5326_v9 = vpop.f32.mrf.mxu0 }
 0x8c5   :  { %v6238_v7 = vmul.f32 -1.442695, %v5329_v49  ;;  %v7826_v59 = vpop.eup %7825 }
 0x8c6   :  { %v7469_v8 = vpop.f32.mrf.mxu0  ;;  %v7828_v48 = vpop.eup %7827 }
 0x8c7   :  { %7833 = vpow2.f32 %v6238_v7  ;;  %v5239_v32 = vmul.f32 %v7828_v48, %v7826_v59 }
 0x8c8   :  { %v5410_v30 = vpop.f32.mrf.mxu0 }
 0x8c9   :  { %v5411_v35 = vadd.f32 %v5410_v30, %v5370_v63 }
 0x8ca   :  { %v7482_v45 = vpop.f32.mrf.mxu0 }
 0x8cb   :  { %v5416_v55 = vadd.f32 %v9226_v37, %v5411_v35 }
 0x8cc   :  { %v7830_v46 = vpop.eup %7829  ;;  %v5413_v24 = vpop.f32.mrf.mxu0 }
 0x8cd   :  { %v7832_v5 = vpop.eup %7831  ;;  %v5238_v47 = vmul.f32 %v7830_v46, %v9230_v34  ;;  %v6241_v60 = vmul.f32 -1.442695, %v5416_v55 }
 0x8ce   :  { %v5235_v2 = vadd.f32 1.0, %v7832_v5  ;;  %v7483_v27 = vpop.f32.mrf.mxu0 }
 0x8cf   :  { %v9413_v10 = vadd.f32 %v5239_v32, %v5238_v47  ;;  %7835 = vpow2.f32 %v6241_v60 }
 0x8d0   :  { %7837 = vrcp.f32 %v5235_v2  ;;  %v5497_v15 = vpop.f32.mrf.mxu0 }
 0x8d1   :  { %7839 = vtanh.f32 %v9413_v10  ;;  %v5498_v37 = vadd.f32 %v5497_v15, %v5457_v25 }
 0x8d2   :  { %v7496_v63 = vpop.f32.mrf.mxu0 }
 0x8d3   :  { %v5503_v34 = vadd.f32 %v9236_v54, %v5498_v37 }
 0x8d4   :  { %v5500_v19 = vpop.f32.mrf.mxu0  ;;  %v7834_v62 = vpop.eup %7833 }
 0x8d5   :  { %v5333_v21 = vadd.f32 1.0, %v7834_v62 }
 0x8d6   :  { %v7497_v3 = vpop.f32.mrf.mxu0 }
 0x8d7   :  { %7841 = vrcp.f32 %v5333_v21 }
 0x8d8   :  { %v5579_v53 = vpop.f32.mrf.mxu0  ;;  %7843 = vtanh.f32 %v5503_v34 }
 0x8d9   :  { %v5580_v36 = vadd.f32 %v5579_v53, %v5539_v38 }
 0x8da   :  { %v7510_v26 = vpop.f32.mrf.mxu0 }
 0x8db   :  { %v5585_v23 = vadd.f32 %v9242_v57, %v5580_v36 }
 0x8dc   :  { %v7836_v14 = vpop.eup %7835  ;;  %v5582_v58 = vpop.f32.mrf.mxu0 }
 0x8dd   :  { %v7838_v29 = vpop.eup %7837  ;;  %v5420_v52 = vadd.f32 1.0, %v7836_v14  ;;  %v6246_v11 = vmul.f32 -1.442695, %v5585_v23 }
 0x8de   :  { %v7840_v61 = vpop.eup %7839  ;;  %v7511_v42 = vpop.f32.mrf.mxu0 }
 0x8df   :  { %7845 = vrcp.f32 %v5420_v52  ;;  %v5242_v25 = vmul.f32 %v7840_v61, %v7838_v29 }
 0x8e0   :  { %7847 = vpow2.f32 %v6246_v11 }
 0x8e1   :  { %v5598_v1 = vpack.c.bf16 %v5242_v25, %v5242_v25 }
 0x8e3   :  { %7517 = vmatmul.mubr.msk.bf16.vlgmr.msra.gmra.mxu1 %vm130_vm3, %v5598_v1 }
 0x8e4   :  { %7529 = vmatpush3.bf16.msra.mxu1 %v9016_v6  ;;  %7532 = vmatprep.mubr.msk.bf16.mxu1 %vm7934_vm1, %v7933_v0  ;;  %v7842_v54 = vpop.eup %7841 }
 0x8e5   :  { %7530 = vmatprep.subr.bf16.mxu1 %v7933_v0  ;;  %v7844_v57 = vpop.eup %7843 }
 0x8e6   :  { %v5593_v22 = vmul.f32 %v7844_v57, %v7842_v54 }
 0x8e8   :  { %7531 = vmatpush3.bf16.msra.mxu1 %v9025_v18 }
 0x8e9   :  { %7544 = vmatprep.subr.bf16.mxu1 %v7933_v0 }
 0x8eb   :  { %7533 = vmatmul.mubr.msk.bf16.vlgmr.msra.gmra.mxu1 %vm130_vm3, %v5598_v1 }
 0x8ec   :  { %v7846_v38 = vpop.eup %7845  ;;  %7545 = vmatpush3.bf16.msra.mxu1 %v9033_v31  ;;  %7548 = vmatprep.mubr.msk.bf16.mxu1 %vm7934_vm1, %v7933_v0 }
 0x8ed   :  { %v7848_v6 = vpop.eup %7847  ;;  %v5592_v51 = vmul.f32 %v7846_v38, %v9258_v56  ;;  %7546 = vmatprep.subr.bf16.mxu1 %v7933_v0 }
 0x8ee   :  { %v5589_v17 = vadd.f32 1.0, %v7848_v6 }
 0x8ef   :  { %v5594_v18 = vadd.f32 %v5593_v22, %v5592_v51 }
 0x8f0   :  { %7849 = vrcp.f32 %v5589_v17  ;;  %7547 = vmatpush3.bf16.msra.mxu1 %v9045_v28 }
 0x8f1   :  { %7851 = vtanh.f32 %v5594_v18  ;;  %7560 = vmatprep.subr.bf16.mxu1 %v7933_v0 }
 0x8f3   :  { %7549 = vmatmul.mubr.msk.bf16.vlgmr.msra.gmra.mxu1 %vm130_vm3, %v5598_v1 }
 0x8f4   :  { %7561 = vmatpush3.bf16.msra.mxu1 %v9054_v13  ;;  %7564 = vmatprep.mubr.msk.bf16.mxu1 %vm7934_vm1, %v7933_v0  ;;  %v7611_v13 = vld [vmem:[%s9490_s7 + $0x8] sm:$0xff]  }
 0x8f5   :  { %7562 = vmatprep.subr.bf16.mxu1 %v7933_v0 }
 0x8f8   :  { %7563 = vmatpush3.bf16.msra.mxu1 %v9063_v33  ;;  %v7612_v33 = vld [vmem:[%s9490_s7] sm:$0xff]  }
 0x8f9   :  { %7576 = vmatprep.subr.bf16.mxu1 %v7933_v0 }
 0x8fb   :  { %7565 = vmatmul.mubr.msk.bf16.vlgmr.msra.gmra.mxu1 %vm130_vm3, %v5598_v1 }
 0x8fc   :  { %7580 = vmatprep.mubr.msk.bf16.mxu1 %vm7934_vm1, %v7933_v0  ;;  %7577 = vmatpush3.bf16.msra.mxu1 %v7611_v13 }
 0x8fd   :  { %v7850_v31 = vpop.eup %7849  ;;  %7578 = vmatprep.subr.bf16.mxu1 %v7933_v0 }
 0x8fe   :  { %v7852_v28 = vpop.eup %7851 }
 0x8ff   :  { %v5596_v56 = vmul.f32 %v7852_v28, %v7850_v31 }
 0x900   :  { %7579 = vmatpush3.bf16.msra.mxu1 %v7612_v33 }
 0x901   :  { %v5597_v49 = vpack.c.bf16 %v5596_v56, %v5596_v56  ;;  %v115_v56 = vld [vmem:[%s9491_s8] sm:$0xff] }
 0x903   :  { %7525 = vmatmul.mubr.msk.bf16.vlgmr.msra.gmra.mxu0 %vm130_vm3, %v5597_v49 }
 0x904   :  { %7537 = vmatpush3.bf16.msra.mxu0 %v9282_v41  ;;  %7540 = vmatprep.mubr.msk.bf16.mxu0 %vm7934_vm1, %v7933_v0 }
 0x905   :  { %7538 = vmatprep.subr.bf16.mxu0 %v7933_v0 }
 0x908   :  { %7539 = vmatpush3.bf16.msra.mxu0 %v9295_v39 }
 0x909   :  { %7552 = vmatprep.subr.bf16.mxu0 %v7933_v0 }
 0x90b   :  { %7541 = vmatmul.mubr.msk.bf16.vlgmr.msra.gmra.mxu0 %vm130_vm3, %v5597_v49 }
 0x90c   :  { %7553 = vmatpush3.bf16.msra.mxu0 %v9306_v20  ;;  %7556 = vmatprep.mubr.msk.bf16.mxu0 %vm7934_vm1, %v7933_v0 }
 0x90d   :  { %7554 = vmatprep.subr.bf16.mxu0 %v7933_v0 }
 0x910   :  { %7555 = vmatpush3.bf16.msra.mxu0 %v9319_v43 }
 0x911   :  { %7568 = vmatprep.subr.bf16.mxu0 %v7933_v0 }
 0x913   :  { %7557 = vmatmul.mubr.msk.bf16.vlgmr.msra.gmra.mxu0 %vm130_vm3, %v5597_v49 }
 0x914   :  { %7569 = vmatpush3.bf16.msra.mxu0 %v9330_v12  ;;  %7572 = vmatprep.mubr.msk.bf16.mxu0 %vm7934_vm1, %v7933_v0 }
 0x915   :  { %7570 = vmatprep.subr.bf16.mxu0 %v7933_v0 }
 0x918   :  { %7571 = vmatpush3.bf16.msra.mxu0 %v9343_v44 }
 0x91b   :  { %7573 = vmatmul.mubr.msk.bf16.vlgmr.msra.gmra.mxu0 %vm130_vm3, %v5597_v49 }
 0x9a3   :  { %v5636_v41 = vpop.f32.mrf.mxu1 }
 0x9a5   :  { %v7518_v39 = vpop.f32.mrf.mxu1 }
 0x9a7   :  { %v5639_v20 = vpop.f32.mrf.mxu1 }
 0x9a9   :  { %v7519_v43 = vpop.f32.mrf.mxu1 }
 0x9ab   :  { %v5726_v12 = vpop.f32.mrf.mxu1 }
 0x9ad   :  { %v7534_v44 = vpop.f32.mrf.mxu1 }
 0x9af   :  { %v5729_v9 = vpop.f32.mrf.mxu1 }
 0x9b1   :  { %v7535_v7 = vpop.f32.mrf.mxu1 }
 0x9b3   :  { %v5813_v8 = vpop.f32.mrf.mxu1 }
 0x9b5   :  { %v7550_v30 = vpop.f32.mrf.mxu1 }
 0x9b7   :  { %v5816_v35 = vpop.f32.mrf.mxu1 }
 0x9b9   :  { %v7551_v59 = vpop.f32.mrf.mxu1 }
 0x9bb   :  { %v5895_v45 = vpop.f32.mrf.mxu1 }
 0x9bd   :  { %v7566_v48 = vpop.f32.mrf.mxu1 }
 0x9bf   :  { %v5898_v55 = vpop.f32.mrf.mxu1 }
 0x9c1   :  { %v7567_v46 = vpop.f32.mrf.mxu1 }
 0x9c3   :  { %v5679_v24 = vpop.f32.mrf.mxu0 }
 0x9c4   :  { %v5680_v5 = vadd.f32 %v5679_v24, %v5636_v41 }
 0x9c5   :  { %v7526_v0 = vpop.f32.mrf.mxu0 }
 0x9c6   :  { %v5685_v47 = vadd.f32 %v9389_v40, %v5680_v5 }
 0x9c7   :  { %v5682_v32 = vpop.f32.mrf.mxu0 }
 0x9c8   :  { %v6249_v60 = vmul.f32 -1.442695, %v5685_v47 }
 0x9c9   :  { %v7527_v2 = vpop.f32.mrf.mxu0 }
 0x9ca   :  { %7853 = vpow2.f32 %v6249_v60 }
 0x9cb   :  { %v5766_v27 = vpop.f32.mrf.mxu0 }
 0x9cc   :  { %v5767_v15 = vadd.f32 %v5766_v27, %v5726_v12 }
 0x9cd   :  { %v7542_v63 = vpop.f32.mrf.mxu0 }
 0x9ce   :  { %v5772_v19 = vadd.f32 %v9395_v50, %v5767_v15 }
 0x9cf   :  { %v5769_v62 = vpop.f32.mrf.mxu0 }
 0x9d0   :  { %v6252_v37 = vmul.f32 -1.442695, %v5772_v19 }
 0x9d1   :  { %v7543_v3 = vpop.f32.mrf.mxu0 }
 0x9d2   :  { %7855 = vpow2.f32 %v6252_v37 }
 0x9d3   :  { %v5853_v53 = vpop.f32.mrf.mxu0 }
 0x9d4   :  { %v5854_v26 = vadd.f32 %v5853_v53, %v5813_v8 }
 0x9d5   :  { %v7558_v21 = vpop.f32.mrf.mxu0 }
 0x9d6   :  { %v5859_v29 = vadd.f32 %v9401_v16, %v5854_v26 }
 0x9d7   :  { %v5856_v36 = vpop.f32.mrf.mxu0  ;;  %v7854_v34 = vpop.eup %7853 }
 0x9d8   :  { %v5689_v14 = vadd.f32 1.0, %v7854_v34 }
 0x9d9   :  { %v7559_v23 = vpop.f32.mrf.mxu0 }
 0x9da   :  { %7857 = vrcp.f32 %v5689_v14 }
 0x9db   :  { %v5935_v40 = vpop.f32.mrf.mxu0  ;;  %7859 = vtanh.f32 %v5859_v29 }
 0x9dc   :  { %v5936_v58 = vadd.f32 %v5935_v40, %v5895_v45 }
 0x9dd   :  { %v7574_v52 = vpop.f32.mrf.mxu0 }
 0x9de   :  { %v5941_v11 = vadd.f32 %v9407_v4, %v5936_v58 }
 0x9df   :  { %v7856_v61 = vpop.eup %7855  ;;  %v5938_v50 = vpop.f32.mrf.mxu0 }
 0x9e0   :  { %v5776_v42 = vadd.f32 1.0, %v7856_v61  ;;  %v6257_v25 = vmul.f32 -1.442695, %v5941_v11 }
 0x9e1   :  { %v7575_v1 = vpop.f32.mrf.mxu0 }
 0x9e2   :  { %7861 = vrcp.f32 %v5776_v42 }
 0x9e3   :  { %7863 = vpow2.f32 %v6257_v25 }
 0x9e7   :  { %v7858_v54 = vpop.eup %7857 }
 0x9e8   :  { %v7860_v57 = vpop.eup %7859 }
 0x9e9   :  { %v5949_v22 = vmul.f32 %v7860_v57, %v7858_v54 }
 0x9ef   :  { %v7862_v38 = vpop.eup %7861 }
 0x9f0   :  { %v7864_v6 = vpop.eup %7863  ;;  %v5948_v51 = vmul.f32 %v7862_v38, %v9413_v10 }
 0x9f1   :  { %v5945_v16 = vadd.f32 1.0, %v7864_v6 }
 0x9f2   :  { %v5950_v17 = vadd.f32 %v5949_v22, %v5948_v51 }
 0x9f3   :  { %7865 = vrcp.f32 %v5945_v16 }
 0x9f4   :  { %7867 = vtanh.f32 %v5950_v17 }
 0xa00   :  { %v7866_v4 = vpop.eup %7865 }
 0xa01   :  { %v7868_v18 = vpop.eup %7867 }
 0xa02   :  { %v5952_v31 = vmul.f32 %v7868_v18, %v7866_v4 }
 0xa04   :  { %v5953_v28 = vpack.c.bf16 %v5952_v31, %v5952_v31 }
 0xa06   :  { %7581 = vmatmul.mubr.msk.bf16.vlgmr.msra.gmra.mxu1 %vm130_vm3, %v5953_v28 }
 0xac6   :  { %v6003_v49 = vpop.f32.mrf.mxu1 }
 0xac7   :  { %v6004_v13 = vadd.f32 %v6003_v49, %v115_v56 }
 0xac8   :  { %v7582_v33 = vpop.f32.mrf.mxu1 }
 0xac9   :  { %6009 = vst [vmem:[%s9492_s9] sm:$0xff] %v6004_v13 }
 0xaca   :  { %v6006_v10 = vpop.f32.mrf.mxu1 }
 0xacc   :  { %v7583_v41 = vpop.f32.mrf.mxu1 }

</bundles_post_ra>
